<compile_context>
chip_gen: v7x
topology: tpu7x:2x2x1
jax: 0.10.0
libtpu: 0.0.40
codegen_flags: <defaults>
</compile_context>

<pallas_src>
import functools

import jax
import jax.numpy as jnp
from jax.experimental import pallas as pl
from jax.experimental.pallas import tpu as pltpu


def _round_up(x, m):
    return (x + m - 1) // m * m


def _bilstm_kernel(len_ref, emb_ref,
                   wih_f_ref, whh_f_ref, b_f_ref,
                   wih_b_ref, whh_b_ref, b_b_ref,
                   out_ref, hfin_ref,
                   xpf_ref, xpb_ref,
                   *, T, Bp, Hp):
    """Bidirectional LSTM, time-major, masked by lengths.

    Shapes (all padded):
      emb_ref   : (T*Bp, E)      bf16
      wih_*     : (E, 4*Hp)      bf16   (gate order [i, f, g, o], gate-padded)
      whh_*     : (Hp, 4*Hp)     bf16
      b_*       : (1, 4*Hp)      f32    (b_ih + b_hh, gate-padded)
      out_ref   : (T, Bp, 2*Hp)  f32    (fwd in lanes [0,Hp), bwd in [Hp,2Hp))
      hfin_ref  : (Bp, 2*Hp)     f32
      xp*_ref   : (T*Bp, 4*Hp)   f32    VMEM scratch (hoisted input projection)
    """
    lens = len_ref[...]                                   # (Bp, 1) int32

    # ---- hoisted input projection: one big MXU matmul per direction ----
    x2d = emb_ref[...]                                    # (T*Bp, E) bf16
    xpf_ref[...] = (jnp.dot(x2d, wih_f_ref[...],
                            preferred_element_type=jnp.float32) + b_f_ref[...])
    xpb_ref[...] = (jnp.dot(x2d, wih_b_ref[...],
                            preferred_element_type=jnp.float32) + b_b_ref[...])

    def gate_math(gates, c):
        # All slices are at multiples of Hp = 128 -> vreg-aligned.
        i = jax.nn.sigmoid(gates[:, 0 * Hp:1 * Hp])
        f = jax.nn.sigmoid(gates[:, 1 * Hp:2 * Hp])
        g = jnp.tanh(gates[:, 2 * Hp:3 * Hp])
        o = jax.nn.sigmoid(gates[:, 3 * Hp:4 * Hp])
        c_new = f * c + i * g
        h_new = o * jnp.tanh(c_new)
        return h_new, c_new

    zeros = jnp.zeros((Bp, Hp), jnp.float32)
    hf, cf, hb, cb = zeros, zeros, zeros, zeros

    # Interleaved forward + backward recurrence, fully unrolled (T is static).
    for s in range(T):
        tf = s                 # forward timestep
        tb = T - 1 - s         # backward timestep

        gates_f = (xpf_ref[tf * Bp:(tf + 1) * Bp, :]
                   + jnp.dot(hf.astype(jnp.bfloat16), whh_f_ref[...],
                             preferred_element_type=jnp.float32))
        gates_b = (xpb_ref[tb * Bp:(tb + 1) * Bp, :]
                   + jnp.dot(hb.astype(jnp.bfloat16), whh_b_ref[...],
                             preferred_element_type=jnp.float32))

        hf_new, cf_new = gate_math(gates_f, cf)
        hb_new, cb_new = gate_math(gates_b, cb)

        mask_f = tf < lens                                # (Bp, 1) bool
        mask_b = tb < lens

        hf = jnp.where(mask_f, hf_new, hf)
        cf = jnp.where(mask_f, cf_new, cf)
        hb = jnp.where(mask_b, hb_new, hb)
        cb = jnp.where(mask_b, cb_new, cb)

        # Lane-dense, vreg-aligned 128-wide stores; padded steps -> 0.
        out_ref[tf, :, 0:Hp] = jnp.where(mask_f, hf_new, 0.0)
        out_ref[tb, :, Hp:2 * Hp] = jnp.where(mask_b, hb_new, 0.0)

    hfin_ref[:, 0:Hp] = hf
    hfin_ref[:, Hp:2 * Hp] = hb


def rnn_encoder_forward(captions, cap_lens, params):
    """captions: (B, T) int32, cap_lens: (B,) int32. Returns (words_emb, sent_emb)."""
    emb_table = params["embedding"]                       # (ntoken, E)
    B, T = captions.shape
    E = emb_table.shape[1]
    H = params["wih_f"].shape[1] // 4
    Hp = _round_up(H, 128)                                # lane-tile padded hidden
    Bp = _round_up(B, 8)                                  # f32 sublane-tile padded batch

    # Build the time-major embedding directly; dropout is identity (eval).
    emb_tm = jnp.take(emb_table, captions.T, axis=0)      # (T, B, E)
    emb_tm = jnp.pad(emb_tm, ((0, 0), (0, Bp - B), (0, 0)))
    emb2d = emb_tm.reshape(T * Bp, E).astype(jnp.bfloat16)

    lens = jnp.pad(cap_lens.astype(jnp.int32), (0, Bp - B)).reshape(Bp, 1)

    # Pad each gate block [i,f,g,o] from width H to Hp so gate boundaries are
    # vreg-aligned; padded columns/rows are zero so padded hidden lanes stay 0.
    def pad_gates(w):                                     # (K, 4H) -> (K, 4Hp)
        out = jnp.zeros((w.shape[0], 4 * Hp), w.dtype)
        for g in range(4):
            out = out.at[:, g * Hp:g * Hp + H].set(w[:, g * H:(g + 1) * H])
        return out

    def pad_whh(w):                                       # (H, 4H) -> (Hp, 4Hp)
        return jnp.zeros((Hp, 4 * Hp), w.dtype).at[:H].set(pad_gates(w))

    wih_f = pad_gates(params["wih_f"]).astype(jnp.bfloat16)
    wih_b = pad_gates(params["wih_b"]).astype(jnp.bfloat16)
    whh_f = pad_whh(params["whh_f"]).astype(jnp.bfloat16)
    whh_b = pad_whh(params["whh_b"]).astype(jnp.bfloat16)
    b_f = pad_gates(params["b_f"])                        # (1, 4Hp) f32
    b_b = pad_gates(params["b_b"])

    vmem = pl.BlockSpec(memory_space=pltpu.MemorySpace.VMEM)
    kernel = functools.partial(_bilstm_kernel, T=T, Bp=Bp, Hp=Hp)

    out, hfin = pl.pallas_call(
        kernel,
        out_shape=(jax.ShapeDtypeStruct((T, Bp, 2 * Hp), jnp.float32),
                   jax.ShapeDtypeStruct((Bp, 2 * Hp), jnp.float32)),
        in_specs=[vmem] * 8,
        out_specs=(vmem, vmem),
        scratch_shapes=[pltpu.VMEM((T * Bp, 4 * Hp), jnp.float32),
                        pltpu.VMEM((T * Bp, 4 * Hp), jnp.float32)],
    )(lens, emb2d, wih_f, whh_f, b_f, wih_b, whh_b, b_b)

    # Un-pad and convert back to PyTorch conventions.
    out_fwd = out[:, :B, :H]                              # (T, B, H)
    out_bwd = out[:, :B, Hp:Hp + H]                       # (T, B, H)
    output = jnp.concatenate([out_fwd, out_bwd], axis=-1)  # (T, B, 2H)
    words_emb = jnp.transpose(output, (1, 2, 0))           # (B, 2H, T)
    sent_emb = jnp.concatenate([hfin[:B, :H], hfin[:B, Hp:Hp + H]], axis=-1)
    return words_emb, sent_emb


def _ref_forward(captions, cap_lens, params):
    """Pure-JAX f32 reference for correctness checking."""
    emb = jnp.take(params["embedding"], captions, axis=0)  # (B, T, E)
    B, T, _ = emb.shape
    H = params["wih_f"].shape[1] // 4

    def run_dir(wih, whh, b, reverse):
        h = jnp.zeros((B, H), jnp.float32)
        c = jnp.zeros((B, H), jnp.float32)
        outs = [None] * T
        order = range(T - 1, -1, -1) if reverse else range(T)
        for t in order:
            x = emb[:, t, :]
            gates = x @ wih + h @ whh + b
            i = jax.nn.sigmoid(gates[:, :H])
            f = jax.nn.sigmoid(gates[:, H:2 * H])
            g = jnp.tanh(gates[:, 2 * H:3 * H])
            o = jax.nn.sigmoid(gates[:, 3 * H:4 * H])
            c_new = f * c + i * g
            h_new = o * jnp.tanh(c_new)
            mask = (t < cap_lens)[:, None]
            h = jnp.where(mask, h_new, h)
            c = jnp.where(mask, c_new, c)
            outs[t] = jnp.where(mask, h_new, 0.0)
        return jnp.stack(outs, axis=1), h                  # (B, T, H), (B, H)

    of, hf = run_dir(params["wih_f"], params["whh_f"], params["b_f"], False)
    ob, hb = run_dir(params["wih_b"], params["whh_b"], params["b_b"], True)
    out = jnp.concatenate([of, ob], axis=-1)               # (B, T, 2H)
    return jnp.transpose(out, (0, 2, 1)), jnp.concatenate([hf, hb], axis=-1)


def _init_params(key, ntoken, E, H):
    """Deterministic init matching PyTorch shapes (weights stored transposed)."""
    k = 1.0 / jnp.sqrt(jnp.float32(H))
    keys = jax.random.split(key, 13)
    u = lambda kk, shape, lim: jax.random.uniform(kk, shape, jnp.float32, -lim, lim)
    params = {
        # nn.Embedding(ntoken, ninput).weight.uniform_(-0.1, 0.1)
        "embedding": u(keys[0], (ntoken, E), 0.1),
        # forward direction: weight_ih_l0 (4H,E) -> stored (E,4H); bias = b_ih + b_hh
        "wih_f": u(keys[1], (E, 4 * H), k),
        "whh_f": u(keys[2], (H, 4 * H), k),
        "b_f": u(keys[3], (1, 4 * H), k) + u(keys[4], (1, 4 * H), k),
        # backward direction (..._reverse)
        "wih_b": u(keys[5], (E, 4 * H), k),
        "whh_b": u(keys[6], (H, 4 * H), k),
        "b_b": u(keys[7], (1, 4 * H), k) + u(keys[8], (1, 4 * H), k),
    }
    return params


if __name__ == "__main__":
    # Module config (small): ntoken=50, words_num(T)=8, ninput(E)=128,
    # nhidden=128 total, bidirectional -> per-direction H=64, nlayers=1, batch B=4.
    ntoken, T, E, H_total, B = 50, 8, 128, 128, 4
    H = H_total // 2

    key = jax.random.PRNGKey(0)
    k_cap, k_par = jax.random.split(key)
    captions = jax.random.randint(k_cap, (B, T), 0, ntoken, dtype=jnp.int32)
    cap_lens = jnp.array([8, 6, 5, 3], dtype=jnp.int32)
    params = _init_params(k_par, ntoken, E, H)

    fwd = jax.jit(rnn_encoder_forward)
    words_emb, sent_emb = fwd(captions, cap_lens, params)
    jax.block_until_ready((words_emb, sent_emb))

    assert words_emb.shape == (B, H_total, T)
    assert sent_emb.shape == (B, H_total)

    # Correctness check against a pure-JAX f32 reference. Tolerance widened to
    # 2e-2 because matmul operands are bf16 (f32 accumulation / elementwise);
    # observed/expected drift is well below this.
    ref_words, ref_sent = _ref_forward(captions, cap_lens, params)
    assert jnp.allclose(words_emb, ref_words, atol=2e-2, rtol=2e-2)
    assert jnp.allclose(sent_emb, ref_sent, atol=2e-2, rtol=2e-2)

    print("KERNEL_OK")
</pallas_src>

<mosaic_0001>
module attributes {stable_mosaic.version = 11 : i64} {
  func.func @_bilstm_kernel(%arg0: memref<8x1xi32, #tpu.memory_space<vmem>>, %arg1: memref<64x128xbf16, #tpu.memory_space<vmem>>, %arg2: memref<128x512xbf16, #tpu.memory_space<vmem>>, %arg3: memref<128x512xbf16, #tpu.memory_space<vmem>>, %arg4: memref<1x512xf32, #tpu.memory_space<vmem>>, %arg5: memref<128x512xbf16, #tpu.memory_space<vmem>>, %arg6: memref<128x512xbf16, #tpu.memory_space<vmem>>, %arg7: memref<1x512xf32, #tpu.memory_space<vmem>>, %arg8: memref<8x8x256xf32, #tpu.memory_space<vmem>>, %arg9: memref<8x256xf32, #tpu.memory_space<vmem>>, %arg10: memref<64x512xf32, #tpu.memory_space<vmem>>, %arg11: memref<64x512xf32, #tpu.memory_space<vmem>>) attributes {dimension_semantics = [], scalar_prefetch = 0 : i64, scratch_operands = 2 : i64, tpu.core_type = #tpu.core_type<tc>} {
    %c0 = arith.constant 0 : index
    %c0_0 = arith.constant 0 : index
    %0 = vector.load %arg0[%c0, %c0_0] : memref<8x1xi32, #tpu.memory_space<vmem>>, vector<8x1xi32>
    %c0_1 = arith.constant 0 : index
    %c0_2 = arith.constant 0 : index
    %1 = vector.load %arg1[%c0_1, %c0_2] : memref<64x128xbf16, #tpu.memory_space<vmem>>, vector<64x128xbf16>
    %c0_3 = arith.constant 0 : index
    %c0_4 = arith.constant 0 : index
    %2 = vector.load %arg2[%c0_3, %c0_4] : memref<128x512xbf16, #tpu.memory_space<vmem>>, vector<128x512xbf16>
    %cst = arith.constant dense<0.000000e+00> : vector<64x512xf32>
    %3 = tpu.matmul %1, %2, %cst {dimension_numbers = #tpu.dot_dimension_numbers<[1], [0], [0], [1], [0, 0, 1, 1], [], []>} : vector<64x128xbf16>, vector<128x512xbf16>, vector<64x512xf32> -> vector<64x512xf32>
    %c0_5 = arith.constant 0 : index
    %c0_6 = arith.constant 0 : index
    %4 = vector.load %arg4[%c0_5, %c0_6] : memref<1x512xf32, #tpu.memory_space<vmem>>, vector<1x512xf32>
    %5 = vector.broadcast %4 : vector<1x512xf32> to vector<64x512xf32>
    %6 = arith.addf %3, %5 : vector<64x512xf32>
    %c0_7 = arith.constant 0 : index
    %c0_8 = arith.constant 0 : index
    %7 = vector.load %arg10[%c0_7, %c0_8] : memref<64x512xf32, #tpu.memory_space<vmem>>, vector<64x512xf32>
    tpu.vector_store %arg10[%c0_7, %c0_8], %6 {strides = array<i32>} : memref<64x512xf32, #tpu.memory_space<vmem>>, vector<64x512xf32>,
    %c0_9 = arith.constant 0 : index
    %c0_10 = arith.constant 0 : index
    %8 = vector.load %arg5[%c0_9, %c0_10] : memref<128x512xbf16, #tpu.memory_space<vmem>>, vector<128x512xbf16>
    %cst_11 = arith.constant dense<0.000000e+00> : vector<64x512xf32>
    %9 = tpu.matmul %1, %8, %cst_11 {dimension_numbers = #tpu.dot_dimension_numbers<[1], [0], [0], [1], [0, 0, 1, 1], [], []>} : vector<64x128xbf16>, vector<128x512xbf16>, vector<64x512xf32> -> vector<64x512xf32>
    %c0_12 = arith.constant 0 : index
    %c0_13 = arith.constant 0 : index
    %10 = vector.load %arg7[%c0_12, %c0_13] : memref<1x512xf32, #tpu.memory_space<vmem>>, vector<1x512xf32>
    %11 = vector.broadcast %10 : vector<1x512xf32> to vector<64x512xf32>
    %12 = arith.addf %9, %11 : vector<64x512xf32>
    %c0_14 = arith.constant 0 : index
    %c0_15 = arith.constant 0 : index
    %13 = vector.load %arg11[%c0_14, %c0_15] : memref<64x512xf32, #tpu.memory_space<vmem>>, vector<64x512xf32>
    tpu.vector_store %arg11[%c0_14, %c0_15], %12 {strides = array<i32>} : memref<64x512xf32, #tpu.memory_space<vmem>>, vector<64x512xf32>,
    %cst_16 = arith.constant 0.000000e+00 : f32
    %14 = vector.broadcast %cst_16 : f32 to vector<8x128xf32>
    %c0_17 = arith.constant 0 : index
    %c0_18 = arith.constant 0 : index
    %15 = vector.load %arg10[%c0_17, %c0_18] : memref<64x512xf32, #tpu.memory_space<vmem>>, vector<8x512xf32>
    %16 = arith.truncf %14 : vector<8x128xf32> to vector<8x128xbf16>
    %c0_19 = arith.constant 0 : index
    %c0_20 = arith.constant 0 : index
    %17 = vector.load %arg3[%c0_19, %c0_20] : memref<128x512xbf16, #tpu.memory_space<vmem>>, vector<128x512xbf16>
    %cst_21 = arith.constant dense<0.000000e+00> : vector<8x512xf32>
    %18 = tpu.matmul %16, %17, %cst_21 {dimension_numbers = #tpu.dot_dimension_numbers<[1], [0], [0], [1], [0, 0, 1, 1], [], []>} : vector<8x128xbf16>, vector<128x512xbf16>, vector<8x512xf32> -> vector<8x512xf32>
    %19 = arith.addf %15, %18 : vector<8x512xf32>
    %c56 = arith.constant 56 : index
    %c0_22 = arith.constant 0 : index
    %20 = vector.load %arg11[%c56, %c0_22] : memref<64x512xf32, #tpu.memory_space<vmem>>, vector<8x512xf32>
    %21 = arith.truncf %14 : vector<8x128xf32> to vector<8x128xbf16>
    %c0_23 = arith.constant 0 : index
    %c0_24 = arith.constant 0 : index
    %22 = vector.load %arg6[%c0_23, %c0_24] : memref<128x512xbf16, #tpu.memory_space<vmem>>, vector<128x512xbf16>
    %cst_25 = arith.constant dense<0.000000e+00> : vector<8x512xf32>
    %23 = tpu.matmul %21, %22, %cst_25 {dimension_numbers = #tpu.dot_dimension_numbers<[1], [0], [0], [1], [0, 0, 1, 1], [], []>} : vector<8x128xbf16>, vector<128x512xbf16>, vector<8x512xf32> -> vector<8x512xf32>
    %24 = arith.addf %20, %23 : vector<8x512xf32>
    %25 = vector.extract_strided_slice %19 {offsets = [0, 0], sizes = [8, 128], strides = [1, 1]} : vector<8x512xf32> to vector<8x128xf32>
    %26 = arith.negf %25 : vector<8x128xf32>
    %27 = math.exp %26 : vector<8x128xf32>
    %cst_26 = arith.constant 1.000000e+00 : f32
    %28 = vector.broadcast %cst_26 : f32 to vector<8x128xf32>
    %29 = arith.addf %28, %27 : vector<8x128xf32>
    %30 = arith.divf %28, %29 : vector<8x128xf32>
    %31 = vector.extract_strided_slice %19 {offsets = [0, 128], sizes = [8, 128], strides = [1, 1]} : vector<8x512xf32> to vector<8x128xf32>
    %32 = arith.negf %31 : vector<8x128xf32>
    %33 = math.exp %32 : vector<8x128xf32>
    %cst_27 = arith.constant 1.000000e+00 : f32
    %34 = vector.broadcast %cst_27 : f32 to vector<8x128xf32>
    %35 = arith.addf %34, %33 : vector<8x128xf32>
    %36 = arith.divf %34, %35 : vector<8x128xf32>
    %37 = vector.extract_strided_slice %19 {offsets = [0, 256], sizes = [8, 128], strides = [1, 1]} : vector<8x512xf32> to vector<8x128xf32>
    %38 = math.tanh %37 : vector<8x128xf32>
    %39 = vector.extract_strided_slice %19 {offsets = [0, 384], sizes = [8, 128], strides = [1, 1]} : vector<8x512xf32> to vector<8x128xf32>
    %40 = arith.negf %39 : vector<8x128xf32>
    %41 = math.exp %40 : vector<8x128xf32>
    %cst_28 = arith.constant 1.000000e+00 : f32
    %42 = vector.broadcast %cst_28 : f32 to vector<8x128xf32>
    %43 = arith.addf %42, %41 : vector<8x128xf32>
    %44 = arith.divf %42, %43 : vector<8x128xf32>
    %45 = arith.mulf %36, %14 : vector<8x128xf32>
    %46 = arith.mulf %30, %38 : vector<8x128xf32>
    %47 = arith.addf %45, %46 : vector<8x128xf32>
    %48 = math.tanh %47 : vector<8x128xf32>
    %49 = arith.mulf %44, %48 : vector<8x128xf32>
    %50 = vector.extract_strided_slice %24 {offsets = [0, 0], sizes = [8, 128], strides = [1, 1]} : vector<8x512xf32> to vector<8x128xf32>
    %51 = arith.negf %50 : vector<8x128xf32>
    %52 = math.exp %51 : vector<8x128xf32>
    %cst_29 = arith.constant 1.000000e+00 : f32
    %53 = vector.broadcast %cst_29 : f32 to vector<8x128xf32>
    %54 = arith.addf %53, %52 : vector<8x128xf32>
    %55 = arith.divf %53, %54 : vector<8x128xf32>
    %56 = vector.extract_strided_slice %24 {offsets = [0, 128], sizes = [8, 128], strides = [1, 1]} : vector<8x512xf32> to vector<8x128xf32>
    %57 = arith.negf %56 : vector<8x128xf32>
    %58 = math.exp %57 : vector<8x128xf32>
    %cst_30 = arith.constant 1.000000e+00 : f32
    %59 = vector.broadcast %cst_30 : f32 to vector<8x128xf32>
    %60 = arith.addf %59, %58 : vector<8x128xf32>
    %61 = arith.divf %59, %60 : vector<8x128xf32>
    %62 = vector.extract_strided_slice %24 {offsets = [0, 256], sizes = [8, 128], strides = [1, 1]} : vector<8x512xf32> to vector<8x128xf32>
    %63 = math.tanh %62 : vector<8x128xf32>
    %64 = vector.extract_strided_slice %24 {offsets = [0, 384], sizes = [8, 128], strides = [1, 1]} : vector<8x512xf32> to vector<8x128xf32>
    %65 = arith.negf %64 : vector<8x128xf32>
    %66 = math.exp %65 : vector<8x128xf32>
    %cst_31 = arith.constant 1.000000e+00 : f32
    %67 = vector.broadcast %cst_31 : f32 to vector<8x128xf32>
    %68 = arith.addf %67, %66 : vector<8x128xf32>
    %69 = arith.divf %67, %68 : vector<8x128xf32>
    %70 = arith.mulf %61, %14 : vector<8x128xf32>
    %71 = arith.mulf %55, %63 : vector<8x128xf32>
    %72 = arith.addf %70, %71 : vector<8x128xf32>
    %73 = math.tanh %72 : vector<8x128xf32>
    %74 = arith.mulf %69, %73 : vector<8x128xf32>
    %c0_i32 = arith.constant 0 : i32
    %75 = vector.broadcast %c0_i32 : i32 to vector<8x1xi32>
    %76 = arith.cmpi sgt, %0, %75 : vector<8x1xi32>
    %c7_i32 = arith.constant 7 : i32
    %77 = vector.broadcast %c7_i32 : i32 to vector<8x1xi32>
    %78 = arith.cmpi sgt, %0, %77 : vector<8x1xi32>
    %79 = vector.shape_cast %76 : vector<8x1xi1> to vector<8x1xi1>
    %80 = vector.broadcast %79 : vector<8x1xi1> to vector<8x128xi1>
    %81 = arith.select %80, %49, %14 : vector<8x128xi1>, vector<8x128xf32>
    %82 = vector.shape_cast %76 : vector<8x1xi1> to vector<8x1xi1>
    %83 = vector.broadcast %82 : vector<8x1xi1> to vector<8x128xi1>
    %84 = arith.select %83, %47, %14 : vector<8x128xi1>, vector<8x128xf32>
    %85 = vector.shape_cast %78 : vector<8x1xi1> to vector<8x1xi1>
    %86 = vector.broadcast %85 : vector<8x1xi1> to vector<8x128xi1>
    %87 = arith.select %86, %74, %14 : vector<8x128xi1>, vector<8x128xf32>
    %88 = vector.shape_cast %78 : vector<8x1xi1> to vector<8x1xi1>
    %89 = vector.broadcast %88 : vector<8x1xi1> to vector<8x128xi1>
    %90 = arith.select %89, %72, %14 : vector<8x128xi1>, vector<8x128xf32>
    %cst_32 = arith.constant 0.000000e+00 : f32
    %91 = vector.shape_cast %76 : vector<8x1xi1> to vector<8x1xi1>
    %92 = vector.broadcast %91 : vector<8x1xi1> to vector<8x128xi1>
    %93 = vector.broadcast %cst_32 : f32 to vector<8x128xf32>
    %94 = arith.select %92, %49, %93 : vector<8x128xi1>, vector<8x128xf32>
    %c0_33 = arith.constant 0 : index
    %c0_34 = arith.constant 0 : index
    %c0_35 = arith.constant 0 : index
    %95 = vector.load %arg8[%c0_33, %c0_34, %c0_35] : memref<8x8x256xf32, #tpu.memory_space<vmem>>, vector<1x8x128xf32>
    %96 = vector.shape_cast %95 : vector<1x8x128xf32> to vector<8x128xf32>
    %97 = vector.shape_cast %94 : vector<8x128xf32> to vector<1x8x128xf32>
    tpu.vector_store %arg8[%c0_33, %c0_34, %c0_35], %97 {strides = array<i32>} : memref<8x8x256xf32, #tpu.memory_space<vmem>>, vector<1x8x128xf32>,
    %cst_36 = arith.constant 0.000000e+00 : f32
    %98 = vector.shape_cast %78 : vector<8x1xi1> to vector<8x1xi1>
    %99 = vector.broadcast %98 : vector<8x1xi1> to vector<8x128xi1>
    %100 = vector.broadcast %cst_36 : f32 to vector<8x128xf32>
    %101 = arith.select %99, %74, %100 : vector<8x128xi1>, vector<8x128xf32>
    %c7 = arith.constant 7 : index
    %c0_37 = arith.constant 0 : index
    %c128 = arith.constant 128 : index
    %102 = vector.load %arg8[%c7, %c0_37, %c128] : memref<8x8x256xf32, #tpu.memory_space<vmem>>, vector<1x8x128xf32>
    %103 = vector.shape_cast %102 : vector<1x8x128xf32> to vector<8x128xf32>
    %104 = vector.shape_cast %101 : vector<8x128xf32> to vector<1x8x128xf32>
    tpu.vector_store %arg8[%c7, %c0_37, %c128], %104 {strides = array<i32>} : memref<8x8x256xf32, #tpu.memory_space<vmem>>, vector<1x8x128xf32>,
    %c8 = arith.constant 8 : index
    %c0_38 = arith.constant 0 : index
    %105 = vector.load %arg10[%c8, %c0_38] : memref<64x512xf32, #tpu.memory_space<vmem>>, vector<8x512xf32>
    %106 = arith.truncf %81 : vector<8x128xf32> to vector<8x128xbf16>
    %c0_39 = arith.constant 0 : index
    %c0_40 = arith.constant 0 : index
    %107 = vector.load %arg3[%c0_39, %c0_40] : memref<128x512xbf16, #tpu.memory_space<vmem>>, vector<128x512xbf16>
    %cst_41 = arith.constant dense<0.000000e+00> : vector<8x512xf32>
    %108 = tpu.matmul %106, %107, %cst_41 {dimension_numbers = #tpu.dot_dimension_numbers<[1], [0], [0], [1], [0, 0, 1, 1], [], []>} : vector<8x128xbf16>, vector<128x512xbf16>, vector<8x512xf32> -> vector<8x512xf32>
    %109 = arith.addf %105, %108 : vector<8x512xf32>
    %c48 = arith.constant 48 : index
    %c0_42 = arith.constant 0 : index
    %110 = vector.load %arg11[%c48, %c0_42] : memref<64x512xf32, #tpu.memory_space<vmem>>, vector<8x512xf32>
    %111 = arith.truncf %87 : vector<8x128xf32> to vector<8x128xbf16>
    %c0_43 = arith.constant 0 : index
    %c0_44 = arith.constant 0 : index
    %112 = vector.load %arg6[%c0_43, %c0_44] : memref<128x512xbf16, #tpu.memory_space<vmem>>, vector<128x512xbf16>
    %cst_45 = arith.constant dense<0.000000e+00> : vector<8x512xf32>
    %113 = tpu.matmul %111, %112, %cst_45 {dimension_numbers = #tpu.dot_dimension_numbers<[1], [0], [0], [1], [0, 0, 1, 1], [], []>} : vector<8x128xbf16>, vector<128x512xbf16>, vector<8x512xf32> -> vector<8x512xf32>
    %114 = arith.addf %110, %113 : vector<8x512xf32>
    %115 = vector.extract_strided_slice %109 {offsets = [0, 0], sizes = [8, 128], strides = [1, 1]} : vector<8x512xf32> to vector<8x128xf32>
    %116 = arith.negf %115 : vector<8x128xf32>
    %117 = math.exp %116 : vector<8x128xf32>
    %cst_46 = arith.constant 1.000000e+00 : f32
    %118 = vector.broadcast %cst_46 : f32 to vector<8x128xf32>
    %119 = arith.addf %118, %117 : vector<8x128xf32>
    %120 = arith.divf %118, %119 : vector<8x128xf32>
    %121 = vector.extract_strided_slice %109 {offsets = [0, 128], sizes = [8, 128], strides = [1, 1]} : vector<8x512xf32> to vector<8x128xf32>
    %122 = arith.negf %121 : vector<8x128xf32>
    %123 = math.exp %122 : vector<8x128xf32>
    %cst_47 = arith.constant 1.000000e+00 : f32
    %124 = vector.broadcast %cst_47 : f32 to vector<8x128xf32>
    %125 = arith.addf %124, %123 : vector<8x128xf32>
    %126 = arith.divf %124, %125 : vector<8x128xf32>
    %127 = vector.extract_strided_slice %109 {offsets = [0, 256], sizes = [8, 128], strides = [1, 1]} : vector<8x512xf32> to vector<8x128xf32>
    %128 = math.tanh %127 : vector<8x128xf32>
    %129 = vector.extract_strided_slice %109 {offsets = [0, 384], sizes = [8, 128], strides = [1, 1]} : vector<8x512xf32> to vector<8x128xf32>
    %130 = arith.negf %129 : vector<8x128xf32>
    %131 = math.exp %130 : vector<8x128xf32>
    %cst_48 = arith.constant 1.000000e+00 : f32
    %132 = vector.broadcast %cst_48 : f32 to vector<8x128xf32>
    %133 = arith.addf %132, %131 : vector<8x128xf32>
    %134 = arith.divf %132, %133 : vector<8x128xf32>
    %135 = arith.mulf %126, %84 : vector<8x128xf32>
    %136 = arith.mulf %120, %128 : vector<8x128xf32>
    %137 = arith.addf %135, %136 : vector<8x128xf32>
    %138 = math.tanh %137 : vector<8x128xf32>
    %139 = arith.mulf %134, %138 : vector<8x128xf32>
    %140 = vector.extract_strided_slice %114 {offsets = [0, 0], sizes = [8, 128], strides = [1, 1]} : vector<8x512xf32> to vector<8x128xf32>
    %141 = arith.negf %140 : vector<8x128xf32>
    %142 = math.exp %141 : vector<8x128xf32>
    %cst_49 = arith.constant 1.000000e+00 : f32
    %143 = vector.broadcast %cst_49 : f32 to vector<8x128xf32>
    %144 = arith.addf %143, %142 : vector<8x128xf32>
    %145 = arith.divf %143, %144 : vector<8x128xf32>
    %146 = vector.extract_strided_slice %114 {offsets = [0, 128], sizes = [8, 128], strides = [1, 1]} : vector<8x512xf32> to vector<8x128xf32>
    %147 = arith.negf %146 : vector<8x128xf32>
    %148 = math.exp %147 : vector<8x128xf32>
    %cst_50 = arith.constant 1.000000e+00 : f32
    %149 = vector.broadcast %cst_50 : f32 to vector<8x128xf32>
    %150 = arith.addf %149, %148 : vector<8x128xf32>
    %151 = arith.divf %149, %150 : vector<8x128xf32>
    %152 = vector.extract_strided_slice %114 {offsets = [0, 256], sizes = [8, 128], strides = [1, 1]} : vector<8x512xf32> to vector<8x128xf32>
    %153 = math.tanh %152 : vector<8x128xf32>
    %154 = vector.extract_strided_slice %114 {offsets = [0, 384], sizes = [8, 128], strides = [1, 1]} : vector<8x512xf32> to vector<8x128xf32>
    %155 = arith.negf %154 : vector<8x128xf32>
    %156 = math.exp %155 : vector<8x128xf32>
    %cst_51 = arith.constant 1.000000e+00 : f32
    %157 = vector.broadcast %cst_51 : f32 to vector<8x128xf32>
    %158 = arith.addf %157, %156 : vector<8x128xf32>
    %159 = arith.divf %157, %158 : vector<8x128xf32>
    %160 = arith.mulf %151, %90 : vector<8x128xf32>
    %161 = arith.mulf %145, %153 : vector<8x128xf32>
    %162 = arith.addf %160, %161 : vector<8x128xf32>
    %163 = math.tanh %162 : vector<8x128xf32>
    %164 = arith.mulf %159, %163 : vector<8x128xf32>
    %c1_i32 = arith.constant 1 : i32
    %165 = vector.broadcast %c1_i32 : i32 to vector<8x1xi32>
    %166 = arith.cmpi sgt, %0, %165 : vector<8x1xi32>
    %c6_i32 = arith.constant 6 : i32
    %167 = vector.broadcast %c6_i32 : i32 to vector<8x1xi32>
    %168 = arith.cmpi sgt, %0, %167 : vector<8x1xi32>
    %169 = vector.shape_cast %166 : vector<8x1xi1> to vector<8x1xi1>
    %170 = vector.broadcast %169 : vector<8x1xi1> to vector<8x128xi1>
    %171 = arith.select %170, %139, %81 : vector<8x128xi1>, vector<8x128xf32>
    %172 = vector.shape_cast %166 : vector<8x1xi1> to vector<8x1xi1>
    %173 = vector.broadcast %172 : vector<8x1xi1> to vector<8x128xi1>
    %174 = arith.select %173, %137, %84 : vector<8x128xi1>, vector<8x128xf32>
    %175 = vector.shape_cast %168 : vector<8x1xi1> to vector<8x1xi1>
    %176 = vector.broadcast %175 : vector<8x1xi1> to vector<8x128xi1>
    %177 = arith.select %176, %164, %87 : vector<8x128xi1>, vector<8x128xf32>
    %178 = vector.shape_cast %168 : vector<8x1xi1> to vector<8x1xi1>
    %179 = vector.broadcast %178 : vector<8x1xi1> to vector<8x128xi1>
    %180 = arith.select %179, %162, %90 : vector<8x128xi1>, vector<8x128xf32>
    %cst_52 = arith.constant 0.000000e+00 : f32
    %181 = vector.shape_cast %166 : vector<8x1xi1> to vector<8x1xi1>
    %182 = vector.broadcast %181 : vector<8x1xi1> to vector<8x128xi1>
    %183 = vector.broadcast %cst_52 : f32 to vector<8x128xf32>
    %184 = arith.select %182, %139, %183 : vector<8x128xi1>, vector<8x128xf32>
    %c1 = arith.constant 1 : index
    %c0_53 = arith.constant 0 : index
    %c0_54 = arith.constant 0 : index
    %185 = vector.load %arg8[%c1, %c0_53, %c0_54] : memref<8x8x256xf32, #tpu.memory_space<vmem>>, vector<1x8x128xf32>
    %186 = vector.shape_cast %185 : vector<1x8x128xf32> to vector<8x128xf32>
    %187 = vector.shape_cast %184 : vector<8x128xf32> to vector<1x8x128xf32>
    tpu.vector_store %arg8[%c1, %c0_53, %c0_54], %187 {strides = array<i32>} : memref<8x8x256xf32, #tpu.memory_space<vmem>>, vector<1x8x128xf32>,
    %cst_55 = arith.constant 0.000000e+00 : f32
    %188 = vector.shape_cast %168 : vector<8x1xi1> to vector<8x1xi1>
    %189 = vector.broadcast %188 : vector<8x1xi1> to vector<8x128xi1>
    %190 = vector.broadcast %cst_55 : f32 to vector<8x128xf32>
    %191 = arith.select %189, %164, %190 : vector<8x128xi1>, vector<8x128xf32>
    %c6 = arith.constant 6 : index
    %c0_56 = arith.constant 0 : index
    %c128_57 = arith.constant 128 : index
    %192 = vector.load %arg8[%c6, %c0_56, %c128_57] : memref<8x8x256xf32, #tpu.memory_space<vmem>>, vector<1x8x128xf32>
    %193 = vector.shape_cast %192 : vector<1x8x128xf32> to vector<8x128xf32>
    %194 = vector.shape_cast %191 : vector<8x128xf32> to vector<1x8x128xf32>
    tpu.vector_store %arg8[%c6, %c0_56, %c128_57], %194 {strides = array<i32>} : memref<8x8x256xf32, #tpu.memory_space<vmem>>, vector<1x8x128xf32>,
    %c16 = arith.constant 16 : index
    %c0_58 = arith.constant 0 : index
    %195 = vector.load %arg10[%c16, %c0_58] : memref<64x512xf32, #tpu.memory_space<vmem>>, vector<8x512xf32>
    %196 = arith.truncf %171 : vector<8x128xf32> to vector<8x128xbf16>
    %c0_59 = arith.constant 0 : index
    %c0_60 = arith.constant 0 : index
    %197 = vector.load %arg3[%c0_59, %c0_60] : memref<128x512xbf16, #tpu.memory_space<vmem>>, vector<128x512xbf16>
    %cst_61 = arith.constant dense<0.000000e+00> : vector<8x512xf32>
    %198 = tpu.matmul %196, %197, %cst_61 {dimension_numbers = #tpu.dot_dimension_numbers<[1], [0], [0], [1], [0, 0, 1, 1], [], []>} : vector<8x128xbf16>, vector<128x512xbf16>, vector<8x512xf32> -> vector<8x512xf32>
    %199 = arith.addf %195, %198 : vector<8x512xf32>
    %c40 = arith.constant 40 : index
    %c0_62 = arith.constant 0 : index
    %200 = vector.load %arg11[%c40, %c0_62] : memref<64x512xf32, #tpu.memory_space<vmem>>, vector<8x512xf32>
    %201 = arith.truncf %177 : vector<8x128xf32> to vector<8x128xbf16>
    %c0_63 = arith.constant 0 : index
    %c0_64 = arith.constant 0 : index
    %202 = vector.load %arg6[%c0_63, %c0_64] : memref<128x512xbf16, #tpu.memory_space<vmem>>, vector<128x512xbf16>
    %cst_65 = arith.constant dense<0.000000e+00> : vector<8x512xf32>
    %203 = tpu.matmul %201, %202, %cst_65 {dimension_numbers = #tpu.dot_dimension_numbers<[1], [0], [0], [1], [0, 0, 1, 1], [], []>} : vector<8x128xbf16>, vector<128x512xbf16>, vector<8x512xf32> -> vector<8x512xf32>
    %204 = arith.addf %200, %203 : vector<8x512xf32>
    %205 = vector.extract_strided_slice %199 {offsets = [0, 0], sizes = [8, 128], strides = [1, 1]} : vector<8x512xf32> to vector<8x128xf32>
    %206 = arith.negf %205 : vector<8x128xf32>
    %207 = math.exp %206 : vector<8x128xf32>
    %cst_66 = arith.constant 1.000000e+00 : f32
    %208 = vector.broadcast %cst_66 : f32 to vector<8x128xf32>
    %209 = arith.addf %208, %207 : vector<8x128xf32>
    %210 = arith.divf %208, %209 : vector<8x128xf32>
    %211 = vector.extract_strided_slice %199 {offsets = [0, 128], sizes = [8, 128], strides = [1, 1]} : vector<8x512xf32> to vector<8x128xf32>
    %212 = arith.negf %211 : vector<8x128xf32>
    %213 = math.exp %212 : vector<8x128xf32>
    %cst_67 = arith.constant 1.000000e+00 : f32
    %214 = vector.broadcast %cst_67 : f32 to vector<8x128xf32>
    %215 = arith.addf %214, %213 : vector<8x128xf32>
    %216 = arith.divf %214, %215 : vector<8x128xf32>
    %217 = vector.extract_strided_slice %199 {offsets = [0, 256], sizes = [8, 128], strides = [1, 1]} : vector<8x512xf32> to vector<8x128xf32>
    %218 = math.tanh %217 : vector<8x128xf32>
    %219 = vector.extract_strided_slice %199 {offsets = [0, 384], sizes = [8, 128], strides = [1, 1]} : vector<8x512xf32> to vector<8x128xf32>
    %220 = arith.negf %219 : vector<8x128xf32>
    %221 = math.exp %220 : vector<8x128xf32>
    %cst_68 = arith.constant 1.000000e+00 : f32
    %222 = vector.broadcast %cst_68 : f32 to vector<8x128xf32>
    %223 = arith.addf %222, %221 : vector<8x128xf32>
    %224 = arith.divf %222, %223 : vector<8x128xf32>
    %225 = arith.mulf %216, %174 : vector<8x128xf32>
    %226 = arith.mulf %210, %218 : vector<8x128xf32>
    %227 = arith.addf %225, %226 : vector<8x128xf32>
    %228 = math.tanh %227 : vector<8x128xf32>
    %229 = arith.mulf %224, %228 : vector<8x128xf32>
    %230 = vector.extract_strided_slice %204 {offsets = [0, 0], sizes = [8, 128], strides = [1, 1]} : vector<8x512xf32> to vector<8x128xf32>
    %231 = arith.negf %230 : vector<8x128xf32>
    %232 = math.exp %231 : vector<8x128xf32>
    %cst_69 = arith.constant 1.000000e+00 : f32
    %233 = vector.broadcast %cst_69 : f32 to vector<8x128xf32>
    %234 = arith.addf %233, %232 : vector<8x128xf32>
    %235 = arith.divf %233, %234 : vector<8x128xf32>
    %236 = vector.extract_strided_slice %204 {offsets = [0, 128], sizes = [8, 128], strides = [1, 1]} : vector<8x512xf32> to vector<8x128xf32>
    %237 = arith.negf %236 : vector<8x128xf32>
    %238 = math.exp %237 : vector<8x128xf32>
    %cst_70 = arith.constant 1.000000e+00 : f32
    %239 = vector.broadcast %cst_70 : f32 to vector<8x128xf32>
    %240 = arith.addf %239, %238 : vector<8x128xf32>
    %241 = arith.divf %239, %240 : vector<8x128xf32>
    %242 = vector.extract_strided_slice %204 {offsets = [0, 256], sizes = [8, 128], strides = [1, 1]} : vector<8x512xf32> to vector<8x128xf32>
    %243 = math.tanh %242 : vector<8x128xf32>
    %244 = vector.extract_strided_slice %204 {offsets = [0, 384], sizes = [8, 128], strides = [1, 1]} : vector<8x512xf32> to vector<8x128xf32>
    %245 = arith.negf %244 : vector<8x128xf32>
    %246 = math.exp %245 : vector<8x128xf32>
    %cst_71 = arith.constant 1.000000e+00 : f32
    %247 = vector.broadcast %cst_71 : f32 to vector<8x128xf32>
    %248 = arith.addf %247, %246 : vector<8x128xf32>
    %249 = arith.divf %247, %248 : vector<8x128xf32>
    %250 = arith.mulf %241, %180 : vector<8x128xf32>
    %251 = arith.mulf %235, %243 : vector<8x128xf32>
    %252 = arith.addf %250, %251 : vector<8x128xf32>
    %253 = math.tanh %252 : vector<8x128xf32>
    %254 = arith.mulf %249, %253 : vector<8x128xf32>
    %c2_i32 = arith.constant 2 : i32
    %255 = vector.broadcast %c2_i32 : i32 to vector<8x1xi32>
    %256 = arith.cmpi sgt, %0, %255 : vector<8x1xi32>
    %c5_i32 = arith.constant 5 : i32
    %257 = vector.broadcast %c5_i32 : i32 to vector<8x1xi32>
    %258 = arith.cmpi sgt, %0, %257 : vector<8x1xi32>
    %259 = vector.shape_cast %256 : vector<8x1xi1> to vector<8x1xi1>
    %260 = vector.broadcast %259 : vector<8x1xi1> to vector<8x128xi1>
    %261 = arith.select %260, %229, %171 : vector<8x128xi1>, vector<8x128xf32>
    %262 = vector.shape_cast %256 : vector<8x1xi1> to vector<8x1xi1>
    %263 = vector.broadcast %262 : vector<8x1xi1> to vector<8x128xi1>
    %264 = arith.select %263, %227, %174 : vector<8x128xi1>, vector<8x128xf32>
    %265 = vector.shape_cast %258 : vector<8x1xi1> to vector<8x1xi1>
    %266 = vector.broadcast %265 : vector<8x1xi1> to vector<8x128xi1>
    %267 = arith.select %266, %254, %177 : vector<8x128xi1>, vector<8x128xf32>
    %268 = vector.shape_cast %258 : vector<8x1xi1> to vector<8x1xi1>
    %269 = vector.broadcast %268 : vector<8x1xi1> to vector<8x128xi1>
    %270 = arith.select %269, %252, %180 : vector<8x128xi1>, vector<8x128xf32>
    %cst_72 = arith.constant 0.000000e+00 : f32
    %271 = vector.shape_cast %256 : vector<8x1xi1> to vector<8x1xi1>
    %272 = vector.broadcast %271 : vector<8x1xi1> to vector<8x128xi1>
    %273 = vector.broadcast %cst_72 : f32 to vector<8x128xf32>
    %274 = arith.select %272, %229, %273 : vector<8x128xi1>, vector<8x128xf32>
    %c2 = arith.constant 2 : index
    %c0_73 = arith.constant 0 : index
    %c0_74 = arith.constant 0 : index
    %275 = vector.load %arg8[%c2, %c0_73, %c0_74] : memref<8x8x256xf32, #tpu.memory_space<vmem>>, vector<1x8x128xf32>
    %276 = vector.shape_cast %275 : vector<1x8x128xf32> to vector<8x128xf32>
    %277 = vector.shape_cast %274 : vector<8x128xf32> to vector<1x8x128xf32>
    tpu.vector_store %arg8[%c2, %c0_73, %c0_74], %277 {strides = array<i32>} : memref<8x8x256xf32, #tpu.memory_space<vmem>>, vector<1x8x128xf32>,
    %cst_75 = arith.constant 0.000000e+00 : f32
    %278 = vector.shape_cast %258 : vector<8x1xi1> to vector<8x1xi1>
    %279 = vector.broadcast %278 : vector<8x1xi1> to vector<8x128xi1>
    %280 = vector.broadcast %cst_75 : f32 to vector<8x128xf32>
    %281 = arith.select %279, %254, %280 : vector<8x128xi1>, vector<8x128xf32>
    %c5 = arith.constant 5 : index
    %c0_76 = arith.constant 0 : index
    %c128_77 = arith.constant 128 : index
    %282 = vector.load %arg8[%c5, %c0_76, %c128_77] : memref<8x8x256xf32, #tpu.memory_space<vmem>>, vector<1x8x128xf32>
    %283 = vector.shape_cast %282 : vector<1x8x128xf32> to vector<8x128xf32>
    %284 = vector.shape_cast %281 : vector<8x128xf32> to vector<1x8x128xf32>
    tpu.vector_store %arg8[%c5, %c0_76, %c128_77], %284 {strides = array<i32>} : memref<8x8x256xf32, #tpu.memory_space<vmem>>, vector<1x8x128xf32>,
    %c24 = arith.constant 24 : index
    %c0_78 = arith.constant 0 : index
    %285 = vector.load %arg10[%c24, %c0_78] : memref<64x512xf32, #tpu.memory_space<vmem>>, vector<8x512xf32>
    %286 = arith.truncf %261 : vector<8x128xf32> to vector<8x128xbf16>
    %c0_79 = arith.constant 0 : index
    %c0_80 = arith.constant 0 : index
    %287 = vector.load %arg3[%c0_79, %c0_80] : memref<128x512xbf16, #tpu.memory_space<vmem>>, vector<128x512xbf16>
    %cst_81 = arith.constant dense<0.000000e+00> : vector<8x512xf32>
    %288 = tpu.matmul %286, %287, %cst_81 {dimension_numbers = #tpu.dot_dimension_numbers<[1], [0], [0], [1], [0, 0, 1, 1], [], []>} : vector<8x128xbf16>, vector<128x512xbf16>, vector<8x512xf32> -> vector<8x512xf32>
    %289 = arith.addf %285, %288 : vector<8x512xf32>
    %c32 = arith.constant 32 : index
    %c0_82 = arith.constant 0 : index
    %290 = vector.load %arg11[%c32, %c0_82] : memref<64x512xf32, #tpu.memory_space<vmem>>, vector<8x512xf32>
    %291 = arith.truncf %267 : vector<8x128xf32> to vector<8x128xbf16>
    %c0_83 = arith.constant 0 : index
    %c0_84 = arith.constant 0 : index
    %292 = vector.load %arg6[%c0_83, %c0_84] : memref<128x512xbf16, #tpu.memory_space<vmem>>, vector<128x512xbf16>
    %cst_85 = arith.constant dense<0.000000e+00> : vector<8x512xf32>
    %293 = tpu.matmul %291, %292, %cst_85 {dimension_numbers = #tpu.dot_dimension_numbers<[1], [0], [0], [1], [0, 0, 1, 1], [], []>} : vector<8x128xbf16>, vector<128x512xbf16>, vector<8x512xf32> -> vector<8x512xf32>
    %294 = arith.addf %290, %293 : vector<8x512xf32>
    %295 = vector.extract_strided_slice %289 {offsets = [0, 0], sizes = [8, 128], strides = [1, 1]} : vector<8x512xf32> to vector<8x128xf32>
    %296 = arith.negf %295 : vector<8x128xf32>
    %297 = math.exp %296 : vector<8x128xf32>
    %cst_86 = arith.constant 1.000000e+00 : f32
    %298 = vector.broadcast %cst_86 : f32 to vector<8x128xf32>
    %299 = arith.addf %298, %297 : vector<8x128xf32>
    %300 = arith.divf %298, %299 : vector<8x128xf32>
    %301 = vector.extract_strided_slice %289 {offsets = [0, 128], sizes = [8, 128], strides = [1, 1]} : vector<8x512xf32> to vector<8x128xf32>
    %302 = arith.negf %301 : vector<8x128xf32>
    %303 = math.exp %302 : vector<8x128xf32>
    %cst_87 = arith.constant 1.000000e+00 : f32
    %304 = vector.broadcast %cst_87 : f32 to vector<8x128xf32>
    %305 = arith.addf %304, %303 : vector<8x128xf32>
    %306 = arith.divf %304, %305 : vector<8x128xf32>
    %307 = vector.extract_strided_slice %289 {offsets = [0, 256], sizes = [8, 128], strides = [1, 1]} : vector<8x512xf32> to vector<8x128xf32>
    %308 = math.tanh %307 : vector<8x128xf32>
    %309 = vector.extract_strided_slice %289 {offsets = [0, 384], sizes = [8, 128], strides = [1, 1]} : vector<8x512xf32> to vector<8x128xf32>
    %310 = arith.negf %309 : vector<8x128xf32>
    %311 = math.exp %310 : vector<8x128xf32>
    %cst_88 = arith.constant 1.000000e+00 : f32
    %312 = vector.broadcast %cst_88 : f32 to vector<8x128xf32>
    %313 = arith.addf %312, %311 : vector<8x128xf32>
    %314 = arith.divf %312, %313 : vector<8x128xf32>
    %315 = arith.mulf %306, %264 : vector<8x128xf32>
    %316 = arith.mulf %300, %308 : vector<8x128xf32>
    %317 = arith.addf %315, %316 : vector<8x128xf32>
    %318 = math.tanh %317 : vector<8x128xf32>
    %319 = arith.mulf %314, %318 : vector<8x128xf32>
    %320 = vector.extract_strided_slice %294 {offsets = [0, 0], sizes = [8, 128], strides = [1, 1]} : vector<8x512xf32> to vector<8x128xf32>
    %321 = arith.negf %320 : vector<8x128xf32>
    %322 = math.exp %321 : vector<8x128xf32>
    %cst_89 = arith.constant 1.000000e+00 : f32
    %323 = vector.broadcast %cst_89 : f32 to vector<8x128xf32>
    %324 = arith.addf %323, %322 : vector<8x128xf32>
    %325 = arith.divf %323, %324 : vector<8x128xf32>
    %326 = vector.extract_strided_slice %294 {offsets = [0, 128], sizes = [8, 128], strides = [1, 1]} : vector<8x512xf32> to vector<8x128xf32>
    %327 = arith.negf %326 : vector<8x128xf32>
    %328 = math.exp %327 : vector<8x128xf32>
    %cst_90 = arith.constant 1.000000e+00 : f32
    %329 = vector.broadcast %cst_90 : f32 to vector<8x128xf32>
    %330 = arith.addf %329, %328 : vector<8x128xf32>
    %331 = arith.divf %329, %330 : vector<8x128xf32>
    %332 = vector.extract_strided_slice %294 {offsets = [0, 256], sizes = [8, 128], strides = [1, 1]} : vector<8x512xf32> to vector<8x128xf32>
    %333 = math.tanh %332 : vector<8x128xf32>
    %334 = vector.extract_strided_slice %294 {offsets = [0, 384], sizes = [8, 128], strides = [1, 1]} : vector<8x512xf32> to vector<8x128xf32>
    %335 = arith.negf %334 : vector<8x128xf32>
    %336 = math.exp %335 : vector<8x128xf32>
    %cst_91 = arith.constant 1.000000e+00 : f32
    %337 = vector.broadcast %cst_91 : f32 to vector<8x128xf32>
    %338 = arith.addf %337, %336 : vector<8x128xf32>
    %339 = arith.divf %337, %338 : vector<8x128xf32>
    %340 = arith.mulf %331, %270 : vector<8x128xf32>
    %341 = arith.mulf %325, %333 : vector<8x128xf32>
    %342 = arith.addf %340, %341 : vector<8x128xf32>
    %343 = math.tanh %342 : vector<8x128xf32>
    %344 = arith.mulf %339, %343 : vector<8x128xf32>
    %c3_i32 = arith.constant 3 : i32
    %345 = vector.broadcast %c3_i32 : i32 to vector<8x1xi32>
    %346 = arith.cmpi sgt, %0, %345 : vector<8x1xi32>
    %c4_i32 = arith.constant 4 : i32
    %347 = vector.broadcast %c4_i32 : i32 to vector<8x1xi32>
    %348 = arith.cmpi sgt, %0, %347 : vector<8x1xi32>
    %349 = vector.shape_cast %346 : vector<8x1xi1> to vector<8x1xi1>
    %350 = vector.broadcast %349 : vector<8x1xi1> to vector<8x128xi1>
    %351 = arith.select %350, %319, %261 : vector<8x128xi1>, vector<8x128xf32>
    %352 = vector.shape_cast %346 : vector<8x1xi1> to vector<8x1xi1>
    %353 = vector.broadcast %352 : vector<8x1xi1> to vector<8x128xi1>
    %354 = arith.select %353, %317, %264 : vector<8x128xi1>, vector<8x128xf32>
    %355 = vector.shape_cast %348 : vector<8x1xi1> to vector<8x1xi1>
    %356 = vector.broadcast %355 : vector<8x1xi1> to vector<8x128xi1>
    %357 = arith.select %356, %344, %267 : vector<8x128xi1>, vector<8x128xf32>
    %358 = vector.shape_cast %348 : vector<8x1xi1> to vector<8x1xi1>
    %359 = vector.broadcast %358 : vector<8x1xi1> to vector<8x128xi1>
    %360 = arith.select %359, %342, %270 : vector<8x128xi1>, vector<8x128xf32>
    %cst_92 = arith.constant 0.000000e+00 : f32
    %361 = vector.shape_cast %346 : vector<8x1xi1> to vector<8x1xi1>
    %362 = vector.broadcast %361 : vector<8x1xi1> to vector<8x128xi1>
    %363 = vector.broadcast %cst_92 : f32 to vector<8x128xf32>
    %364 = arith.select %362, %319, %363 : vector<8x128xi1>, vector<8x128xf32>
    %c3 = arith.constant 3 : index
    %c0_93 = arith.constant 0 : index
    %c0_94 = arith.constant 0 : index
    %365 = vector.load %arg8[%c3, %c0_93, %c0_94] : memref<8x8x256xf32, #tpu.memory_space<vmem>>, vector<1x8x128xf32>
    %366 = vector.shape_cast %365 : vector<1x8x128xf32> to vector<8x128xf32>
    %367 = vector.shape_cast %364 : vector<8x128xf32> to vector<1x8x128xf32>
    tpu.vector_store %arg8[%c3, %c0_93, %c0_94], %367 {strides = array<i32>} : memref<8x8x256xf32, #tpu.memory_space<vmem>>, vector<1x8x128xf32>,
    %cst_95 = arith.constant 0.000000e+00 : f32
    %368 = vector.shape_cast %348 : vector<8x1xi1> to vector<8x1xi1>
    %369 = vector.broadcast %368 : vector<8x1xi1> to vector<8x128xi1>
    %370 = vector.broadcast %cst_95 : f32 to vector<8x128xf32>
    %371 = arith.select %369, %344, %370 : vector<8x128xi1>, vector<8x128xf32>
    %c4 = arith.constant 4 : index
    %c0_96 = arith.constant 0 : index
    %c128_97 = arith.constant 128 : index
    %372 = vector.load %arg8[%c4, %c0_96, %c128_97] : memref<8x8x256xf32, #tpu.memory_space<vmem>>, vector<1x8x128xf32>
    %373 = vector.shape_cast %372 : vector<1x8x128xf32> to vector<8x128xf32>
    %374 = vector.shape_cast %371 : vector<8x128xf32> to vector<1x8x128xf32>
    tpu.vector_store %arg8[%c4, %c0_96, %c128_97], %374 {strides = array<i32>} : memref<8x8x256xf32, #tpu.memory_space<vmem>>, vector<1x8x128xf32>,
    %c32_98 = arith.constant 32 : index
    %c0_99 = arith.constant 0 : index
    %375 = vector.load %arg10[%c32_98, %c0_99] : memref<64x512xf32, #tpu.memory_space<vmem>>, vector<8x512xf32>
    %376 = arith.truncf %351 : vector<8x128xf32> to vector<8x128xbf16>
    %c0_100 = arith.constant 0 : index
    %c0_101 = arith.constant 0 : index
    %377 = vector.load %arg3[%c0_100, %c0_101] : memref<128x512xbf16, #tpu.memory_space<vmem>>, vector<128x512xbf16>
    %cst_102 = arith.constant dense<0.000000e+00> : vector<8x512xf32>
    %378 = tpu.matmul %376, %377, %cst_102 {dimension_numbers = #tpu.dot_dimension_numbers<[1], [0], [0], [1], [0, 0, 1, 1], [], []>} : vector<8x128xbf16>, vector<128x512xbf16>, vector<8x512xf32> -> vector<8x512xf32>
    %379 = arith.addf %375, %378 : vector<8x512xf32>
    %c24_103 = arith.constant 24 : index
    %c0_104 = arith.constant 0 : index
    %380 = vector.load %arg11[%c24_103, %c0_104] : memref<64x512xf32, #tpu.memory_space<vmem>>, vector<8x512xf32>
    %381 = arith.truncf %357 : vector<8x128xf32> to vector<8x128xbf16>
    %c0_105 = arith.constant 0 : index
    %c0_106 = arith.constant 0 : index
    %382 = vector.load %arg6[%c0_105, %c0_106] : memref<128x512xbf16, #tpu.memory_space<vmem>>, vector<128x512xbf16>
    %cst_107 = arith.constant dense<0.000000e+00> : vector<8x512xf32>
    %383 = tpu.matmul %381, %382, %cst_107 {dimension_numbers = #tpu.dot_dimension_numbers<[1], [0], [0], [1], [0, 0, 1, 1], [], []>} : vector<8x128xbf16>, vector<128x512xbf16>, vector<8x512xf32> -> vector<8x512xf32>
    %384 = arith.addf %380, %383 : vector<8x512xf32>
    %385 = vector.extract_strided_slice %379 {offsets = [0, 0], sizes = [8, 128], strides = [1, 1]} : vector<8x512xf32> to vector<8x128xf32>
    %386 = arith.negf %385 : vector<8x128xf32>
    %387 = math.exp %386 : vector<8x128xf32>
    %cst_108 = arith.constant 1.000000e+00 : f32
    %388 = vector.broadcast %cst_108 : f32 to vector<8x128xf32>
    %389 = arith.addf %388, %387 : vector<8x128xf32>
    %390 = arith.divf %388, %389 : vector<8x128xf32>
    %391 = vector.extract_strided_slice %379 {offsets = [0, 128], sizes = [8, 128], strides = [1, 1]} : vector<8x512xf32> to vector<8x128xf32>
    %392 = arith.negf %391 : vector<8x128xf32>
    %393 = math.exp %392 : vector<8x128xf32>
    %cst_109 = arith.constant 1.000000e+00 : f32
    %394 = vector.broadcast %cst_109 : f32 to vector<8x128xf32>
    %395 = arith.addf %394, %393 : vector<8x128xf32>
    %396 = arith.divf %394, %395 : vector<8x128xf32>
    %397 = vector.extract_strided_slice %379 {offsets = [0, 256], sizes = [8, 128], strides = [1, 1]} : vector<8x512xf32> to vector<8x128xf32>
    %398 = math.tanh %397 : vector<8x128xf32>
    %399 = vector.extract_strided_slice %379 {offsets = [0, 384], sizes = [8, 128], strides = [1, 1]} : vector<8x512xf32> to vector<8x128xf32>
    %400 = arith.negf %399 : vector<8x128xf32>
    %401 = math.exp %400 : vector<8x128xf32>
    %cst_110 = arith.constant 1.000000e+00 : f32
    %402 = vector.broadcast %cst_110 : f32 to vector<8x128xf32>
    %403 = arith.addf %402, %401 : vector<8x128xf32>
    %404 = arith.divf %402, %403 : vector<8x128xf32>
    %405 = arith.mulf %396, %354 : vector<8x128xf32>
    %406 = arith.mulf %390, %398 : vector<8x128xf32>
    %407 = arith.addf %405, %406 : vector<8x128xf32>
    %408 = math.tanh %407 : vector<8x128xf32>
    %409 = arith.mulf %404, %408 : vector<8x128xf32>
    %410 = vector.extract_strided_slice %384 {offsets = [0, 0], sizes = [8, 128], strides = [1, 1]} : vector<8x512xf32> to vector<8x128xf32>
    %411 = arith.negf %410 : vector<8x128xf32>
    %412 = math.exp %411 : vector<8x128xf32>
    %cst_111 = arith.constant 1.000000e+00 : f32
    %413 = vector.broadcast %cst_111 : f32 to vector<8x128xf32>
    %414 = arith.addf %413, %412 : vector<8x128xf32>
    %415 = arith.divf %413, %414 : vector<8x128xf32>
    %416 = vector.extract_strided_slice %384 {offsets = [0, 128], sizes = [8, 128], strides = [1, 1]} : vector<8x512xf32> to vector<8x128xf32>
    %417 = arith.negf %416 : vector<8x128xf32>
    %418 = math.exp %417 : vector<8x128xf32>
    %cst_112 = arith.constant 1.000000e+00 : f32
    %419 = vector.broadcast %cst_112 : f32 to vector<8x128xf32>
    %420 = arith.addf %419, %418 : vector<8x128xf32>
    %421 = arith.divf %419, %420 : vector<8x128xf32>
    %422 = vector.extract_strided_slice %384 {offsets = [0, 256], sizes = [8, 128], strides = [1, 1]} : vector<8x512xf32> to vector<8x128xf32>
    %423 = math.tanh %422 : vector<8x128xf32>
    %424 = vector.extract_strided_slice %384 {offsets = [0, 384], sizes = [8, 128], strides = [1, 1]} : vector<8x512xf32> to vector<8x128xf32>
    %425 = arith.negf %424 : vector<8x128xf32>
    %426 = math.exp %425 : vector<8x128xf32>
    %cst_113 = arith.constant 1.000000e+00 : f32
    %427 = vector.broadcast %cst_113 : f32 to vector<8x128xf32>
    %428 = arith.addf %427, %426 : vector<8x128xf32>
    %429 = arith.divf %427, %428 : vector<8x128xf32>
    %430 = arith.mulf %421, %360 : vector<8x128xf32>
    %431 = arith.mulf %415, %423 : vector<8x128xf32>
    %432 = arith.addf %430, %431 : vector<8x128xf32>
    %433 = math.tanh %432 : vector<8x128xf32>
    %434 = arith.mulf %429, %433 : vector<8x128xf32>
    %c4_i32_114 = arith.constant 4 : i32
    %435 = vector.broadcast %c4_i32_114 : i32 to vector<8x1xi32>
    %436 = arith.cmpi sgt, %0, %435 : vector<8x1xi32>
    %c3_i32_115 = arith.constant 3 : i32
    %437 = vector.broadcast %c3_i32_115 : i32 to vector<8x1xi32>
    %438 = arith.cmpi sgt, %0, %437 : vector<8x1xi32>
    %439 = vector.shape_cast %436 : vector<8x1xi1> to vector<8x1xi1>
    %440 = vector.broadcast %439 : vector<8x1xi1> to vector<8x128xi1>
    %441 = arith.select %440, %409, %351 : vector<8x128xi1>, vector<8x128xf32>
    %442 = vector.shape_cast %436 : vector<8x1xi1> to vector<8x1xi1>
    %443 = vector.broadcast %442 : vector<8x1xi1> to vector<8x128xi1>
    %444 = arith.select %443, %407, %354 : vector<8x128xi1>, vector<8x128xf32>
    %445 = vector.shape_cast %438 : vector<8x1xi1> to vector<8x1xi1>
    %446 = vector.broadcast %445 : vector<8x1xi1> to vector<8x128xi1>
    %447 = arith.select %446, %434, %357 : vector<8x128xi1>, vector<8x128xf32>
    %448 = vector.shape_cast %438 : vector<8x1xi1> to vector<8x1xi1>
    %449 = vector.broadcast %448 : vector<8x1xi1> to vector<8x128xi1>
    %450 = arith.select %449, %432, %360 : vector<8x128xi1>, vector<8x128xf32>
    %cst_116 = arith.constant 0.000000e+00 : f32
    %451 = vector.shape_cast %436 : vector<8x1xi1> to vector<8x1xi1>
    %452 = vector.broadcast %451 : vector<8x1xi1> to vector<8x128xi1>
    %453 = vector.broadcast %cst_116 : f32 to vector<8x128xf32>
    %454 = arith.select %452, %409, %453 : vector<8x128xi1>, vector<8x128xf32>
    %c4_117 = arith.constant 4 : index
    %c0_118 = arith.constant 0 : index
    %c0_119 = arith.constant 0 : index
    %455 = vector.load %arg8[%c4_117, %c0_118, %c0_119] : memref<8x8x256xf32, #tpu.memory_space<vmem>>, vector<1x8x128xf32>
    %456 = vector.shape_cast %455 : vector<1x8x128xf32> to vector<8x128xf32>
    %457 = vector.shape_cast %454 : vector<8x128xf32> to vector<1x8x128xf32>
    tpu.vector_store %arg8[%c4_117, %c0_118, %c0_119], %457 {strides = array<i32>} : memref<8x8x256xf32, #tpu.memory_space<vmem>>, vector<1x8x128xf32>,
    %cst_120 = arith.constant 0.000000e+00 : f32
    %458 = vector.shape_cast %438 : vector<8x1xi1> to vector<8x1xi1>
    %459 = vector.broadcast %458 : vector<8x1xi1> to vector<8x128xi1>
    %460 = vector.broadcast %cst_120 : f32 to vector<8x128xf32>
    %461 = arith.select %459, %434, %460 : vector<8x128xi1>, vector<8x128xf32>
    %c3_121 = arith.constant 3 : index
    %c0_122 = arith.constant 0 : index
    %c128_123 = arith.constant 128 : index
    %462 = vector.load %arg8[%c3_121, %c0_122, %c128_123] : memref<8x8x256xf32, #tpu.memory_space<vmem>>, vector<1x8x128xf32>
    %463 = vector.shape_cast %462 : vector<1x8x128xf32> to vector<8x128xf32>
    %464 = vector.shape_cast %461 : vector<8x128xf32> to vector<1x8x128xf32>
    tpu.vector_store %arg8[%c3_121, %c0_122, %c128_123], %464 {strides = array<i32>} : memref<8x8x256xf32, #tpu.memory_space<vmem>>, vector<1x8x128xf32>,
    %c40_124 = arith.constant 40 : index
    %c0_125 = arith.constant 0 : index
    %465 = vector.load %arg10[%c40_124, %c0_125] : memref<64x512xf32, #tpu.memory_space<vmem>>, vector<8x512xf32>
    %466 = arith.truncf %441 : vector<8x128xf32> to vector<8x128xbf16>
    %c0_126 = arith.constant 0 : index
    %c0_127 = arith.constant 0 : index
    %467 = vector.load %arg3[%c0_126, %c0_127] : memref<128x512xbf16, #tpu.memory_space<vmem>>, vector<128x512xbf16>
    %cst_128 = arith.constant dense<0.000000e+00> : vector<8x512xf32>
    %468 = tpu.matmul %466, %467, %cst_128 {dimension_numbers = #tpu.dot_dimension_numbers<[1], [0], [0], [1], [0, 0, 1, 1], [], []>} : vector<8x128xbf16>, vector<128x512xbf16>, vector<8x512xf32> -> vector<8x512xf32>
    %469 = arith.addf %465, %468 : vector<8x512xf32>
    %c16_129 = arith.constant 16 : index
    %c0_130 = arith.constant 0 : index
    %470 = vector.load %arg11[%c16_129, %c0_130] : memref<64x512xf32, #tpu.memory_space<vmem>>, vector<8x512xf32>
    %471 = arith.truncf %447 : vector<8x128xf32> to vector<8x128xbf16>
    %c0_131 = arith.constant 0 : index
    %c0_132 = arith.constant 0 : index
    %472 = vector.load %arg6[%c0_131, %c0_132] : memref<128x512xbf16, #tpu.memory_space<vmem>>, vector<128x512xbf16>
    %cst_133 = arith.constant dense<0.000000e+00> : vector<8x512xf32>
    %473 = tpu.matmul %471, %472, %cst_133 {dimension_numbers = #tpu.dot_dimension_numbers<[1], [0], [0], [1], [0, 0, 1, 1], [], []>} : vector<8x128xbf16>, vector<128x512xbf16>, vector<8x512xf32> -> vector<8x512xf32>
    %474 = arith.addf %470, %473 : vector<8x512xf32>
    %475 = vector.extract_strided_slice %469 {offsets = [0, 0], sizes = [8, 128], strides = [1, 1]} : vector<8x512xf32> to vector<8x128xf32>
    %476 = arith.negf %475 : vector<8x128xf32>
    %477 = math.exp %476 : vector<8x128xf32>
    %cst_134 = arith.constant 1.000000e+00 : f32
    %478 = vector.broadcast %cst_134 : f32 to vector<8x128xf32>
    %479 = arith.addf %478, %477 : vector<8x128xf32>
    %480 = arith.divf %478, %479 : vector<8x128xf32>
    %481 = vector.extract_strided_slice %469 {offsets = [0, 128], sizes = [8, 128], strides = [1, 1]} : vector<8x512xf32> to vector<8x128xf32>
    %482 = arith.negf %481 : vector<8x128xf32>
    %483 = math.exp %482 : vector<8x128xf32>
    %cst_135 = arith.constant 1.000000e+00 : f32
    %484 = vector.broadcast %cst_135 : f32 to vector<8x128xf32>
    %485 = arith.addf %484, %483 : vector<8x128xf32>
    %486 = arith.divf %484, %485 : vector<8x128xf32>
    %487 = vector.extract_strided_slice %469 {offsets = [0, 256], sizes = [8, 128], strides = [1, 1]} : vector<8x512xf32> to vector<8x128xf32>
    %488 = math.tanh %487 : vector<8x128xf32>
    %489 = vector.extract_strided_slice %469 {offsets = [0, 384], sizes = [8, 128], strides = [1, 1]} : vector<8x512xf32> to vector<8x128xf32>
    %490 = arith.negf %489 : vector<8x128xf32>
    %491 = math.exp %490 : vector<8x128xf32>
    %cst_136 = arith.constant 1.000000e+00 : f32
    %492 = vector.broadcast %cst_136 : f32 to vector<8x128xf32>
    %493 = arith.addf %492, %491 : vector<8x128xf32>
    %494 = arith.divf %492, %493 : vector<8x128xf32>
    %495 = arith.mulf %486, %444 : vector<8x128xf32>
    %496 = arith.mulf %480, %488 : vector<8x128xf32>
    %497 = arith.addf %495, %496 : vector<8x128xf32>
    %498 = math.tanh %497 : vector<8x128xf32>
    %499 = arith.mulf %494, %498 : vector<8x128xf32>
    %500 = vector.extract_strided_slice %474 {offsets = [0, 0], sizes = [8, 128], strides = [1, 1]} : vector<8x512xf32> to vector<8x128xf32>
    %501 = arith.negf %500 : vector<8x128xf32>
    %502 = math.exp %501 : vector<8x128xf32>
    %cst_137 = arith.constant 1.000000e+00 : f32
    %503 = vector.broadcast %cst_137 : f32 to vector<8x128xf32>
    %504 = arith.addf %503, %502 : vector<8x128xf32>
    %505 = arith.divf %503, %504 : vector<8x128xf32>
    %506 = vector.extract_strided_slice %474 {offsets = [0, 128], sizes = [8, 128], strides = [1, 1]} : vector<8x512xf32> to vector<8x128xf32>
    %507 = arith.negf %506 : vector<8x128xf32>
    %508 = math.exp %507 : vector<8x128xf32>
    %cst_138 = arith.constant 1.000000e+00 : f32
    %509 = vector.broadcast %cst_138 : f32 to vector<8x128xf32>
    %510 = arith.addf %509, %508 : vector<8x128xf32>
    %511 = arith.divf %509, %510 : vector<8x128xf32>
    %512 = vector.extract_strided_slice %474 {offsets = [0, 256], sizes = [8, 128], strides = [1, 1]} : vector<8x512xf32> to vector<8x128xf32>
    %513 = math.tanh %512 : vector<8x128xf32>
    %514 = vector.extract_strided_slice %474 {offsets = [0, 384], sizes = [8, 128], strides = [1, 1]} : vector<8x512xf32> to vector<8x128xf32>
    %515 = arith.negf %514 : vector<8x128xf32>
    %516 = math.exp %515 : vector<8x128xf32>
    %cst_139 = arith.constant 1.000000e+00 : f32
    %517 = vector.broadcast %cst_139 : f32 to vector<8x128xf32>
    %518 = arith.addf %517, %516 : vector<8x128xf32>
    %519 = arith.divf %517, %518 : vector<8x128xf32>
    %520 = arith.mulf %511, %450 : vector<8x128xf32>
    %521 = arith.mulf %505, %513 : vector<8x128xf32>
    %522 = arith.addf %520, %521 : vector<8x128xf32>
    %523 = math.tanh %522 : vector<8x128xf32>
    %524 = arith.mulf %519, %523 : vector<8x128xf32>
    %c5_i32_140 = arith.constant 5 : i32
    %525 = vector.broadcast %c5_i32_140 : i32 to vector<8x1xi32>
    %526 = arith.cmpi sgt, %0, %525 : vector<8x1xi32>
    %c2_i32_141 = arith.constant 2 : i32
    %527 = vector.broadcast %c2_i32_141 : i32 to vector<8x1xi32>
    %528 = arith.cmpi sgt, %0, %527 : vector<8x1xi32>
    %529 = vector.shape_cast %526 : vector<8x1xi1> to vector<8x1xi1>
    %530 = vector.broadcast %529 : vector<8x1xi1> to vector<8x128xi1>
    %531 = arith.select %530, %499, %441 : vector<8x128xi1>, vector<8x128xf32>
    %532 = vector.shape_cast %526 : vector<8x1xi1> to vector<8x1xi1>
    %533 = vector.broadcast %532 : vector<8x1xi1> to vector<8x128xi1>
    %534 = arith.select %533, %497, %444 : vector<8x128xi1>, vector<8x128xf32>
    %535 = vector.shape_cast %528 : vector<8x1xi1> to vector<8x1xi1>
    %536 = vector.broadcast %535 : vector<8x1xi1> to vector<8x128xi1>
    %537 = arith.select %536, %524, %447 : vector<8x128xi1>, vector<8x128xf32>
    %538 = vector.shape_cast %528 : vector<8x1xi1> to vector<8x1xi1>
    %539 = vector.broadcast %538 : vector<8x1xi1> to vector<8x128xi1>
    %540 = arith.select %539, %522, %450 : vector<8x128xi1>, vector<8x128xf32>
    %cst_142 = arith.constant 0.000000e+00 : f32
    %541 = vector.shape_cast %526 : vector<8x1xi1> to vector<8x1xi1>
    %542 = vector.broadcast %541 : vector<8x1xi1> to vector<8x128xi1>
    %543 = vector.broadcast %cst_142 : f32 to vector<8x128xf32>
    %544 = arith.select %542, %499, %543 : vector<8x128xi1>, vector<8x128xf32>
    %c5_143 = arith.constant 5 : index
    %c0_144 = arith.constant 0 : index
    %c0_145 = arith.constant 0 : index
    %545 = vector.load %arg8[%c5_143, %c0_144, %c0_145] : memref<8x8x256xf32, #tpu.memory_space<vmem>>, vector<1x8x128xf32>
    %546 = vector.shape_cast %545 : vector<1x8x128xf32> to vector<8x128xf32>
    %547 = vector.shape_cast %544 : vector<8x128xf32> to vector<1x8x128xf32>
    tpu.vector_store %arg8[%c5_143, %c0_144, %c0_145], %547 {strides = array<i32>} : memref<8x8x256xf32, #tpu.memory_space<vmem>>, vector<1x8x128xf32>,
    %cst_146 = arith.constant 0.000000e+00 : f32
    %548 = vector.shape_cast %528 : vector<8x1xi1> to vector<8x1xi1>
    %549 = vector.broadcast %548 : vector<8x1xi1> to vector<8x128xi1>
    %550 = vector.broadcast %cst_146 : f32 to vector<8x128xf32>
    %551 = arith.select %549, %524, %550 : vector<8x128xi1>, vector<8x128xf32>
    %c2_147 = arith.constant 2 : index
    %c0_148 = arith.constant 0 : index
    %c128_149 = arith.constant 128 : index
    %552 = vector.load %arg8[%c2_147, %c0_148, %c128_149] : memref<8x8x256xf32, #tpu.memory_space<vmem>>, vector<1x8x128xf32>
    %553 = vector.shape_cast %552 : vector<1x8x128xf32> to vector<8x128xf32>
    %554 = vector.shape_cast %551 : vector<8x128xf32> to vector<1x8x128xf32>
    tpu.vector_store %arg8[%c2_147, %c0_148, %c128_149], %554 {strides = array<i32>} : memref<8x8x256xf32, #tpu.memory_space<vmem>>, vector<1x8x128xf32>,
    %c48_150 = arith.constant 48 : index
    %c0_151 = arith.constant 0 : index
    %555 = vector.load %arg10[%c48_150, %c0_151] : memref<64x512xf32, #tpu.memory_space<vmem>>, vector<8x512xf32>
    %556 = arith.truncf %531 : vector<8x128xf32> to vector<8x128xbf16>
    %c0_152 = arith.constant 0 : index
    %c0_153 = arith.constant 0 : index
    %557 = vector.load %arg3[%c0_152, %c0_153] : memref<128x512xbf16, #tpu.memory_space<vmem>>, vector<128x512xbf16>
    %cst_154 = arith.constant dense<0.000000e+00> : vector<8x512xf32>
    %558 = tpu.matmul %556, %557, %cst_154 {dimension_numbers = #tpu.dot_dimension_numbers<[1], [0], [0], [1], [0, 0, 1, 1], [], []>} : vector<8x128xbf16>, vector<128x512xbf16>, vector<8x512xf32> -> vector<8x512xf32>
    %559 = arith.addf %555, %558 : vector<8x512xf32>
    %c8_155 = arith.constant 8 : index
    %c0_156 = arith.constant 0 : index
    %560 = vector.load %arg11[%c8_155, %c0_156] : memref<64x512xf32, #tpu.memory_space<vmem>>, vector<8x512xf32>
    %561 = arith.truncf %537 : vector<8x128xf32> to vector<8x128xbf16>
    %c0_157 = arith.constant 0 : index
    %c0_158 = arith.constant 0 : index
    %562 = vector.load %arg6[%c0_157, %c0_158] : memref<128x512xbf16, #tpu.memory_space<vmem>>, vector<128x512xbf16>
    %cst_159 = arith.constant dense<0.000000e+00> : vector<8x512xf32>
    %563 = tpu.matmul %561, %562, %cst_159 {dimension_numbers = #tpu.dot_dimension_numbers<[1], [0], [0], [1], [0, 0, 1, 1], [], []>} : vector<8x128xbf16>, vector<128x512xbf16>, vector<8x512xf32> -> vector<8x512xf32>
    %564 = arith.addf %560, %563 : vector<8x512xf32>
    %565 = vector.extract_strided_slice %559 {offsets = [0, 0], sizes = [8, 128], strides = [1, 1]} : vector<8x512xf32> to vector<8x128xf32>
    %566 = arith.negf %565 : vector<8x128xf32>
    %567 = math.exp %566 : vector<8x128xf32>
    %cst_160 = arith.constant 1.000000e+00 : f32
    %568 = vector.broadcast %cst_160 : f32 to vector<8x128xf32>
    %569 = arith.addf %568, %567 : vector<8x128xf32>
    %570 = arith.divf %568, %569 : vector<8x128xf32>
    %571 = vector.extract_strided_slice %559 {offsets = [0, 128], sizes = [8, 128], strides = [1, 1]} : vector<8x512xf32> to vector<8x128xf32>
    %572 = arith.negf %571 : vector<8x128xf32>
    %573 = math.exp %572 : vector<8x128xf32>
    %cst_161 = arith.constant 1.000000e+00 : f32
    %574 = vector.broadcast %cst_161 : f32 to vector<8x128xf32>
    %575 = arith.addf %574, %573 : vector<8x128xf32>
    %576 = arith.divf %574, %575 : vector<8x128xf32>
    %577 = vector.extract_strided_slice %559 {offsets = [0, 256], sizes = [8, 128], strides = [1, 1]} : vector<8x512xf32> to vector<8x128xf32>
    %578 = math.tanh %577 : vector<8x128xf32>
    %579 = vector.extract_strided_slice %559 {offsets = [0, 384], sizes = [8, 128], strides = [1, 1]} : vector<8x512xf32> to vector<8x128xf32>
    %580 = arith.negf %579 : vector<8x128xf32>
    %581 = math.exp %580 : vector<8x128xf32>
    %cst_162 = arith.constant 1.000000e+00 : f32
    %582 = vector.broadcast %cst_162 : f32 to vector<8x128xf32>
    %583 = arith.addf %582, %581 : vector<8x128xf32>
    %584 = arith.divf %582, %583 : vector<8x128xf32>
    %585 = arith.mulf %576, %534 : vector<8x128xf32>
    %586 = arith.mulf %570, %578 : vector<8x128xf32>
    %587 = arith.addf %585, %586 : vector<8x128xf32>
    %588 = math.tanh %587 : vector<8x128xf32>
    %589 = arith.mulf %584, %588 : vector<8x128xf32>
    %590 = vector.extract_strided_slice %564 {offsets = [0, 0], sizes = [8, 128], strides = [1, 1]} : vector<8x512xf32> to vector<8x128xf32>
    %591 = arith.negf %590 : vector<8x128xf32>
    %592 = math.exp %591 : vector<8x128xf32>
    %cst_163 = arith.constant 1.000000e+00 : f32
    %593 = vector.broadcast %cst_163 : f32 to vector<8x128xf32>
    %594 = arith.addf %593, %592 : vector<8x128xf32>
    %595 = arith.divf %593, %594 : vector<8x128xf32>
    %596 = vector.extract_strided_slice %564 {offsets = [0, 128], sizes = [8, 128], strides = [1, 1]} : vector<8x512xf32> to vector<8x128xf32>
    %597 = arith.negf %596 : vector<8x128xf32>
    %598 = math.exp %597 : vector<8x128xf32>
    %cst_164 = arith.constant 1.000000e+00 : f32
    %599 = vector.broadcast %cst_164 : f32 to vector<8x128xf32>
    %600 = arith.addf %599, %598 : vector<8x128xf32>
    %601 = arith.divf %599, %600 : vector<8x128xf32>
    %602 = vector.extract_strided_slice %564 {offsets = [0, 256], sizes = [8, 128], strides = [1, 1]} : vector<8x512xf32> to vector<8x128xf32>
    %603 = math.tanh %602 : vector<8x128xf32>
    %604 = vector.extract_strided_slice %564 {offsets = [0, 384], sizes = [8, 128], strides = [1, 1]} : vector<8x512xf32> to vector<8x128xf32>
    %605 = arith.negf %604 : vector<8x128xf32>
    %606 = math.exp %605 : vector<8x128xf32>
    %cst_165 = arith.constant 1.000000e+00 : f32
    %607 = vector.broadcast %cst_165 : f32 to vector<8x128xf32>
    %608 = arith.addf %607, %606 : vector<8x128xf32>
    %609 = arith.divf %607, %608 : vector<8x128xf32>
    %610 = arith.mulf %601, %540 : vector<8x128xf32>
    %611 = arith.mulf %595, %603 : vector<8x128xf32>
    %612 = arith.addf %610, %611 : vector<8x128xf32>
    %613 = math.tanh %612 : vector<8x128xf32>
    %614 = arith.mulf %609, %613 : vector<8x128xf32>
    %c6_i32_166 = arith.constant 6 : i32
    %615 = vector.broadcast %c6_i32_166 : i32 to vector<8x1xi32>
    %616 = arith.cmpi sgt, %0, %615 : vector<8x1xi32>
    %c1_i32_167 = arith.constant 1 : i32
    %617 = vector.broadcast %c1_i32_167 : i32 to vector<8x1xi32>
    %618 = arith.cmpi sgt, %0, %617 : vector<8x1xi32>
    %619 = vector.shape_cast %616 : vector<8x1xi1> to vector<8x1xi1>
    %620 = vector.broadcast %619 : vector<8x1xi1> to vector<8x128xi1>
    %621 = arith.select %620, %589, %531 : vector<8x128xi1>, vector<8x128xf32>
    %622 = vector.shape_cast %616 : vector<8x1xi1> to vector<8x1xi1>
    %623 = vector.broadcast %622 : vector<8x1xi1> to vector<8x128xi1>
    %624 = arith.select %623, %587, %534 : vector<8x128xi1>, vector<8x128xf32>
    %625 = vector.shape_cast %618 : vector<8x1xi1> to vector<8x1xi1>
    %626 = vector.broadcast %625 : vector<8x1xi1> to vector<8x128xi1>
    %627 = arith.select %626, %614, %537 : vector<8x128xi1>, vector<8x128xf32>
    %628 = vector.shape_cast %618 : vector<8x1xi1> to vector<8x1xi1>
    %629 = vector.broadcast %628 : vector<8x1xi1> to vector<8x128xi1>
    %630 = arith.select %629, %612, %540 : vector<8x128xi1>, vector<8x128xf32>
    %cst_168 = arith.constant 0.000000e+00 : f32
    %631 = vector.shape_cast %616 : vector<8x1xi1> to vector<8x1xi1>
    %632 = vector.broadcast %631 : vector<8x1xi1> to vector<8x128xi1>
    %633 = vector.broadcast %cst_168 : f32 to vector<8x128xf32>
    %634 = arith.select %632, %589, %633 : vector<8x128xi1>, vector<8x128xf32>
    %c6_169 = arith.constant 6 : index
    %c0_170 = arith.constant 0 : index
    %c0_171 = arith.constant 0 : index
    %635 = vector.load %arg8[%c6_169, %c0_170, %c0_171] : memref<8x8x256xf32, #tpu.memory_space<vmem>>, vector<1x8x128xf32>
    %636 = vector.shape_cast %635 : vector<1x8x128xf32> to vector<8x128xf32>
    %637 = vector.shape_cast %634 : vector<8x128xf32> to vector<1x8x128xf32>
    tpu.vector_store %arg8[%c6_169, %c0_170, %c0_171], %637 {strides = array<i32>} : memref<8x8x256xf32, #tpu.memory_space<vmem>>, vector<1x8x128xf32>,
    %cst_172 = arith.constant 0.000000e+00 : f32
    %638 = vector.shape_cast %618 : vector<8x1xi1> to vector<8x1xi1>
    %639 = vector.broadcast %638 : vector<8x1xi1> to vector<8x128xi1>
    %640 = vector.broadcast %cst_172 : f32 to vector<8x128xf32>
    %641 = arith.select %639, %614, %640 : vector<8x128xi1>, vector<8x128xf32>
    %c1_173 = arith.constant 1 : index
    %c0_174 = arith.constant 0 : index
    %c128_175 = arith.constant 128 : index
    %642 = vector.load %arg8[%c1_173, %c0_174, %c128_175] : memref<8x8x256xf32, #tpu.memory_space<vmem>>, vector<1x8x128xf32>
    %643 = vector.shape_cast %642 : vector<1x8x128xf32> to vector<8x128xf32>
    %644 = vector.shape_cast %641 : vector<8x128xf32> to vector<1x8x128xf32>
    tpu.vector_store %arg8[%c1_173, %c0_174, %c128_175], %644 {strides = array<i32>} : memref<8x8x256xf32, #tpu.memory_space<vmem>>, vector<1x8x128xf32>,
    %c56_176 = arith.constant 56 : index
    %c0_177 = arith.constant 0 : index
    %645 = vector.load %arg10[%c56_176, %c0_177] : memref<64x512xf32, #tpu.memory_space<vmem>>, vector<8x512xf32>
    %646 = arith.truncf %621 : vector<8x128xf32> to vector<8x128xbf16>
    %c0_178 = arith.constant 0 : index
    %c0_179 = arith.constant 0 : index
    %647 = vector.load %arg3[%c0_178, %c0_179] : memref<128x512xbf16, #tpu.memory_space<vmem>>, vector<128x512xbf16>
    %cst_180 = arith.constant dense<0.000000e+00> : vector<8x512xf32>
    %648 = tpu.matmul %646, %647, %cst_180 {dimension_numbers = #tpu.dot_dimension_numbers<[1], [0], [0], [1], [0, 0, 1, 1], [], []>} : vector<8x128xbf16>, vector<128x512xbf16>, vector<8x512xf32> -> vector<8x512xf32>
    %649 = arith.addf %645, %648 : vector<8x512xf32>
    %c0_181 = arith.constant 0 : index
    %c0_182 = arith.constant 0 : index
    %650 = vector.load %arg11[%c0_181, %c0_182] : memref<64x512xf32, #tpu.memory_space<vmem>>, vector<8x512xf32>
    %651 = arith.truncf %627 : vector<8x128xf32> to vector<8x128xbf16>
    %c0_183 = arith.constant 0 : index
    %c0_184 = arith.constant 0 : index
    %652 = vector.load %arg6[%c0_183, %c0_184] : memref<128x512xbf16, #tpu.memory_space<vmem>>, vector<128x512xbf16>
    %cst_185 = arith.constant dense<0.000000e+00> : vector<8x512xf32>
    %653 = tpu.matmul %651, %652, %cst_185 {dimension_numbers = #tpu.dot_dimension_numbers<[1], [0], [0], [1], [0, 0, 1, 1], [], []>} : vector<8x128xbf16>, vector<128x512xbf16>, vector<8x512xf32> -> vector<8x512xf32>
    %654 = arith.addf %650, %653 : vector<8x512xf32>
    %655 = vector.extract_strided_slice %649 {offsets = [0, 0], sizes = [8, 128], strides = [1, 1]} : vector<8x512xf32> to vector<8x128xf32>
    %656 = arith.negf %655 : vector<8x128xf32>
    %657 = math.exp %656 : vector<8x128xf32>
    %cst_186 = arith.constant 1.000000e+00 : f32
    %658 = vector.broadcast %cst_186 : f32 to vector<8x128xf32>
    %659 = arith.addf %658, %657 : vector<8x128xf32>
    %660 = arith.divf %658, %659 : vector<8x128xf32>
    %661 = vector.extract_strided_slice %649 {offsets = [0, 128], sizes = [8, 128], strides = [1, 1]} : vector<8x512xf32> to vector<8x128xf32>
    %662 = arith.negf %661 : vector<8x128xf32>
    %663 = math.exp %662 : vector<8x128xf32>
    %cst_187 = arith.constant 1.000000e+00 : f32
    %664 = vector.broadcast %cst_187 : f32 to vector<8x128xf32>
    %665 = arith.addf %664, %663 : vector<8x128xf32>
    %666 = arith.divf %664, %665 : vector<8x128xf32>
    %667 = vector.extract_strided_slice %649 {offsets = [0, 256], sizes = [8, 128], strides = [1, 1]} : vector<8x512xf32> to vector<8x128xf32>
    %668 = math.tanh %667 : vector<8x128xf32>
    %669 = vector.extract_strided_slice %649 {offsets = [0, 384], sizes = [8, 128], strides = [1, 1]} : vector<8x512xf32> to vector<8x128xf32>
    %670 = arith.negf %669 : vector<8x128xf32>
    %671 = math.exp %670 : vector<8x128xf32>
    %cst_188 = arith.constant 1.000000e+00 : f32
    %672 = vector.broadcast %cst_188 : f32 to vector<8x128xf32>
    %673 = arith.addf %672, %671 : vector<8x128xf32>
    %674 = arith.divf %672, %673 : vector<8x128xf32>
    %675 = arith.mulf %666, %624 : vector<8x128xf32>
    %676 = arith.mulf %660, %668 : vector<8x128xf32>
    %677 = arith.addf %675, %676 : vector<8x128xf32>
    %678 = math.tanh %677 : vector<8x128xf32>
    %679 = arith.mulf %674, %678 : vector<8x128xf32>
    %680 = vector.extract_strided_slice %654 {offsets = [0, 0], sizes = [8, 128], strides = [1, 1]} : vector<8x512xf32> to vector<8x128xf32>
    %681 = arith.negf %680 : vector<8x128xf32>
    %682 = math.exp %681 : vector<8x128xf32>
    %cst_189 = arith.constant 1.000000e+00 : f32
    %683 = vector.broadcast %cst_189 : f32 to vector<8x128xf32>
    %684 = arith.addf %683, %682 : vector<8x128xf32>
    %685 = arith.divf %683, %684 : vector<8x128xf32>
    %686 = vector.extract_strided_slice %654 {offsets = [0, 128], sizes = [8, 128], strides = [1, 1]} : vector<8x512xf32> to vector<8x128xf32>
    %687 = arith.negf %686 : vector<8x128xf32>
    %688 = math.exp %687 : vector<8x128xf32>
    %cst_190 = arith.constant 1.000000e+00 : f32
    %689 = vector.broadcast %cst_190 : f32 to vector<8x128xf32>
    %690 = arith.addf %689, %688 : vector<8x128xf32>
    %691 = arith.divf %689, %690 : vector<8x128xf32>
    %692 = vector.extract_strided_slice %654 {offsets = [0, 256], sizes = [8, 128], strides = [1, 1]} : vector<8x512xf32> to vector<8x128xf32>
    %693 = math.tanh %692 : vector<8x128xf32>
    %694 = vector.extract_strided_slice %654 {offsets = [0, 384], sizes = [8, 128], strides = [1, 1]} : vector<8x512xf32> to vector<8x128xf32>
    %695 = arith.negf %694 : vector<8x128xf32>
    %696 = math.exp %695 : vector<8x128xf32>
    %cst_191 = arith.constant 1.000000e+00 : f32
    %697 = vector.broadcast %cst_191 : f32 to vector<8x128xf32>
    %698 = arith.addf %697, %696 : vector<8x128xf32>
    %699 = arith.divf %697, %698 : vector<8x128xf32>
    %700 = arith.mulf %691, %630 : vector<8x128xf32>
    %701 = arith.mulf %685, %693 : vector<8x128xf32>
    %702 = arith.addf %700, %701 : vector<8x128xf32>
    %703 = math.tanh %702 : vector<8x128xf32>
    %704 = arith.mulf %699, %703 : vector<8x128xf32>
    %c7_i32_192 = arith.constant 7 : i32
    %705 = vector.broadcast %c7_i32_192 : i32 to vector<8x1xi32>
    %706 = arith.cmpi sgt, %0, %705 : vector<8x1xi32>
    %c0_i32_193 = arith.constant 0 : i32
    %707 = vector.broadcast %c0_i32_193 : i32 to vector<8x1xi32>
    %708 = arith.cmpi sgt, %0, %707 : vector<8x1xi32>
    %709 = vector.shape_cast %706 : vector<8x1xi1> to vector<8x1xi1>
    %710 = vector.broadcast %709 : vector<8x1xi1> to vector<8x128xi1>
    %711 = arith.select %710, %679, %621 : vector<8x128xi1>, vector<8x128xf32>
    %712 = vector.shape_cast %708 : vector<8x1xi1> to vector<8x1xi1>
    %713 = vector.broadcast %712 : vector<8x1xi1> to vector<8x128xi1>
    %714 = arith.select %713, %704, %627 : vector<8x128xi1>, vector<8x128xf32>
    %cst_194 = arith.constant 0.000000e+00 : f32
    %715 = vector.shape_cast %706 : vector<8x1xi1> to vector<8x1xi1>
    %716 = vector.broadcast %715 : vector<8x1xi1> to vector<8x128xi1>
    %717 = vector.broadcast %cst_194 : f32 to vector<8x128xf32>
    %718 = arith.select %716, %679, %717 : vector<8x128xi1>, vector<8x128xf32>
    %c7_195 = arith.constant 7 : index
    %c0_196 = arith.constant 0 : index
    %c0_197 = arith.constant 0 : index
    %719 = vector.load %arg8[%c7_195, %c0_196, %c0_197] : memref<8x8x256xf32, #tpu.memory_space<vmem>>, vector<1x8x128xf32>
    %720 = vector.shape_cast %719 : vector<1x8x128xf32> to vector<8x128xf32>
    %721 = vector.shape_cast %718 : vector<8x128xf32> to vector<1x8x128xf32>
    tpu.vector_store %arg8[%c7_195, %c0_196, %c0_197], %721 {strides = array<i32>} : memref<8x8x256xf32, #tpu.memory_space<vmem>>, vector<1x8x128xf32>,
    %cst_198 = arith.constant 0.000000e+00 : f32
    %722 = vector.shape_cast %708 : vector<8x1xi1> to vector<8x1xi1>
    %723 = vector.broadcast %722 : vector<8x1xi1> to vector<8x128xi1>
    %724 = vector.broadcast %cst_198 : f32 to vector<8x128xf32>
    %725 = arith.select %723, %704, %724 : vector<8x128xi1>, vector<8x128xf32>
    %c0_199 = arith.constant 0 : index
    %c0_200 = arith.constant 0 : index
    %c128_201 = arith.constant 128 : index
    %726 = vector.load %arg8[%c0_199, %c0_200, %c128_201] : memref<8x8x256xf32, #tpu.memory_space<vmem>>, vector<1x8x128xf32>
    %727 = vector.shape_cast %726 : vector<1x8x128xf32> to vector<8x128xf32>
    %728 = vector.shape_cast %725 : vector<8x128xf32> to vector<1x8x128xf32>
    tpu.vector_store %arg8[%c0_199, %c0_200, %c128_201], %728 {strides = array<i32>} : memref<8x8x256xf32, #tpu.memory_space<vmem>>, vector<1x8x128xf32>,
    %c0_202 = arith.constant 0 : index
    %c0_203 = arith.constant 0 : index
    %729 = vector.load %arg9[%c0_202, %c0_203] : memref<8x256xf32, #tpu.memory_space<vmem>>, vector<8x128xf32>
    tpu.vector_store %arg9[%c0_202, %c0_203], %711 {strides = array<i32>} : memref<8x256xf32, #tpu.memory_space<vmem>>, vector<8x128xf32>,
    %c0_204 = arith.constant 0 : index
    %c128_205 = arith.constant 128 : index
    %730 = vector.load %arg9[%c0_204, %c128_205] : memref<8x256xf32, #tpu.memory_space<vmem>>, vector<8x128xf32>
    tpu.vector_store %arg9[%c0_204, %c128_205], %714 {strides = array<i32>} : memref<8x256xf32, #tpu.memory_space<vmem>>, vector<8x128xf32>,
    return
  }
}

</mosaic_0001>

<bundles_post_ra>
// kernel: rnn_encoder_forward.1
= control target key start
LH: loop header
LB: loop body
LE: loop exit
PB: predicated region body
PF: predicated region fallthrough
CT: control target
= control target key end

     0   :  { %v10023_v1 = vmov 0   ;;  %s10009_s2 = inlined_call_operand.vmem [shape: bf16[128,512], index: 2, kind: input, shape index: {}]   ;;  %s10010_s1 = inlined_call_operand.vmem [shape: bf16[64,128], index: 1, kind: input, shape index: {}]   ;;  %s10011_s5 = inlined_call_operand.vmem [shape: bf16[128,512], index: 5, kind: input, shape index: {}]   ;;  %s10012_s3 = inlined_call_operand.vmem [shape: bf16[128,512], index: 3, kind: input, shape index: {}]   ;;  %s10013_s6 = inlined_call_operand.vmem [shape: bf16[128,512], index: 6, kind: input, shape index: {}]   ;;  %s10014_s0 = inlined_call_operand.vmem [shape: s32[8,1], index: 0, kind: input, shape index: {}]   ;;  %s10015_s4 = inlined_call_operand.vmem [shape: f32[1,512], index: 4, kind: input, shape index: {}]   ;;  %s10016_s7 = inlined_call_operand.vmem [shape: f32[1,512], index: 7, kind: input, shape index: {}]   ;;  %s10017_s8 = inlined_call_operand.vmem [shape: f32[8,8,256], index: 8, kind: output, shape index: {0}]   ;;  %s10018_s9 = inlined_call_operand.vmem [shape: f32[8,256], index: 9, kind: output, shape index: {1}]  }
   0x1   :  { %v6541_v0 = vld [vmem:[%s10009_s2 + $0x4] ss:$16 sps:$4 sm:$0xff]   ;;  %311 = vmatprep.mubr.bf16.mxu0 %v10023_v1  ;;  %384 = vmatprep.mubr.bf16.mxu1 %v10023_v1  ;;  %v6543_v2 = vld [vmem:[%s10009_s2 + $0xc] ss:$16 sps:$4 sm:$0xff]   ;;  %v6545_v3 = vld [vmem:[%s10009_s2] ss:$16 sps:$4 sm:$0xff]  }
   0x2   :  { %6539 = vset.pattern.permute.xlu0 %v10023_v1  ;;  %6540 = vset.pattern.permute.xlu1 %v10023_v1  ;;  %v6546_v4 = vld [vmem:[%s10009_s2 + $0x8] ss:$16 sps:$4 sm:$0xff]   ;;  %v6547_v5 = vld [vmem:[%s10009_s2 + $0x24] ss:$16 sps:$4 sm:$0xff]   ;;  %v6549_v6 = vld [vmem:[%s10009_s2 + $0x2c] ss:$16 sps:$4 sm:$0xff]  }
   0x3   :  { %279 = vmatprep.subr.bf16.mxu0 %v6541_v0  ;;  %352 = vmatprep.subr.bf16.mxu1 %v6543_v2  ;;  %v6551_v7 = vld [vmem:[%s10009_s2 + $0x20] ss:$16 sps:$4 sm:$0xff]   ;;  %v6552_v8 = vld [vmem:[%s10009_s2 + $0x28] ss:$16 sps:$4 sm:$0xff]   ;;  %v6553_v9 = vld [vmem:[%s10009_s2 + $0x44] ss:$16 sps:$4 sm:$0xff]  }
   0x4   :  { %280 = vmatpush1.bf16.msra.mxu0 %v6545_v3  ;;  %353 = vmatpush1.bf16.msra.mxu1 %v6546_v4  ;;  %v6555_v10 = vld [vmem:[%s10009_s2 + $0x4c] ss:$16 sps:$4 sm:$0xff]   ;;  %v6557_v11 = vld [vmem:[%s10009_s2 + $0x40] ss:$16 sps:$4 sm:$0xff]   ;;  %v6558_v12 = vld [vmem:[%s10009_s2 + $0x48] ss:$16 sps:$4 sm:$0xff]  }
   0x5   :  { %281 = vmatprep.subr.bf16.mxu0 %v6547_v5  ;;  %354 = vmatprep.subr.bf16.mxu1 %v6549_v6  ;;  %v6559_v13 = vld [vmem:[%s10009_s2 + $0x64] ss:$16 sps:$4 sm:$0xff]   ;;  %v6561_v14 = vld [vmem:[%s10009_s2 + $0x6c] ss:$16 sps:$4 sm:$0xff]   ;;  %v6563_v15 = vld [vmem:[%s10009_s2 + $0x60] ss:$16 sps:$4 sm:$0xff]  }
   0x6   :  { %v6564_v16 = vld [vmem:[%s10009_s2 + $0x68] ss:$16 sps:$4 sm:$0xff]   ;;  %v6565_v17 = vld [vmem:[%s10009_s2 + $0x84] ss:$16 sps:$4 sm:$0xff]   ;;  %v6567_v18 = vld [vmem:[%s10009_s2 + $0x8c] ss:$16 sps:$4 sm:$0xff]  }
   0x7   :  { %v6569_v19 = vld [vmem:[%s10009_s2 + $0x80] ss:$16 sps:$4 sm:$0xff]   ;;  %v6570_v20 = vld [vmem:[%s10009_s2 + $0x88] ss:$16 sps:$4 sm:$0xff]   ;;  %v6571_v21 = vld [vmem:[%s10009_s2 + $0xa4] ss:$16 sps:$4 sm:$0xff]  }
   0x8   :  { %282 = vmatpush1.bf16.msra.mxu0 %v6551_v7  ;;  %355 = vmatpush1.bf16.msra.mxu1 %v6552_v8  ;;  %v6573_v22 = vld [vmem:[%s10009_s2 + $0xac] ss:$16 sps:$4 sm:$0xff]   ;;  %v6575_v23 = vld [vmem:[%s10009_s2 + $0xa0] ss:$16 sps:$4 sm:$0xff]   ;;  %v6576_v24 = vld [vmem:[%s10009_s2 + $0xa8] ss:$16 sps:$4 sm:$0xff]  }
   0x9   :  { %283 = vmatprep.subr.bf16.mxu0 %v6553_v9  ;;  %356 = vmatprep.subr.bf16.mxu1 %v6555_v10  ;;  %v6577_v25 = vld [vmem:[%s10009_s2 + $0xc4] ss:$16 sps:$4 sm:$0xff]   ;;  %v6579_v26 = vld [vmem:[%s10009_s2 + $0xcc] ss:$16 sps:$4 sm:$0xff]   ;;  %v6581_v27 = vld [vmem:[%s10009_s2 + $0xc0] ss:$16 sps:$4 sm:$0xff]  }
   0xa   :  { %v6582_v28 = vld [vmem:[%s10009_s2 + $0xc8] ss:$16 sps:$4 sm:$0xff]   ;;  %v6583_v29 = vld [vmem:[%s10009_s2 + $0xe4] ss:$16 sps:$4 sm:$0xff]   ;;  %v6585_v30 = vld [vmem:[%s10009_s2 + $0xec] ss:$16 sps:$4 sm:$0xff]  }
   0xb   :  { %v6587_v31 = vld [vmem:[%s10009_s2 + $0xe0] ss:$16 sps:$4 sm:$0xff]   ;;  %v6588_v32 = vld [vmem:[%s10009_s2 + $0xe8] ss:$16 sps:$4 sm:$0xff]   ;;  %v6592_v33 = vld [vmem:[%s10011_s5 + $0x4] ss:$16 sps:$4 sm:$0xff]  }
   0xc   :  { %284 = vmatpush1.bf16.msra.mxu0 %v6557_v11  ;;  %357 = vmatpush1.bf16.msra.mxu1 %v6558_v12  ;;  %v6595_v34 = vld [vmem:[%s10011_s5 + $0xc] ss:$16 sps:$4 sm:$0xff]   ;;  %v7447_v35 = vld [vmem:[%s10010_s1] sm:$0xff]   ;;  %v6593_v37 = vld [vmem:[%s10011_s5 + $0x8] ss:$16 sps:$4 sm:$0xff]  }
   0xd   :  { %285 = vmatprep.subr.bf16.mxu0 %v6559_v13  ;;  %358 = vmatprep.subr.bf16.mxu1 %v6561_v14  ;;  %v6590_v36 = vld [vmem:[%s10011_s5] ss:$16 sps:$4 sm:$0xff]   ;;  %v6598_v38 = vld [vmem:[%s10011_s5 + $0x24] ss:$16 sps:$4 sm:$0xff]   ;;  %v6601_v39 = vld [vmem:[%s10011_s5 + $0x2c] ss:$16 sps:$4 sm:$0xff]  }
   0xe   :  { %v6596_v40 = vld [vmem:[%s10011_s5 + $0x20] ss:$16 sps:$4 sm:$0xff]   ;;  %v6599_v41 = vld [vmem:[%s10011_s5 + $0x28] ss:$16 sps:$4 sm:$0xff]   ;;  %v6605_v42 = vld [vmem:[%s10011_s5 + $0x44] ss:$16 sps:$4 sm:$0xff]  }
   0xf   :  { %v6608_v43 = vld [vmem:[%s10011_s5 + $0x4c] ss:$16 sps:$4 sm:$0xff]   ;;  %v6603_v45 = vld [vmem:[%s10011_s5 + $0x40] ss:$16 sps:$4 sm:$0xff]   ;;  %v6606_v46 = vld [vmem:[%s10011_s5 + $0x48] ss:$16 sps:$4 sm:$0xff]  }
  0x10   :  { %286 = vmatpush1.bf16.msra.mxu0 %v6563_v15  ;;  %359 = vmatpush1.bf16.msra.mxu1 %v6564_v16  ;;  %v7480_v44 = vld [vmem:[%s10010_s1 + $0x8] sm:$0xff]   ;;  %v6611_v47 = vld [vmem:[%s10011_s5 + $0x64] ss:$16 sps:$4 sm:$0xff]   ;;  %v6609_v49 = vld [vmem:[%s10011_s5 + $0x60] ss:$16 sps:$4 sm:$0xff]  }
  0x11   :  { %287 = vmatprep.subr.bf16.mxu0 %v6565_v17  ;;  %360 = vmatprep.subr.bf16.mxu1 %v6567_v18  ;;  %v6614_v48 = vld [vmem:[%s10011_s5 + $0x6c] ss:$16 sps:$4 sm:$0xff]   ;;  %v6612_v50 = vld [vmem:[%s10011_s5 + $0x68] ss:$16 sps:$4 sm:$0xff]   ;;  %v6618_v51 = vld [vmem:[%s10011_s5 + $0x84] ss:$16 sps:$4 sm:$0xff]  }
  0x12   :  { %v6621_v52 = vld [vmem:[%s10011_s5 + $0x8c] ss:$16 sps:$4 sm:$0xff]   ;;  %v7513_v53 = vld [vmem:[%s10010_s1 + $0x10] sm:$0xff]   ;;  %v6619_v55 = vld [vmem:[%s10011_s5 + $0x88] ss:$16 sps:$4 sm:$0xff]  }
  0x13   :  { %v6616_v54 = vld [vmem:[%s10011_s5 + $0x80] ss:$16 sps:$4 sm:$0xff]   ;;  %v6624_v56 = vld [vmem:[%s10011_s5 + $0xa4] ss:$16 sps:$4 sm:$0xff]   ;;  %v6627_v57 = vld [vmem:[%s10011_s5 + $0xac] ss:$16 sps:$4 sm:$0xff]  }
  0x14   :  { %288 = vmatpush1.bf16.msra.mxu0 %v6569_v19  ;;  %361 = vmatpush1.bf16.msra.mxu1 %v6570_v20  ;;  %v6622_v58 = vld [vmem:[%s10011_s5 + $0xa0] ss:$16 sps:$4 sm:$0xff]   ;;  %v6625_v59 = vld [vmem:[%s10011_s5 + $0xa8] ss:$16 sps:$4 sm:$0xff]   ;;  %v6631_v60 = vld [vmem:[%s10011_s5 + $0xc4] ss:$16 sps:$4 sm:$0xff]  }
  0x15   :  { %289 = vmatprep.subr.bf16.mxu0 %v6571_v21  ;;  %362 = vmatprep.subr.bf16.mxu1 %v6573_v22  ;;  %v6634_v61 = vld [vmem:[%s10011_s5 + $0xcc] ss:$16 sps:$4 sm:$0xff]   ;;  %v6629_v63 = vld [vmem:[%s10011_s5 + $0xc0] ss:$16 sps:$4 sm:$0xff]   ;;  %v6632_v0 = vld [vmem:[%s10011_s5 + $0xc8] ss:$16 sps:$4 sm:$0xff]  }
  0x16   :  { %v7546_v62 = vld [vmem:[%s10010_s1 + $0x18] sm:$0xff]   ;;  %v6637_v2 = vld [vmem:[%s10011_s5 + $0xe4] ss:$16 sps:$4 sm:$0xff]   ;;  %v6635_v4 = vld [vmem:[%s10011_s5 + $0xe0] ss:$16 sps:$4 sm:$0xff]  }
  0x17   :  { %v6640_v3 = vld [vmem:[%s10011_s5 + $0xec] ss:$16 sps:$4 sm:$0xff]   ;;  %v6638_v5 = vld [vmem:[%s10011_s5 + $0xe8] ss:$16 sps:$4 sm:$0xff]   ;;  %v7571_v6 = vld [vmem:[%s10012_s3 + $0x4] ss:$16 sps:$4 sm:$0xff]  }
  0x18   :  { %290 = vmatpush1.bf16.msra.mxu0 %v6575_v23  ;;  %363 = vmatpush1.bf16.msra.mxu1 %v6576_v24  ;;  %v7576_v7 = vld [vmem:[%s10012_s3 + $0xc] ss:$16 sps:$4 sm:$0xff]   ;;  %v7583_v8 = vld [vmem:[%s10012_s3] ss:$16 sps:$4 sm:$0xff]   ;;  %v7588_v9 = vld [vmem:[%s10012_s3 + $0x8] ss:$16 sps:$4 sm:$0xff]  }
  0x19   :  { %291 = vmatprep.subr.bf16.mxu0 %v6577_v25  ;;  %364 = vmatprep.subr.bf16.mxu1 %v6579_v26  ;;  %v7593_v10 = vld [vmem:[%s10012_s3 + $0x24] ss:$16 sps:$4 sm:$0xff]   ;;  %v7600_v11 = vld [vmem:[%s10012_s3 + $0x2c] ss:$16 sps:$4 sm:$0xff]   ;;  %v7607_v12 = vld [vmem:[%s10012_s3 + $0x20] ss:$16 sps:$4 sm:$0xff]  }
  0x1a   :  { %v7612_v13 = vld [vmem:[%s10012_s3 + $0x28] ss:$16 sps:$4 sm:$0xff]   ;;  %v7619_v14 = vld [vmem:[%s10012_s3 + $0x44] ss:$16 sps:$4 sm:$0xff]   ;;  %v7626_v15 = vld [vmem:[%s10012_s3 + $0x4c] ss:$16 sps:$4 sm:$0xff]  }
  0x1b   :  { %v7633_v16 = vld [vmem:[%s10012_s3 + $0x40] ss:$16 sps:$4 sm:$0xff]   ;;  %v7638_v17 = vld [vmem:[%s10012_s3 + $0x48] ss:$16 sps:$4 sm:$0xff]   ;;  %v7645_v18 = vld [vmem:[%s10012_s3 + $0x64] ss:$16 sps:$4 sm:$0xff]  }
  0x1c   :  { %292 = vmatpush1.bf16.msra.mxu0 %v6581_v27  ;;  %365 = vmatpush1.bf16.msra.mxu1 %v6582_v28  ;;  %v7652_v19 = vld [vmem:[%s10012_s3 + $0x6c] ss:$16 sps:$4 sm:$0xff]   ;;  %v7659_v20 = vld [vmem:[%s10012_s3 + $0x60] ss:$16 sps:$4 sm:$0xff]   ;;  %v7664_v21 = vld [vmem:[%s10012_s3 + $0x68] ss:$16 sps:$4 sm:$0xff]  }
  0x1d   :  { %293 = vmatprep.subr.bf16.mxu0 %v6583_v29  ;;  %366 = vmatprep.subr.bf16.mxu1 %v6585_v30  ;;  %v7671_v22 = vld [vmem:[%s10012_s3 + $0x84] ss:$16 sps:$4 sm:$0xff]   ;;  %v7678_v23 = vld [vmem:[%s10012_s3 + $0x8c] ss:$16 sps:$4 sm:$0xff]   ;;  %v7685_v24 = vld [vmem:[%s10012_s3 + $0x80] ss:$16 sps:$4 sm:$0xff]  }
  0x1e   :  { %v7690_v25 = vld [vmem:[%s10012_s3 + $0x88] ss:$16 sps:$4 sm:$0xff]   ;;  %v7697_v26 = vld [vmem:[%s10012_s3 + $0xa4] ss:$16 sps:$4 sm:$0xff]   ;;  %v7704_v27 = vld [vmem:[%s10012_s3 + $0xac] ss:$16 sps:$4 sm:$0xff]  }
  0x1f   :  { %v7711_v28 = vld [vmem:[%s10012_s3 + $0xa0] ss:$16 sps:$4 sm:$0xff]   ;;  %v7716_v29 = vld [vmem:[%s10012_s3 + $0xa8] ss:$16 sps:$4 sm:$0xff]   ;;  %v7723_v30 = vld [vmem:[%s10012_s3 + $0xc4] ss:$16 sps:$4 sm:$0xff]  }
  0x20   :  { %294 = vmatpush1.bf16.msra.mxu0 %v6587_v31  ;;  %367 = vmatpush1.bf16.msra.mxu1 %v6588_v32  ;;  %v7730_v31 = vld [vmem:[%s10012_s3 + $0xcc] ss:$16 sps:$4 sm:$0xff]   ;;  %v7737_v32 = vld [vmem:[%s10012_s3 + $0xc0] ss:$16 sps:$4 sm:$0xff]  }
  0x21   :  { %671 = vmatprep.subr.bf16.mxu0 %v6592_v33  ;;  %744 = vmatprep.subr.bf16.mxu1 %v6595_v34  ;;  %v7744_v33 = vld [vmem:[%s10012_s3 + $0xc8] ss:$16 sps:$4 sm:$0xff]   ;;  %v7751_v34 = vld [vmem:[%s10012_s3 + $0xe4] ss:$16 sps:$4 sm:$0xff]  }
  0x23   :  { %312 = vmatmul.mubr.bf16.vlgmr.msra.gmra.mrb[0].mxu0 %v7447_v35  ;;  %385 = vmatmul.mubr.bf16.vlgmr.msra.gmra.mrb[0].mxu1 %v7447_v35 }
  0x24   :  { %672 = vmatpush1.bf16.msra.mxu0 %v6590_v36  ;;  %745 = vmatpush1.bf16.msra.mxu1 %v6593_v37  ;;  %v7761_v36 = vld [vmem:[%s10014_s0] sm:$0xff] }
  0x25   :  { %673 = vmatprep.subr.bf16.mxu0 %v6598_v38  ;;  %746 = vmatprep.subr.bf16.mxu1 %v6601_v39  ;;  %v7766_v37 = vld [vmem:[%s10012_s3 + $0xe0] ss:$16 sps:$4 sm:$0xff]   ;;  %v7771_v38 = vld [vmem:[%s10012_s3 + $0xe8] ss:$16 sps:$4 sm:$0xff]   ;;  %vm1461_vm0 = vcmp.gt.s32.totalorder %v7761_v36, 0  ;;  %vm1462_vm1 = vcmp.gt.s32.totalorder %v7761_v36, 7 }
  0x26   :  { %321 = vmatprep.mubr.bf16.mxu0 %v10023_v1  ;;  %394 = vmatprep.mubr.bf16.mxu1 %v10023_v1  ;;  %v7779_v39 = vld [vmem:[%s10013_s6 + $0x4] ss:$16 sps:$4 sm:$0xff]   ;;  %vm2730_vm2 = vcmp.gt.s32.totalorder %v7761_v36, 2  ;;  %vm3366_vm3 = vcmp.gt.s32.totalorder %v7761_v36, 3  ;;  %vm2094_vm4 = vcmp.gt.s32.totalorder %v7761_v36, 1  ;;  %vm2095_vm5 = vcmp.gt.s32.totalorder %v7761_v36, 6 }
  0x27   :  { %vm2731_vm6 = vcmp.gt.s32.totalorder %v7761_v36, 5  ;;  %vm3367_vm7 = vcmp.gt.s32.totalorder %v7761_v36, 4 }
  0x28   :  { %674 = vmatpush1.bf16.msra.mxu0 %v6596_v40  ;;  %747 = vmatpush1.bf16.msra.mxu1 %v6599_v41  ;;  %v7784_v40 = vld [vmem:[%s10013_s6 + $0xc] ss:$16 sps:$4 sm:$0xff]   ;;  %v1463_v41 = vsel %vm1461_vm0, 1, %v10023_v1 }
  0x29   :  { %675 = vmatprep.subr.bf16.mxu0 %v6605_v42  ;;  %748 = vmatprep.subr.bf16.mxu1 %v6608_v43  ;;  %v6689_v42 = vld [vmem:[%s10013_s6] ss:$16 sps:$4 sm:$0xff]   ;;  %v6692_v43 = vld [vmem:[%s10013_s6 + $0x8] ss:$16 sps:$4 sm:$0xff]  }
  0x2a   :  { %1465 = vperm.xlu0 %6539, %v1463_v41   ;;  %v7932_v41 = vld [vmem:[%s10013_s6 + $0xc0] ss:$16 sps:$4 sm:$0xff]  }
  0x2b   :  { %322 = vmatmul.mubr.bf16.gmra.mrb[4].mxu0 %v7480_v44  ;;  %395 = vmatmul.mubr.bf16.gmra.mrb[4].mxu1 %v7480_v44 }
  0x2c   :  { %676 = vmatpush1.bf16.msra.mxu0 %v6603_v45  ;;  %749 = vmatpush1.bf16.msra.mxu1 %v6606_v46  ;;  %v6700_v45 = vld [vmem:[%s10013_s6 + $0x2c] ss:$16 sps:$4 sm:$0xff]   ;;  %v6695_v46 = vld [vmem:[%s10013_s6 + $0x20] ss:$16 sps:$4 sm:$0xff]  }
  0x2d   :  { %677 = vmatprep.subr.bf16.mxu0 %v6611_v47  ;;  %750 = vmatprep.subr.bf16.mxu1 %v6614_v48  ;;  %v6698_v47 = vld [vmem:[%s10013_s6 + $0x28] ss:$16 sps:$4 sm:$0xff]   ;;  %v7821_v48 = vld [vmem:[%s10013_s6 + $0x44] ss:$16 sps:$4 sm:$0xff]  }
  0x2e   :  { %331 = vmatprep.mubr.bf16.mxu0 %v10023_v1  ;;  %404 = vmatprep.mubr.bf16.mxu1 %v10023_v1 }
  0x30   :  { %678 = vmatpush1.bf16.msra.mxu0 %v6609_v49  ;;  %751 = vmatpush1.bf16.msra.mxu1 %v6612_v50  ;;  %v7826_v49 = vld [vmem:[%s10013_s6 + $0x4c] ss:$16 sps:$4 sm:$0xff]   ;;  %v1470_v50 = vsel %vm1462_vm1, 1, %v10023_v1 }
  0x31   :  { %679 = vmatprep.subr.bf16.mxu0 %v6618_v51  ;;  %752 = vmatprep.subr.bf16.mxu1 %v6621_v52  ;;  %v7833_v51 = vld [vmem:[%s10013_s6 + $0x40] ss:$16 sps:$4 sm:$0xff]   ;;  %v7838_v52 = vld [vmem:[%s10013_s6 + $0x48] ss:$16 sps:$4 sm:$0xff]  }
  0x32   :  { %1472 = vperm.xlu0 %6539, %v1470_v50  }
  0x33   :  { %332 = vmatmul.mubr.bf16.gmra.mrb[8].mxu0 %v7513_v53  ;;  %405 = vmatmul.mubr.bf16.gmra.mrb[8].mxu1 %v7513_v53 }
  0x34   :  { %680 = vmatpush1.bf16.msra.mxu0 %v6616_v54  ;;  %753 = vmatpush1.bf16.msra.mxu1 %v6619_v55  ;;  %v7850_v54 = vld [vmem:[%s10013_s6 + $0x6c] ss:$16 sps:$4 sm:$0xff]   ;;  %v2732_v55 = vsel %vm2730_vm2, 1, %v10023_v1 }
  0x35   :  { %681 = vmatprep.subr.bf16.mxu0 %v6624_v56  ;;  %754 = vmatprep.subr.bf16.mxu1 %v6627_v57  ;;  %v7859_v56 = vld [vmem:[%s10013_s6 + $0x60] ss:$16 sps:$4 sm:$0xff]   ;;  %v7864_v57 = vld [vmem:[%s10013_s6 + $0x68] ss:$16 sps:$4 sm:$0xff]  }
  0x36   :  { %341 = vmatprep.mubr.bf16.mxu0 %v10023_v1  ;;  %414 = vmatprep.mubr.bf16.mxu1 %v10023_v1 }
  0x37   :  { %2734 = vperm.xlu0 %6539, %v2732_v55  }
  0x38   :  { %682 = vmatpush1.bf16.msra.mxu0 %v6622_v58  ;;  %755 = vmatpush1.bf16.msra.mxu1 %v6625_v59  ;;  %v7869_v58 = vld [vmem:[%s10013_s6 + $0x84] ss:$16 sps:$4 sm:$0xff]   ;;  %v7874_v59 = vld [vmem:[%s10013_s6 + $0x8c] ss:$16 sps:$4 sm:$0xff]  }
  0x39   :  { %683 = vmatprep.subr.bf16.mxu0 %v6631_v60  ;;  %756 = vmatprep.subr.bf16.mxu1 %v6634_v61  ;;  %v3368_v60 = vsel %vm3366_vm3, 1, %v10023_v1  ;;  %v7884_v61 = vld [vmem:[%s10013_s6 + $0x80] ss:$16 sps:$4 sm:$0xff]  }
  0x3b   :  { %342 = vmatmul.mubr.bf16.gmra.mrb[12].mxu0 %v7546_v62  ;;  %415 = vmatmul.mubr.bf16.gmra.mrb[12].mxu1 %v7546_v62 }
  0x3c   :  { %684 = vmatpush1.bf16.msra.mxu0 %v6629_v63  ;;  %757 = vmatpush1.bf16.msra.mxu1 %v6632_v0  ;;  %v7894_v63 = vld [vmem:[%s10013_s6 + $0xa4] ss:$16 sps:$4 sm:$0xff]   ;;  %v7899_v0 = vld [vmem:[%s10013_s6 + $0xac] ss:$16 sps:$4 sm:$0xff]  }
  0x3d   :  { %685 = vmatprep.subr.bf16.mxu0 %v6637_v2  ;;  %758 = vmatprep.subr.bf16.mxu1 %v6640_v3  ;;  %v7908_v2 = vld [vmem:[%s10013_s6 + $0xa0] ss:$16 sps:$4 sm:$0xff]   ;;  %v7913_v3 = vld [vmem:[%s10013_s6 + $0xa8] ss:$16 sps:$4 sm:$0xff]  }
  0x3e   :  { %703 = vmatprep.mubr.bf16.mxu0 %v10023_v1  ;;  %776 = vmatprep.mubr.bf16.mxu1 %v10023_v1 }
  0x3f   :  { %3370 = vperm.xlu0 %6539, %v3368_v60  }
  0x40   :  { %686 = vmatpush1.bf16.msra.mxu0 %v6635_v4  ;;  %759 = vmatpush1.bf16.msra.mxu1 %v6638_v5  ;;  %v7918_v4 = vld [vmem:[%s10013_s6 + $0xc4] ss:$16 sps:$4 sm:$0xff]   ;;  %v7923_v5 = vld [vmem:[%s10013_s6 + $0xcc] ss:$16 sps:$4 sm:$0xff]  }
  0x41   :  { %1045 = vmatprep.subr.bf16.mxu0 %v7571_v6  ;;  %1086 = vmatprep.subr.bf16.mxu1 %v7576_v7 }
  0x43   :  { %704 = vmatmul.mubr.bf16.vlgmr.msra.gmra.mrb[16].mxu0 %v7447_v35  ;;  %777 = vmatmul.mubr.bf16.vlgmr.msra.gmra.mrb[16].mxu1 %v7447_v35  ;;  %v7756_v35 = vld [vmem:[%s10012_s3 + $0xec] ss:$16 sps:$4 sm:$0xff]  }
  0x44   :  { %1046 = vmatpush1.bf16.msra.mxu0 %v7583_v8  ;;  %1087 = vmatpush1.bf16.msra.mxu1 %v7588_v9 }
  0x45   :  { %1047 = vmatprep.subr.bf16.mxu0 %v7593_v10  ;;  %1088 = vmatprep.subr.bf16.mxu1 %v7600_v11 }
  0x46   :  { %713 = vmatprep.mubr.bf16.mxu0 %v10023_v1  ;;  %786 = vmatprep.mubr.bf16.mxu1 %v10023_v1 }
  0x48   :  { %1048 = vmatpush1.bf16.msra.mxu0 %v7607_v12  ;;  %1089 = vmatpush1.bf16.msra.mxu1 %v7612_v13 }
  0x49   :  { %1049 = vmatprep.subr.bf16.mxu0 %v7619_v14  ;;  %1090 = vmatprep.subr.bf16.mxu1 %v7626_v15 }
  0x4b   :  { %714 = vmatmul.mubr.bf16.gmra.mrb[20].mxu0 %v7480_v44  ;;  %787 = vmatmul.mubr.bf16.gmra.mrb[20].mxu1 %v7480_v44  ;;  %v6697_v44 = vld [vmem:[%s10013_s6 + $0x24] ss:$16 sps:$4 sm:$0xff]  }
  0x4c   :  { %1050 = vmatpush1.bf16.msra.mxu0 %v7633_v16  ;;  %1091 = vmatpush1.bf16.msra.mxu1 %v7638_v17 }
  0x4d   :  { %1051 = vmatprep.subr.bf16.mxu0 %v7645_v18  ;;  %1092 = vmatprep.subr.bf16.mxu1 %v7652_v19 }
  0x4e   :  { %723 = vmatprep.mubr.bf16.mxu0 %v10023_v1  ;;  %796 = vmatprep.mubr.bf16.mxu1 %v10023_v1 }
  0x50   :  { %1052 = vmatpush1.bf16.msra.mxu0 %v7659_v20  ;;  %1093 = vmatpush1.bf16.msra.mxu1 %v7664_v21 }
  0x51   :  { %1053 = vmatprep.subr.bf16.mxu0 %v7671_v22  ;;  %1094 = vmatprep.subr.bf16.mxu1 %v7678_v23 }
  0x53   :  { %724 = vmatmul.mubr.bf16.gmra.mrb[24].mxu0 %v7513_v53  ;;  %797 = vmatmul.mubr.bf16.gmra.mrb[24].mxu1 %v7513_v53  ;;  %v7845_v53 = vld [vmem:[%s10013_s6 + $0x64] ss:$16 sps:$4 sm:$0xff]  }
  0x54   :  { %1054 = vmatpush1.bf16.msra.mxu0 %v7685_v24  ;;  %1095 = vmatpush1.bf16.msra.mxu1 %v7690_v25 }
  0x55   :  { %1055 = vmatprep.subr.bf16.mxu0 %v7697_v26  ;;  %1096 = vmatprep.subr.bf16.mxu1 %v7704_v27 }
  0x56   :  { %733 = vmatprep.mubr.bf16.mxu0 %v10023_v1  ;;  %806 = vmatprep.mubr.bf16.mxu1 %v10023_v1 }
  0x58   :  { %1056 = vmatpush1.bf16.msra.mxu0 %v7711_v28  ;;  %1097 = vmatpush1.bf16.msra.mxu1 %v7716_v29 }
  0x59   :  { %1057 = vmatprep.subr.bf16.mxu0 %v7723_v30  ;;  %1098 = vmatprep.subr.bf16.mxu1 %v7730_v31 }
  0x5b   :  { %734 = vmatmul.mubr.bf16.gmra.mrb[28].mxu0 %v7546_v62  ;;  %807 = vmatmul.mubr.bf16.gmra.mrb[28].mxu1 %v7546_v62  ;;  %v7889_v62 = vld [vmem:[%s10013_s6 + $0x88] ss:$16 sps:$4 sm:$0xff]  }
  0x5c   :  { %1058 = vmatpush1.bf16.msra.mxu0 %v7737_v32  ;;  %1099 = vmatpush1.bf16.msra.mxu1 %v7744_v33 }
  0x5d   :  { %1059 = vmatprep.subr.bf16.mxu0 %v7751_v34  ;;  %1100 = vmatprep.subr.bf16.mxu1 %v7756_v35 }
  0x5e   :  { %1077 = vmatprep.mubr.bf16.mxu0 %v10023_v1  ;;  %1118 = vmatprep.mubr.bf16.mxu1 %v10023_v1 }
  0x60   :  { %1060 = vmatpush1.bf16.msra.mxu0 %v7766_v37  ;;  %1101 = vmatpush1.bf16.msra.mxu1 %v7771_v38 }
  0x61   :  { %1327 = vmatprep.subr.bf16.mxu0 %v7779_v39  ;;  %1368 = vmatprep.subr.bf16.mxu1 %v7784_v40 }
  0x63   :  { %1078 = vmatmul.mubr.bf16.vlgmr.msra.gmra.mrb[32].mxu0 %v10023_v1  ;;  %1119 = vmatmul.mubr.bf16.vlgmr.msra.gmra.mrb[32].mxu1 %v10023_v1 }
  0x64   :  { %1328 = vmatpush1.bf16.msra.mxu0 %v6689_v42  ;;  %1369 = vmatpush1.bf16.msra.mxu1 %v6692_v43  ;;  %v7937_v42 = vld [vmem:[%s10013_s6 + $0xc8] ss:$16 sps:$4 sm:$0xff]   ;;  %v7942_v43 = vld [vmem:[%s10013_s6 + $0xe4] ss:$16 sps:$4 sm:$0xff]  }
  0x65   :  { %1329 = vmatprep.subr.bf16.mxu0 %v6697_v44  ;;  %1370 = vmatprep.subr.bf16.mxu1 %v6700_v45  ;;  %v7947_v44 = vld [vmem:[%s10013_s6 + $0xec] ss:$16 sps:$4 sm:$0xff]   ;;  %v7956_v45 = vld [vmem:[%s10013_s6 + $0xe0] ss:$16 sps:$4 sm:$0xff]  }
  0x66   :  { %1359 = vmatprep.mubr.bf16.mxu0 %v10023_v1  ;;  %1400 = vmatprep.mubr.bf16.mxu1 %v10023_v1 }
  0x68   :  { %1330 = vmatpush1.bf16.msra.mxu0 %v6695_v46  ;;  %1371 = vmatpush1.bf16.msra.mxu1 %v6698_v47  ;;  %v7961_v46 = vld [vmem:[%s10013_s6 + $0xe8] ss:$16 sps:$4 sm:$0xff]  }
  0x69   :  { %1331 = vmatprep.subr.bf16.mxu0 %v7821_v48  ;;  %1372 = vmatprep.subr.bf16.mxu1 %v7826_v49 }
  0x6c   :  { %1332 = vmatpush1.bf16.msra.mxu0 %v7833_v51  ;;  %1373 = vmatpush1.bf16.msra.mxu1 %v7838_v52 }
  0x6d   :  { %1333 = vmatprep.subr.bf16.mxu0 %v7845_v53  ;;  %1374 = vmatprep.subr.bf16.mxu1 %v7850_v54 }
  0x70   :  { %1334 = vmatpush1.bf16.msra.mxu0 %v7859_v56  ;;  %1375 = vmatpush1.bf16.msra.mxu1 %v7864_v57 }
  0x71   :  { %1335 = vmatprep.subr.bf16.mxu0 %v7869_v58  ;;  %1376 = vmatprep.subr.bf16.mxu1 %v7874_v59 }
  0x74   :  { %1336 = vmatpush1.bf16.msra.mxu0 %v7884_v61  ;;  %1377 = vmatpush1.bf16.msra.mxu1 %v7889_v62 }
  0x75   :  { %1337 = vmatprep.subr.bf16.mxu0 %v7894_v63  ;;  %1378 = vmatprep.subr.bf16.mxu1 %v7899_v0 }
  0x78   :  { %1338 = vmatpush1.bf16.msra.mxu0 %v7908_v2  ;;  %1379 = vmatpush1.bf16.msra.mxu1 %v7913_v3 }
  0x79   :  { %1339 = vmatprep.subr.bf16.mxu0 %v7918_v4  ;;  %1380 = vmatprep.subr.bf16.mxu1 %v7923_v5 }
  0x7c   :  { %1340 = vmatpush1.bf16.msra.mxu0 %v7932_v41  ;;  %1381 = vmatpush1.bf16.msra.mxu1 %v7937_v42 }
  0x7d   :  { %1341 = vmatprep.subr.bf16.mxu0 %v7942_v43  ;;  %1382 = vmatprep.subr.bf16.mxu1 %v7947_v44 }
  0x80   :  { %1342 = vmatpush1.bf16.msra.mxu0 %v7956_v45  ;;  %1383 = vmatpush1.bf16.msra.mxu1 %v7961_v46 }
  0x81   :  { %1677 = vmatprep.subr.bf16.mxu0 %v7571_v6  ;;  %1718 = vmatprep.subr.bf16.mxu1 %v7576_v7  ;;  %v75_v6 = vlaneseq }
  0x83   :  { %1360 = vmatmul.mubr.bf16.vlgmr.msra.gmra.mrb[36].mxu0 %v10023_v1  ;;  %1401 = vmatmul.mubr.bf16.vlgmr.msra.gmra.mrb[36].mxu1 %v10023_v1  ;;  %v8007_v7 = vshrl.u32 %v75_v6, 7 }
  0x84   :  { %1678 = vmatpush1.bf16.msra.mxu0 %v7583_v8  ;;  %1719 = vmatpush1.bf16.msra.mxu1 %v7588_v9 }
  0x85   :  { %1679 = vmatprep.subr.bf16.mxu0 %v7593_v10  ;;  %1720 = vmatprep.subr.bf16.mxu1 %v7600_v11  ;;  %v10022_v8 = vsub.s32 0, %v8007_v7  ;;  %v10021_v9 = vsub.s32 2, %v8007_v7  ;;  %v73_v10 = vld [vmem:[%s10015_s4] sm:$0xf]  ;;  %v10019_v11 = vsub.s32 3, %v8007_v7 }
  0x86   :  { %1709 = vmatprep.mubr.bf16.mxu0 %v10023_v1  ;;  %1750 = vmatprep.mubr.bf16.mxu1 %v10023_v1 }
  0x88   :  { %1680 = vmatpush1.bf16.msra.mxu0 %v7607_v12  ;;  %1721 = vmatpush1.bf16.msra.mxu1 %v7612_v13  ;;  %v10020_v12 = vsub.s32 1, %v8007_v7  ;;  %v8018_v13 = vrot.slane %v73_v10, %v10022_v8 }
  0x89   :  { %1681 = vmatprep.subr.bf16.mxu0 %v7619_v14  ;;  %1722 = vmatprep.subr.bf16.mxu1 %v7626_v15  ;;  %v8022_v14 = vrot.slane %v73_v10, %v10021_v9  ;;  %v2739_v9 = vsel %vm2731_vm6, 1, %v10023_v1 }
  0x8c   :  { %1682 = vmatpush1.bf16.msra.mxu0 %v7633_v16  ;;  %1723 = vmatpush1.bf16.msra.mxu1 %v7638_v17  ;;  %v8030_v17 = vrot.slane %v73_v10, %v10019_v11 }
  0x8d   :  { %1683 = vmatprep.subr.bf16.mxu0 %v7645_v18  ;;  %1724 = vmatprep.subr.bf16.mxu1 %v7652_v19 }
  0x90   :  { %1684 = vmatpush1.bf16.msra.mxu0 %v7659_v20  ;;  %1725 = vmatpush1.bf16.msra.mxu1 %v7664_v21  ;;  %v8038_v20 = vrot.slane %v73_v10, %v10020_v12 }
  0x91   :  { %1685 = vmatprep.subr.bf16.mxu0 %v7671_v22  ;;  %1726 = vmatprep.subr.bf16.mxu1 %v7678_v23 }
  0x94   :  { %1686 = vmatpush1.bf16.msra.mxu0 %v7685_v24  ;;  %1727 = vmatpush1.bf16.msra.mxu1 %v7690_v25 }
  0x95   :  { %1687 = vmatprep.subr.bf16.mxu0 %v7697_v26  ;;  %1728 = vmatprep.subr.bf16.mxu1 %v7704_v27 }
  0x98   :  { %1688 = vmatpush1.bf16.msra.mxu0 %v7711_v28  ;;  %1729 = vmatpush1.bf16.msra.mxu1 %v7716_v29 }
  0x99   :  { %1689 = vmatprep.subr.bf16.mxu0 %v7723_v30  ;;  %1730 = vmatprep.subr.bf16.mxu1 %v7730_v31 }
  0x9c   :  { %1690 = vmatpush1.bf16.msra.mxu0 %v7737_v32  ;;  %1731 = vmatpush1.bf16.msra.mxu1 %v7744_v33 }
  0x9d   :  { %1691 = vmatprep.subr.bf16.mxu0 %v7751_v34  ;;  %1732 = vmatprep.subr.bf16.mxu1 %v7756_v35 }
  0xa0   :  { %1692 = vmatpush1.bf16.msra.mxu0 %v7766_v37  ;;  %1733 = vmatpush1.bf16.msra.mxu1 %v7771_v38 }
  0xa1   :  { %1960 = vmatprep.subr.bf16.mxu0 %v7779_v39  ;;  %2001 = vmatprep.subr.bf16.mxu1 %v7784_v40 }
  0xf6   :  { %v8024_v15 = vpop.f32.mrb[0].mxu0  ;;  %v8026_v16 = vpop.f32.mrb[0].mxu1 }
  0xf7   :  { %v8032_v18 = vpop.f32.mrb[1].mxu0  ;;  %v8034_v19 = vpop.f32.mrb[1].mxu1 }
  0xf8   :  { %v317_v21 = vpop.f32.mrb[2].mxu0  ;;  %v390_v22 = vpop.f32.mrb[2].mxu1 }
  0xf9   :  { %v8041_v23 = vadd.f32 %v317_v21, %v8018_v13  ;;  %v319_v24 = vpop.f32.mrb[3].mxu0  ;;  %v8044_v25 = vadd.f32 %v390_v22, %v8022_v14  ;;  %v392_v26 = vpop.f32.mrb[3].mxu1 }
  0xfa   :  { %v8047_v27 = vadd.f32 %v319_v24, %v8038_v20  ;;  %v8050_v28 = vadd.f32 %v392_v26, %v8030_v17 }
  0xfe   :  { %v323_v29 = vpop.f32.mrb[4].mxu0  ;;  %v396_v30 = vpop.f32.mrb[4].mxu1 }
  0xff   :  { %v8053_v31 = vadd.f32 %v323_v29, %v8018_v13  ;;  %v325_v32 = vpop.f32.mrb[5].mxu0  ;;  %v8056_v33 = vadd.f32 %v396_v30, %v8022_v14  ;;  %v398_v34 = vpop.f32.mrb[5].mxu1 }
 0x100   :  { %v8059_v35 = vadd.f32 %v325_v32, %v8038_v20  ;;  %v327_v37 = vpop.f32.mrb[6].mxu0  ;;  %v8062_v38 = vadd.f32 %v398_v34, %v8030_v17  ;;  %v400_v39 = vpop.f32.mrb[6].mxu1 }
 0x101   :  { %10075 = vst [vmem:[#allocation4_spill] sm:$0xff] %v8053_v31  ;;  %10076 = vst [vmem:[#allocation5_spill] sm:$0xff] %v8056_v33  ;;  %v8065_v40 = vadd.f32 %v327_v37, %v8018_v13  ;;  %v329_v47 = vpop.f32.mrb[7].mxu0  ;;  %v8068_v50 = vadd.f32 %v400_v39, %v8022_v14  ;;  %v402_v55 = vpop.f32.mrb[7].mxu1  ;;  %v2096_v39 = vsel %vm2094_vm4, 1, %v10023_v1 }
 0x102   :  { %10077 = vst [vmem:[#allocation6_spill] sm:$0xff] %v8059_v35  ;;  %10078 = vst [vmem:[#allocation7_spill] sm:$0xff] %v8062_v38  ;;  %v8071_v60 = vadd.f32 %v329_v47, %v8038_v20  ;;  %v8074_v6 = vadd.f32 %v402_v55, %v8030_v17  ;;  %2098 = vperm.xlu1 %6540, %v2096_v39  }
 0x103   :  { %10079 = vst [vmem:[#allocation8_spill] sm:$0xff] %v8065_v40  ;;  %10080 = vst [vmem:[#allocation9_spill] sm:$0xff] %v8068_v50 }
 0x104   :  { %10081 = vst [vmem:[#allocation10_spill] sm:$0xff] %v8071_v60  ;;  %10082 = vst [vmem:[#allocation11_spill] sm:$0xff] %v8074_v6  ;;  %v314_v60 = vadd.f32 %v8024_v15, %v8018_v13 }
 0x106   :  { %v333_v10 = vpop.f32.mrb[8].mxu0  ;;  %v406_v21 = vpop.f32.mrb[8].mxu1 }
 0x107   :  { %v8077_v22 = vadd.f32 %v333_v10, %v8018_v13  ;;  %v335_v24 = vpop.f32.mrb[9].mxu0  ;;  %v8080_v26 = vadd.f32 %v406_v21, %v8022_v14  ;;  %v408_v29 = vpop.f32.mrb[9].mxu1 }
 0x108   :  { %v8085_v30 = vadd.f32 %v335_v24, %v8038_v20  ;;  %v337_v32 = vpop.f32.mrb[10].mxu0  ;;  %v8088_v34 = vadd.f32 %v408_v29, %v8030_v17  ;;  %v410_v37 = vpop.f32.mrb[10].mxu1  ;;  %v2103_v29 = vsel %vm2095_vm5, 1, %v10023_v1 }
 0x109   :  { %10083 = vst [vmem:[#allocation12_spill] sm:$0xff] %v8077_v22  ;;  %10084 = vst [vmem:[#allocation13_spill] sm:$0xff] %v8080_v26  ;;  %v8092_v47 = vadd.f32 %v337_v32, %v8018_v13  ;;  %v339_v55 = vpop.f32.mrb[11].mxu0  ;;  %v8095_v10 = vadd.f32 %v410_v37, %v8022_v14  ;;  %v412_v21 = vpop.f32.mrb[11].mxu1  ;;  %2105 = vperm.xlu1 %6540, %v2103_v29   ;;  %v489_v29 = vld [vmem:[%s10016_s7] sm:$0xf] }
 0x10a   :  { %10085 = vst [vmem:[#allocation14_spill] sm:$0xff] %v8085_v30  ;;  %10086 = vst [vmem:[#allocation15_spill] sm:$0xff] %v8088_v34  ;;  %v8098_v11 = vadd.f32 %v339_v55, %v8038_v20  ;;  %v8101_v24 = vadd.f32 %v412_v21, %v8030_v17 }
 0x10b   :  { %10087 = vst [vmem:[#allocation16_spill] sm:$0xff] %v8092_v47  ;;  %10088 = vst [vmem:[#allocation17_spill] sm:$0xff] %v8095_v10 }
 0x10c   :  { %10089 = vst [vmem:[#allocation18_spill] sm:$0xff] %v8098_v11  ;;  %10090 = vst [vmem:[#allocation19_spill] sm:$0xff] %v8101_v24  ;;  %v10099_v11 = vmov 0  }
 0x10d   :  { %2741 = vperm.xlu1 %6540, %v2739_v9   ;;  %v3375_v10 = vsel %vm3367_vm7, 1, %v10099_v11  ;;  %v10103_v9 = vsub.s32 3, %v8007_v7 }
 0x10e   :  { %v343_v12 = vpop.f32.mrb[12].mxu0  ;;  %v416_v32 = vpop.f32.mrb[12].mxu1 }
 0x10f   :  { %v8107_v37 = vadd.f32 %v343_v12, %v8018_v13  ;;  %v345_v8 = vpop.f32.mrb[13].mxu0  ;;  %v8110_v39 = vadd.f32 %v416_v32, %v8022_v14  ;;  %v418_v55 = vpop.f32.mrb[13].mxu1 }
 0x110   :  { %v8114_v21 = vadd.f32 %v345_v8, %v8038_v20  ;;  %v347_v24 = vpop.f32.mrb[14].mxu0  ;;  %v8120_v1 = vadd.f32 %v418_v55, %v8030_v17  ;;  %v420_v12 = vpop.f32.mrb[14].mxu1  ;;  %v10100_v55 = vsub.s32 0, %v8007_v7 }
 0x111   :  { %10091 = vst [vmem:[#allocation20_spill] sm:$0xff] %v8107_v37  ;;  %10092 = vst [vmem:[#allocation21_spill] sm:$0xff] %v8110_v39  ;;  %v8123_v37 = vadd.f32 %v347_v24, %v8018_v13  ;;  %v349_v32 = vpop.f32.mrb[15].mxu0  ;;  %v8126_v39 = vadd.f32 %v420_v12, %v8022_v14  ;;  %v422_v36 = vpop.f32.mrb[15].mxu1  ;;  %v10101_v24 = vsub.s32 2, %v8007_v7  ;;  %v10102_v12 = vsub.s32 1, %v8007_v7  ;;  %3377 = vperm.xlu1 %6540, %v3375_v10  }
 0x112   :  { %10093 = vst [vmem:[#allocation22_spill] sm:$0xff] %v8114_v21  ;;  %10094 = vst [vmem:[#allocation23_spill] sm:$0xff] %v8120_v1  ;;  %v8129_v8 = vadd.f32 %v349_v32, %v8038_v20  ;;  %v8132_v21 = vadd.f32 %v422_v36, %v8030_v17  ;;  %v8137_v1 = vrot.slane %v489_v29, %v10100_v55 }
 0x113   :  { %10095 = vst [vmem:[#allocation24_spill] sm:$0xff] %v8123_v37  ;;  %10096 = vst [vmem:[#allocation25_spill] sm:$0xff] %v8126_v39  ;;  %v8141_v37 = vrot.slane %v489_v29, %v10101_v24  ;;  %v8145_v39 = vrot.slane %v489_v29, %v10102_v12  ;;  %v8149_v32 = vrot.slane %v489_v29, %v10103_v9 }
 0x114   :  { %10097 = vst [vmem:[#allocation26_spill] sm:$0xff] %v8129_v8  ;;  %10098 = vst [vmem:[#allocation27_spill] sm:$0xff] %v8132_v21 }
 0x116   :  { %v705_v36 = vpop.f32.mrb[16].mxu0  ;;  %v778_v21 = vpop.f32.mrb[16].mxu1 }
 0x117   :  { %v8152_v8 = vadd.f32 %v705_v36, %v8137_v1  ;;  %v707_v55 = vpop.f32.mrb[17].mxu0  ;;  %v8155_v47 = vadd.f32 %v778_v21, %v8141_v37  ;;  %v780_v24 = vpop.f32.mrb[17].mxu1 }
 0x118   :  { %v8158_v34 = vadd.f32 %v707_v55, %v8145_v39  ;;  %v709_v12 = vpop.f32.mrb[18].mxu0  ;;  %v8161_v30 = vadd.f32 %v780_v24, %v8149_v32  ;;  %v782_v7 = vpop.f32.mrb[18].mxu1 }
 0x119   :  { %10104 = vst [vmem:[#allocation28_spill] sm:$0xff] %v8152_v8  ;;  %10105 = vst [vmem:[#allocation29_spill] sm:$0xff] %v8155_v47  ;;  %v8164_v10 = vadd.f32 %v709_v12, %v8137_v1  ;;  %v711_v29 = vpop.f32.mrb[19].mxu0  ;;  %v8167_v9 = vadd.f32 %v782_v7, %v8141_v37  ;;  %v784_v36 = vpop.f32.mrb[19].mxu1 }
 0x11a   :  { %10106 = vst [vmem:[#allocation30_spill] sm:$0xff] %v8158_v34  ;;  %10107 = vst [vmem:[#allocation31_spill] sm:$0xff] %v8161_v30  ;;  %v8170_v21 = vadd.f32 %v711_v29, %v8145_v39  ;;  %v8173_v47 = vadd.f32 %v784_v36, %v8149_v32 }
 0x11b   :  { %10108 = vst [vmem:[#allocation32_spill] sm:$0xff] %v8164_v10  ;;  %10109 = vst [vmem:[#allocation33_spill] sm:$0xff] %v8167_v9 }
 0x11c   :  { %10110 = vst [vmem:[#allocation34_spill] sm:$0xff] %v8170_v21  ;;  %10111 = vst [vmem:[#allocation35_spill] sm:$0xff] %v8173_v47 }
 0x11e   :  { %v715_v55 = vpop.f32.mrb[20].mxu0  ;;  %v788_v34 = vpop.f32.mrb[20].mxu1 }
 0x11f   :  { %v8176_v24 = vadd.f32 %v715_v55, %v8137_v1  ;;  %v717_v30 = vpop.f32.mrb[21].mxu0  ;;  %v8179_v12 = vadd.f32 %v788_v34, %v8141_v37  ;;  %v790_v8 = vpop.f32.mrb[21].mxu1 }
 0x120   :  { %v8182_v7 = vadd.f32 %v717_v30, %v8145_v39  ;;  %v719_v9 = vpop.f32.mrb[22].mxu0  ;;  %v8185_v29 = vadd.f32 %v790_v8, %v8149_v32  ;;  %v792_v21 = vpop.f32.mrb[22].mxu1 }
 0x121   :  { %10112 = vst [vmem:[#allocation36_spill] sm:$0xff] %v8176_v24  ;;  %10113 = vst [vmem:[#allocation37_spill] sm:$0xff] %v8179_v12  ;;  %v8188_v36 = vadd.f32 %v719_v9, %v8137_v1  ;;  %v721_v47 = vpop.f32.mrb[23].mxu0  ;;  %v8191_v55 = vadd.f32 %v792_v21, %v8141_v37  ;;  %v794_v10 = vpop.f32.mrb[23].mxu1 }
 0x122   :  { %10114 = vst [vmem:[#allocation38_spill] sm:$0xff] %v8182_v7  ;;  %10115 = vst [vmem:[#allocation39_spill] sm:$0xff] %v8185_v29  ;;  %v8194_v34 = vadd.f32 %v721_v47, %v8145_v39  ;;  %v8197_v12 = vadd.f32 %v794_v10, %v8149_v32 }
 0x123   :  { %10116 = vst [vmem:[#allocation40_spill] sm:$0xff] %v8188_v36  ;;  %10117 = vst [vmem:[#allocation41_spill] sm:$0xff] %v8191_v55 }
 0x124   :  { %10118 = vst [vmem:[#allocation42_spill] sm:$0xff] %v8194_v34  ;;  %10119 = vst [vmem:[#allocation43_spill] sm:$0xff] %v8197_v12 }
 0x126   :  { %v725_v30 = vpop.f32.mrb[24].mxu0  ;;  %v798_v7 = vpop.f32.mrb[24].mxu1 }
 0x127   :  { %v8200_v8 = vadd.f32 %v725_v30, %v8137_v1  ;;  %v727_v29 = vpop.f32.mrb[25].mxu0  ;;  %v8203_v9 = vadd.f32 %v798_v7, %v8141_v37  ;;  %v800_v24 = vpop.f32.mrb[25].mxu1 }
 0x128   :  { %v8206_v21 = vadd.f32 %v727_v29, %v8145_v39  ;;  %v729_v55 = vpop.f32.mrb[26].mxu0  ;;  %v8209_v47 = vadd.f32 %v800_v24, %v8149_v32  ;;  %v802_v34 = vpop.f32.mrb[26].mxu1 }
 0x129   :  { %10120 = vst [vmem:[#allocation44_spill] sm:$0xff] %v8200_v8  ;;  %10121 = vst [vmem:[#allocation45_spill] sm:$0xff] %v8203_v9  ;;  %v8212_v10 = vadd.f32 %v729_v55, %v8137_v1  ;;  %v731_v12 = vpop.f32.mrb[27].mxu0  ;;  %v8215_v30 = vadd.f32 %v802_v34, %v8141_v37  ;;  %v804_v36 = vpop.f32.mrb[27].mxu1 }
 0x12a   :  { %10122 = vst [vmem:[#allocation46_spill] sm:$0xff] %v8206_v21  ;;  %10123 = vst [vmem:[#allocation47_spill] sm:$0xff] %v8209_v47  ;;  %v8218_v7 = vadd.f32 %v731_v12, %v8145_v39  ;;  %v8221_v26 = vadd.f32 %v804_v36, %v8149_v32 }
 0x12b   :  { %10124 = vst [vmem:[#allocation48_spill] sm:$0xff] %v8212_v10  ;;  %10125 = vst [vmem:[#allocation49_spill] sm:$0xff] %v8215_v30 }
 0x12c   :  { %10126 = vst [vmem:[#allocation50_spill] sm:$0xff] %v8218_v7  ;;  %10127 = vst [vmem:[#allocation51_spill] sm:$0xff] %v8221_v26 }
 0x12e   :  { %v735_v29 = vpop.f32.mrb[28].mxu0  ;;  %v808_v22 = vpop.f32.mrb[28].mxu1 }
 0x12f   :  { %v8224_v24 = vadd.f32 %v735_v29, %v8137_v1  ;;  %v737_v47 = vpop.f32.mrb[29].mxu0  ;;  %v8227_v55 = vadd.f32 %v808_v22, %v8141_v37  ;;  %v810_v21 = vpop.f32.mrb[29].mxu1  ;;  %v387_v29 = vadd.f32 %v8026_v16, %v8022_v14  ;;  %v316_v22 = vadd.f32 %v8032_v18, %v8038_v20 }
 0x130   :  { %v8230_v34 = vadd.f32 %v737_v47, %v8145_v39  ;;  %v739_v9 = vpop.f32.mrb[30].mxu0  ;;  %v8233_v12 = vadd.f32 %v810_v21, %v8149_v32  ;;  %v812_v8 = vpop.f32.mrb[30].mxu1  ;;  %v389_v47 = vadd.f32 %v8034_v19, %v8030_v17 }
 0x131   :  { %v741_v36 = vpop.f32.mrb[31].mxu0  ;;  %v814_v6 = vpop.f32.mrb[31].mxu1 }
 0x136   :  { %v1079_v50 = vpop.f32.mrb[32].mxu0  ;;  %v1120_v40 = vpop.f32.mrb[32].mxu1 }
 0x137   :  { %v1127_v26 = vadd.f32 %v1079_v50, %v314_v60  ;;  %v1129_v21 = vadd.f32 %v1120_v40, %v387_v29  ;;  %v1081_v7 = vpop.f32.mrb[33].mxu0  ;;  %v1122_v30 = vpop.f32.mrb[33].mxu1 }
 0x138   :  { %v1128_v10 = vadd.f32 %v1081_v7, %v316_v22  ;;  %v1130_v38 = vadd.f32 %v1122_v30, %v389_v47  ;;  %v1083_v35 = vpop.f32.mrb[34].mxu0  ;;  %v1124_v33 = vpop.f32.mrb[34].mxu1  ;;  %v815_v7 = vadd.f32 %v814_v6, %v8149_v32 }
 0x139   :  { %v6016_v13 = vmul.f32 -1.442695, %v1127_v26  ;;  %v1084_v15 = vpop.f32.mrb[35].mxu0  ;;  %v1125_v31 = vpop.f32.mrb[35].mxu1 }
 0x13a   :  { %v6017_v14 = vmul.f32 -1.442695, %v1128_v10  ;;  %v6018_v16 = vmul.f32 -1.442695, %v1130_v38  ;;  %v740_v31 = vadd.f32 %v739_v9, %v8137_v1  ;;  %v813_v10 = vadd.f32 %v812_v8, %v8141_v37  ;;  %v8250_v6 = vpop.permute.xlu0 %1465 }
 0x13b   :  { %7025 = vpow2.f32 %v6016_v13  ;;  %v742_v38 = vadd.f32 %v741_v36, %v8145_v39  ;;  %10128 = vst [vmem:[#allocation52_spill] sm:$0xff] %v8250_v6  ;;  %vm1467_vm8 = vcmp.eq.s32.totalorder %v8250_v6, 1  ;;  %v8663_v6 = vld [vmem:[%s10013_s6 + $0x80] ss:$16 sps:$4 sm:$0xff]  }
 0x13c   :  { %7027 = vpow2.f32 %v6017_v14  ;;  %vm6055_vm9 = vmpackc.low %vm1467_vm8, %vm1467_vm8 }
 0x13d   :  { %7029 = vpow2.f32 %v6018_v16 }
 0x13e   :  { %7031 = vtanh.f32 %v1129_v21 }
 0x145   :  { %v7026_v18 = vpop.eup %7025 }
 0x146   :  { %v7028_v20 = vpop.eup %7027  ;;  %v1416_v17 = vadd.f32 1.0, %v7026_v18 }
 0x147   :  { %v1422_v19 = vadd.f32 1.0, %v7028_v20  ;;  %v7030_v40 = vpop.eup %7029 }
 0x148   :  { %7033 = vrcp.f32 %v1416_v17  ;;  %v7032_v50 = vpop.eup %7031  ;;  %v1429_v33 = vadd.f32 1.0, %v7030_v40 }
 0x149   :  { %7035 = vrcp.f32 %v1422_v19 }
 0x14a   :  { %7037 = vrcp.f32 %v1429_v33 }
 0x152   :  { %v7034_v60 = vpop.eup %7033 }
 0x153   :  { %v7036_v35 = vpop.eup %7035  ;;  %v1433_v26 = vmul.f32 %v7034_v60, %v7032_v50 }
 0x154   :  { %v1432_v30 = vmul.f32 0.0, %v7036_v35  ;;  %v7038_v32 = vpop.eup %7037 }
 0x156   :  { %v1361_v29 = vpop.f32.mrb[36].mxu0  ;;  %v1402_v22 = vpop.f32.mrb[36].mxu1  ;;  %v8247_v47 = vadd.f32 %v1433_v26, %v1432_v30  ;;  %v7281_v30 = vld [vmem:[%s10013_s6] ss:$16 sps:$4 sm:$0xff]  }
 0x157   :  { %v1409_v21 = vadd.f32 %v1361_v29, %v740_v31  ;;  %v1411_v13 = vadd.f32 %v1402_v22, %v813_v10  ;;  %v1363_v15 = vpop.f32.mrb[37].mxu0  ;;  %v1404_v14 = vpop.f32.mrb[37].mxu1  ;;  %v7282_v31 = vld [vmem:[%s10013_s6 + $0x8] ss:$16 sps:$4 sm:$0xff]   ;;  %v7283_v10 = vld [vmem:[%s10013_s6 + $0x24] ss:$16 sps:$4 sm:$0xff]  }
 0x158   :  { %7039 = vtanh.f32 %v8247_v47  ;;  %v1410_v16 = vadd.f32 %v1363_v15, %v742_v38  ;;  %v1412_v18 = vadd.f32 %v1404_v14, %v815_v7  ;;  %v1365_v1 = vpop.f32.mrb[38].mxu0  ;;  %v1406_v9 = vpop.f32.mrb[38].mxu1  ;;  %v7284_v38 = vld [vmem:[%s10013_s6 + $0x2c] ss:$16 sps:$4 sm:$0xff]   ;;  %v7285_v7 = vld [vmem:[%s10013_s6 + $0x20] ss:$16 sps:$4 sm:$0xff]  }
 0x159   :  { %v6019_v37 = vmul.f32 -1.442695, %v1409_v21  ;;  %v1366_v8 = vpop.f32.mrb[39].mxu0  ;;  %v1407_v39 = vpop.f32.mrb[39].mxu1  ;;  %v7286_v29 = vld [vmem:[%s10013_s6 + $0x28] ss:$16 sps:$4 sm:$0xff]  }
 0x15a   :  { %v6020_v36 = vmul.f32 -1.442695, %v1410_v16  ;;  %v6021_v17 = vmul.f32 -1.442695, %v1412_v18  ;;  %v8431_v1 = vld [vmem:[%s10012_s3 + $0x8c] ss:$16 sps:$4 sm:$0xff]  }
 0x15b   :  { %7041 = vpow2.f32 %v6019_v37  ;;  %v8436_v9 = vld [vmem:[%s10012_s3 + $0x80] ss:$16 sps:$4 sm:$0xff]   ;;  %v8441_v37 = vld [vmem:[%s10012_s3 + $0x88] ss:$16 sps:$4 sm:$0xff]   ;;  %v8450_v8 = vld [vmem:[%s10012_s3 + $0xa4] ss:$16 sps:$4 sm:$0xff]  }
 0x15c   :  { %7043 = vpow2.f32 %v6020_v36  ;;  %v8455_v39 = vld [vmem:[%s10012_s3 + $0xac] ss:$16 sps:$4 sm:$0xff]   ;;  %v8460_v36 = vld [vmem:[%s10012_s3 + $0xa0] ss:$16 sps:$4 sm:$0xff]  }
 0x15d   :  { %7045 = vpow2.f32 %v6021_v17  ;;  %v8479_v17 = vld [vmem:[%s10012_s3 + $0xcc] ss:$16 sps:$4 sm:$0xff]  }
 0x15e   :  { %7047 = vtanh.f32 %v1411_v13 }
 0x162   :  { %v7040_v20 = vpop.eup %7039 }
 0x163   :  { %v1436_v19 = vmul.f32 %v7040_v20, %v7038_v32  ;;  %v8465_v32 = vld [vmem:[%s10012_s3 + $0xa8] ss:$16 sps:$4 sm:$0xff]   ;;  %v8474_v20 = vld [vmem:[%s10012_s3 + $0xc4] ss:$16 sps:$4 sm:$0xff]  }
 0x165   :  { %v7042_v40 = vpop.eup %7041  ;;  %v6056_v50 = vpack.c.bf16 %v1436_v19, %v1436_v19  ;;  %v8258_v60 = vsel %vm1467_vm8, %v1436_v19, 0.0  ;;  %v8484_v19 = vld [vmem:[%s10012_s3 + $0xc0] ss:$16 sps:$4 sm:$0xff]  }
 0x166   :  { %v7044_v35 = vpop.eup %7043  ;;  %v1440_v33 = vadd.f32 1.0, %v7042_v40  ;;  %1477 = vst [vmem:[%s10017_s8] sm:$0xff] %v8258_v60  ;;  %v8489_v40 = vld [vmem:[%s10012_s3 + $0xc8] ss:$16 sps:$4 sm:$0xff]  }
 0x167   :  { %v1446_v26 = vadd.f32 1.0, %v7044_v35  ;;  %6057 = vmatmul.mubr.msk.bf16.vlgmr.msra.gmra.mrb[40].mxu0 %vm6055_vm9, %v6056_v50  ;;  %6060 = vmatmul.mubr.msk.bf16.vlgmr.msra.gmra.mrb[40].mxu1 %vm6055_vm9, %v6056_v50  ;;  %v7046_v22 = vpop.eup %7045  ;;  %v8498_v50 = vld [vmem:[%s10012_s3 + $0xe4] ss:$16 sps:$4 sm:$0xff]   ;;  %v8503_v35 = vld [vmem:[%s10012_s3 + $0xec] ss:$16 sps:$4 sm:$0xff]  }
 0x168   :  { %7049 = vrcp.f32 %v1440_v33  ;;  %1961 = vmatpush1.bf16.msra.mxu0 %v7281_v30  ;;  %2002 = vmatpush1.bf16.msra.mxu1 %v7282_v31  ;;  %v7048_v21 = vpop.eup %7047  ;;  %v1453_v14 = vadd.f32 1.0, %v7046_v22  ;;  %v8508_v33 = vld [vmem:[%s10012_s3 + $0xe0] ss:$16 sps:$4 sm:$0xff]   ;;  %v8522_v30 = vld [vmem:[%s10013_s6 + $0x4] ss:$16 sps:$4 sm:$0xff]  }
 0x169   :  { %7051 = vrcp.f32 %v1446_v26  ;;  %1962 = vmatprep.subr.bf16.mxu0 %v7283_v10  ;;  %2003 = vmatprep.subr.bf16.mxu1 %v7284_v38  ;;  %v8513_v26 = vld [vmem:[%s10012_s3 + $0xe8] ss:$16 sps:$4 sm:$0xff]   ;;  %10130 = vst [vmem:[#allocation54_spill] sm:$0xff] %v8522_v30  ;;  %v8527_v31 = vld [vmem:[%s10013_s6 + $0xc] ss:$16 sps:$4 sm:$0xff]  }
 0x16a   :  { %1992 = vmatprep.mubr.bf16.mxu0 %v10099_v11  ;;  %2033 = vmatprep.mubr.bf16.mxu1 %v10099_v11  ;;  %7053 = vrcp.f32 %v1453_v14  ;;  %10131 = vst [vmem:[#allocation55_spill] sm:$0xff] %v8527_v31 }
 0x16c   :  { %1963 = vmatpush1.bf16.msra.mxu0 %v7285_v7  ;;  %2004 = vmatpush1.bf16.msra.mxu1 %v7286_v29 }
 0x16d   :  { %1964 = vmatprep.subr.bf16.mxu0 %v7821_v48  ;;  %2005 = vmatprep.subr.bf16.mxu1 %v7826_v49 }
 0x170   :  { %1965 = vmatpush1.bf16.msra.mxu0 %v7833_v51  ;;  %2006 = vmatpush1.bf16.msra.mxu1 %v7838_v52  ;;  %v8309_v52 = vpop.permute.xlu0 %1472 }
 0x171   :  { %1966 = vmatprep.subr.bf16.mxu0 %v7845_v53  ;;  %2007 = vmatprep.subr.bf16.mxu1 %v7850_v54  ;;  %10129 = vst [vmem:[#allocation53_spill] sm:$0xff] %v8309_v52  ;;  %vm1474_vm10 = vcmp.eq.s32.totalorder %v8309_v52, 1  ;;  %v8730_v52 = vld [vmem:[%s10013_s6 + $0xe4] ss:$16 sps:$4 sm:$0xff]  }
 0x172   :  { %v7050_v13 = vpop.eup %7049  ;;  %vm6093_vm11 = vmpackc.low %vm1474_vm10, %vm1474_vm10 }
 0x173   :  { %v7052_v15 = vpop.eup %7051  ;;  %v1457_v16 = vmul.f32 %v7050_v13, %v7048_v21 }
 0x174   :  { %v1456_v18 = vmul.f32 0.0, %v7052_v15  ;;  %1967 = vmatpush1.bf16.msra.mxu0 %v7859_v56  ;;  %2008 = vmatpush1.bf16.msra.mxu1 %v7864_v57  ;;  %v7054_v49 = vpop.eup %7053  ;;  %v8330_v57 = vld [vmem:[%s10012_s3 + $0x4] ss:$16 sps:$4 sm:$0xff]  }
 0x175   :  { %1968 = vmatprep.subr.bf16.mxu0 %v7869_v58  ;;  %2009 = vmatprep.subr.bf16.mxu1 %v7874_v59  ;;  %v8335_v58 = vld [vmem:[%s10012_s3 + $0xc] ss:$16 sps:$4 sm:$0xff]   ;;  %v8340_v59 = vld [vmem:[%s10012_s3] ss:$16 sps:$4 sm:$0xff]  }
 0x176   :  { %v8294_v48 = vadd.f32 %v1457_v16, %v1456_v18 }
 0x178   :  { %7055 = vtanh.f32 %v8294_v48  ;;  %1969 = vmatpush1.bf16.msra.mxu0 %v7884_v61  ;;  %2010 = vmatpush1.bf16.msra.mxu1 %v7889_v62  ;;  %v8345_v61 = vld [vmem:[%s10012_s3 + $0x8] ss:$16 sps:$4 sm:$0xff]   ;;  %v8354_v62 = vld [vmem:[%s10012_s3 + $0x24] ss:$16 sps:$4 sm:$0xff]  }
 0x179   :  { %1970 = vmatprep.subr.bf16.mxu0 %v7894_v63  ;;  %2011 = vmatprep.subr.bf16.mxu1 %v7899_v0  ;;  %v8359_v63 = vld [vmem:[%s10012_s3 + $0x2c] ss:$16 sps:$4 sm:$0xff]   ;;  %v8364_v0 = vld [vmem:[%s10012_s3 + $0x20] ss:$16 sps:$4 sm:$0xff]  }
 0x17c   :  { %1971 = vmatpush1.bf16.msra.mxu0 %v7908_v2  ;;  %2012 = vmatpush1.bf16.msra.mxu1 %v7913_v3  ;;  %v8369_v2 = vld [vmem:[%s10012_s3 + $0x28] ss:$16 sps:$4 sm:$0xff]   ;;  %v8378_v3 = vld [vmem:[%s10012_s3 + $0x44] ss:$16 sps:$4 sm:$0xff]  }
 0x17d   :  { %1972 = vmatprep.subr.bf16.mxu0 %v7918_v4  ;;  %2013 = vmatprep.subr.bf16.mxu1 %v7923_v5  ;;  %v8383_v4 = vld [vmem:[%s10012_s3 + $0x4c] ss:$16 sps:$4 sm:$0xff]   ;;  %v8388_v5 = vld [vmem:[%s10012_s3 + $0x40] ss:$16 sps:$4 sm:$0xff]  }
 0x180   :  { %1973 = vmatpush1.bf16.msra.mxu0 %v7932_v41  ;;  %2014 = vmatpush1.bf16.msra.mxu1 %v7937_v42  ;;  %v8393_v41 = vld [vmem:[%s10012_s3 + $0x48] ss:$16 sps:$4 sm:$0xff]   ;;  %v8402_v42 = vld [vmem:[%s10012_s3 + $0x64] ss:$16 sps:$4 sm:$0xff]  }
 0x181   :  { %1974 = vmatprep.subr.bf16.mxu0 %v7942_v43  ;;  %2015 = vmatprep.subr.bf16.mxu1 %v7947_v44  ;;  %v8407_v43 = vld [vmem:[%s10012_s3 + $0x6c] ss:$16 sps:$4 sm:$0xff]   ;;  %v8412_v44 = vld [vmem:[%s10012_s3 + $0x60] ss:$16 sps:$4 sm:$0xff]  }
 0x182   :  { %v7056_v51 = vpop.eup %7055 }
 0x183   :  { %v1460_v53 = vmul.f32 %v7056_v51, %v7054_v49 }
 0x184   :  { %1975 = vmatpush1.bf16.msra.mxu0 %v7956_v45  ;;  %2016 = vmatpush1.bf16.msra.mxu1 %v7961_v46  ;;  %v8417_v45 = vld [vmem:[%s10012_s3 + $0x68] ss:$16 sps:$4 sm:$0xff]   ;;  %v8426_v46 = vld [vmem:[%s10012_s3 + $0x84] ss:$16 sps:$4 sm:$0xff]  }
 0x185   :  { %v6094_v54 = vpack.c.bf16 %v1460_v53, %v1460_v53  ;;  %v8316_v56 = vsel %vm1474_vm10, %v1460_v53, 0.0  ;;  %2313 = vmatprep.subr.bf16.mxu0 %v8330_v57  ;;  %2354 = vmatprep.subr.bf16.mxu1 %v8335_v58 }
 0x186   :  { %6022 = vst [vmem:[%s10017_s8 + $0x78] sm:$0xff] %v8316_v56 }
 0x187   :  { %6095 = vmatmul.mubr.msk.bf16.vlgmr.msra.gmra.mrb[44].mxu0 %vm6093_vm11, %v6094_v54  ;;  %6098 = vmatmul.mubr.msk.bf16.vlgmr.msra.gmra.mrb[44].mxu1 %vm6093_vm11, %v6094_v54 }
 0x188   :  { %2345 = vmatprep.mubr.bf16.mxu0 %v10099_v11  ;;  %2386 = vmatprep.mubr.bf16.mxu1 %v10099_v11 }
 0x189   :  { %2314 = vmatpush1.bf16.msra.mxu0 %v8340_v59  ;;  %2355 = vmatpush1.bf16.msra.mxu1 %v8345_v61 }
 0x18a   :  { %2315 = vmatprep.subr.bf16.mxu0 %v8354_v62  ;;  %2356 = vmatprep.subr.bf16.mxu1 %v8359_v63 }
 0x18d   :  { %2316 = vmatpush1.bf16.msra.mxu0 %v8364_v0  ;;  %2357 = vmatpush1.bf16.msra.mxu1 %v8369_v2 }
 0x18e   :  { %2317 = vmatprep.subr.bf16.mxu0 %v8378_v3  ;;  %2358 = vmatprep.subr.bf16.mxu1 %v8383_v4 }
 0x191   :  { %2318 = vmatpush1.bf16.msra.mxu0 %v8388_v5  ;;  %2359 = vmatpush1.bf16.msra.mxu1 %v8393_v41 }
 0x192   :  { %2319 = vmatprep.subr.bf16.mxu0 %v8402_v42  ;;  %2360 = vmatprep.subr.bf16.mxu1 %v8407_v43 }
 0x195   :  { %2320 = vmatpush1.bf16.msra.mxu0 %v8412_v44  ;;  %2361 = vmatpush1.bf16.msra.mxu1 %v8417_v45 }
 0x196   :  { %2321 = vmatprep.subr.bf16.mxu0 %v8426_v46  ;;  %2362 = vmatprep.subr.bf16.mxu1 %v8431_v1 }
 0x199   :  { %2322 = vmatpush1.bf16.msra.mxu0 %v8436_v9  ;;  %2363 = vmatpush1.bf16.msra.mxu1 %v8441_v37 }
 0x19a   :  { %2323 = vmatprep.subr.bf16.mxu0 %v8450_v8  ;;  %2364 = vmatprep.subr.bf16.mxu1 %v8455_v39 }
 0x19d   :  { %2324 = vmatpush1.bf16.msra.mxu0 %v8460_v36  ;;  %2365 = vmatpush1.bf16.msra.mxu1 %v8465_v32 }
 0x19e   :  { %2325 = vmatprep.subr.bf16.mxu0 %v8474_v20  ;;  %2366 = vmatprep.subr.bf16.mxu1 %v8479_v17 }
 0x1a1   :  { %2326 = vmatpush1.bf16.msra.mxu0 %v8484_v19  ;;  %2367 = vmatpush1.bf16.msra.mxu1 %v8489_v40 }
 0x1a2   :  { %2327 = vmatprep.subr.bf16.mxu0 %v8498_v50  ;;  %2368 = vmatprep.subr.bf16.mxu1 %v8503_v35 }
 0x1a5   :  { %2328 = vmatpush1.bf16.msra.mxu0 %v8508_v33  ;;  %2369 = vmatpush1.bf16.msra.mxu1 %v8513_v26 }
 0x1a6   :  { %2596 = vmatprep.subr.bf16.mxu0 %v8522_v30  ;;  %2637 = vmatprep.subr.bf16.mxu1 %v8527_v31 }
 0x23a   :  { %v1711_v10 = vpop.f32.mrb[40].mxu0  ;;  %v1752_v38 = vpop.f32.mrb[40].mxu1 }
 0x23b   :  { %v1759_v7 = vadd.f32 %v1711_v10, %v8041_v23  ;;  %v1761_v29 = vadd.f32 %v1752_v38, %v8044_v25  ;;  %v1713_v22 = vpop.f32.mrb[41].mxu0  ;;  %v1754_v21 = vpop.f32.mrb[41].mxu1 }
 0x23c   :  { %v1760_v13 = vadd.f32 %v1713_v22, %v8047_v27  ;;  %v1762_v15 = vadd.f32 %v1754_v21, %v8050_v28  ;;  %v1715_v14 = vpop.f32.mrb[42].mxu0  ;;  %v1756_v16 = vpop.f32.mrb[42].mxu1  ;;  %v1469_v22 = vsel %vm1467_vm8, %v8247_v47, 0.0 }
 0x23d   :  { %v6099_v18 = vmul.f32 -1.442695, %v1759_v7  ;;  %v1716_v49 = vpop.f32.mrb[43].mxu0  ;;  %v1757_v51 = vpop.f32.mrb[43].mxu1 }
 0x23e   :  { %v6100_v53 = vmul.f32 -1.442695, %v1760_v13  ;;  %v6101_v54 = vmul.f32 -1.442695, %v1762_v15  ;;  %v8535_v38 = vpop.permute.xlu1 %2098 }
 0x23f   :  { %7057 = vpow2.f32 %v6099_v18  ;;  %10132 = vst [vmem:[#allocation56_spill] sm:$0xff] %v8535_v38  ;;  %vm2100_vm12 = vcmp.eq.s32.totalorder %v8535_v38, 1  ;;  %v8668_v38 = vld [vmem:[%s10013_s6 + $0x88] ss:$16 sps:$4 sm:$0xff]  }
 0x240   :  { %7059 = vpow2.f32 %v6100_v53 }
 0x241   :  { %7061 = vpow2.f32 %v6101_v54 }
 0x242   :  { %7063 = vtanh.f32 %v1761_v29 }
 0x249   :  { %v7058_v31 = vpop.eup %7057 }
 0x24a   :  { %v7060_v30 = vpop.eup %7059  ;;  %v2049_v23 = vadd.f32 1.0, %v7058_v31 }
 0x24b   :  { %v2055_v25 = vadd.f32 1.0, %v7060_v30  ;;  %v7062_v27 = vpop.eup %7061 }
 0x24c   :  { %7065 = vrcp.f32 %v2049_v23  ;;  %v7064_v10 = vpop.eup %7063  ;;  %v2062_v13 = vadd.f32 1.0, %v7062_v27 }
 0x24d   :  { %7067 = vrcp.f32 %v2055_v25 }
 0x24e   :  { %7069 = vrcp.f32 %v2062_v13 }
 0x256   :  { %v7066_v28 = vpop.eup %7065 }
 0x257   :  { %v7068_v7 = vpop.eup %7067  ;;  %v2066_v21 = vmul.f32 %v7066_v28, %v7064_v10 }
 0x258   :  { %v2065_v15 = vmul.f32 %v7068_v7, %v1469_v22 }
 0x25a   :  { %v2067_v31 = vadd.f32 %v2066_v21, %v2065_v15  ;;  %v1994_v29 = vpop.f32.mrb[44].mxu0  ;;  %v2035_v30 = vpop.f32.mrb[44].mxu1  ;;  %v8564_v15 = vld [vmem:[%s10013_s6 + $0x8] ss:$16 sps:$4 sm:$0xff]  }
 0x25b   :  { %v2042_v14 = vadd.f32 %v1994_v29, %v8224_v24  ;;  %v2044_v16 = vadd.f32 %v2035_v30, %v8227_v55  ;;  %v1996_v18 = vpop.f32.mrb[45].mxu0  ;;  %v2037_v49 = vpop.f32.mrb[45].mxu1  ;;  %v8574_v30 = vld [vmem:[%s10013_s6 + $0x24] ss:$16 sps:$4 sm:$0xff]  }
 0x25c   :  { %7071 = vtanh.f32 %v2067_v31  ;;  %v8545_v51 = vsel %vm2100_vm12, %v2067_v31, %v1469_v22  ;;  %v2043_v47 = vadd.f32 %v1996_v18, %v8230_v34  ;;  %v2045_v53 = vadd.f32 %v2037_v49, %v8233_v12  ;;  %v1998_v54 = vpop.f32.mrb[46].mxu0  ;;  %v2039_v23 = vpop.f32.mrb[46].mxu1  ;;  %v8559_v12 = vld [vmem:[%s10013_s6] ss:$16 sps:$4 sm:$0xff]  }
 0x25d   :  { %v6102_v25 = vmul.f32 -1.442695, %v2042_v14  ;;  %v1999_v27 = vpop.f32.mrb[47].mxu0  ;;  %v2040_v10 = vpop.f32.mrb[47].mxu1  ;;  %v8579_v14 = vld [vmem:[%s10013_s6 + $0x2c] ss:$16 sps:$4 sm:$0xff]  }
 0x25e   :  { %v6103_v28 = vmul.f32 -1.442695, %v2043_v47  ;;  %v7070_v24 = vpop.eup %7069  ;;  %v6104_v7 = vmul.f32 -1.442695, %v2045_v53  ;;  %v8586_v49 = vld [vmem:[%s10013_s6 + $0x20] ss:$16 sps:$4 sm:$0xff]  }
 0x25f   :  { %7073 = vpow2.f32 %v6102_v25  ;;  %v8591_v47 = vld [vmem:[%s10013_s6 + $0x28] ss:$16 sps:$4 sm:$0xff]   ;;  %v8603_v53 = vld [vmem:[%s10013_s6 + $0x4c] ss:$16 sps:$4 sm:$0xff]   ;;  %v8612_v54 = vld [vmem:[%s10013_s6 + $0x40] ss:$16 sps:$4 sm:$0xff]  }
 0x260   :  { %7075 = vpow2.f32 %v6103_v28  ;;  %v8617_v23 = vld [vmem:[%s10013_s6 + $0x48] ss:$16 sps:$4 sm:$0xff]   ;;  %v8624_v25 = vld [vmem:[%s10013_s6 + $0x64] ss:$16 sps:$4 sm:$0xff]   ;;  %v8629_v27 = vld [vmem:[%s10013_s6 + $0x6c] ss:$16 sps:$4 sm:$0xff]  }
 0x261   :  { %7077 = vpow2.f32 %v6104_v7  ;;  %10133 = vst [vmem:[#allocation57_spill] sm:$0xff] %v8629_v27 }
 0x262   :  { %7079 = vtanh.f32 %v2044_v16  ;;  %v8598_v16 = vld [vmem:[%s10013_s6 + $0x44] ss:$16 sps:$4 sm:$0xff]  }
 0x266   :  { %v7072_v55 = vpop.eup %7071 }
 0x267   :  { %v2069_v21 = vmul.f32 %v7072_v55, %v7070_v24  ;;  %v8636_v24 = vld [vmem:[%s10013_s6 + $0x60] ss:$16 sps:$4 sm:$0xff]   ;;  %v8641_v55 = vld [vmem:[%s10013_s6 + $0x68] ss:$16 sps:$4 sm:$0xff]  }
 0x269   :  { %v7074_v13 = vpop.eup %7073  ;;  %v2110_v22 = vsel %vm2100_vm12, %v2069_v21, 0.0  ;;  %v8554_v34 = vsel %vm2100_vm12, %v2069_v21, %v8258_v60  ;;  %v8648_v21 = vld [vmem:[%s10013_s6 + $0x84] ss:$16 sps:$4 sm:$0xff]  }
 0x26a   :  { %v7076_v31 = vpop.eup %7075  ;;  %6105 = vst [vmem:[%s10017_s8 + $0x10] sm:$0xff] %v2110_v22  ;;  %v2073_v29 = vadd.f32 1.0, %v7074_v13  ;;  %v2120_v60 = vpack.c.bf16 %v8554_v34, %v8554_v34  ;;  %v8653_v13 = vld [vmem:[%s10013_s6 + $0x8c] ss:$16 sps:$4 sm:$0xff]  }
 0x26b   :  { %v2079_v18 = vadd.f32 1.0, %v7076_v31  ;;  %v7078_v10 = vpop.eup %7077  ;;  %v1476_v31 = vsel %vm1474_vm10, %v8294_v48, 0.0 }
 0x26c   :  { %7081 = vrcp.f32 %v2073_v29  ;;  %2346 = vmatmul.mubr.bf16.vlgmr.msra.gmra.mrb[48].mxu0 %v2120_v60  ;;  %2387 = vmatmul.mubr.bf16.vlgmr.msra.gmra.mrb[48].mxu1 %v2120_v60  ;;  %v7080_v28 = vpop.eup %7079  ;;  %v2086_v60 = vadd.f32 1.0, %v7078_v10  ;;  %v8677_v10 = vld [vmem:[%s10013_s6 + $0xa4] ss:$16 sps:$4 sm:$0xff]  }
 0x26d   :  { %7083 = vrcp.f32 %v2079_v18  ;;  %2597 = vmatpush1.bf16.msra.mxu0 %v8559_v12  ;;  %2638 = vmatpush1.bf16.msra.mxu1 %v8564_v15  ;;  %10135 = vst [vmem:[#allocation59_spill] sm:$0xff] %v8677_v10 }
 0x26e   :  { %2598 = vmatprep.subr.bf16.mxu0 %v8574_v30  ;;  %2639 = vmatprep.subr.bf16.mxu1 %v8579_v14  ;;  %7085 = vrcp.f32 %v2086_v60  ;;  %v8711_v60 = vld [vmem:[%s10013_s6 + $0xcc] ss:$16 sps:$4 sm:$0xff]  }
 0x26f   :  { %2628 = vmatprep.mubr.bf16.mxu0 %v10099_v11  ;;  %2669 = vmatprep.mubr.bf16.mxu1 %v10099_v11  ;;  %10140 = vst [vmem:[#allocation64_spill] sm:$0xff] %v8711_v60 }
 0x271   :  { %2599 = vmatpush1.bf16.msra.mxu0 %v8586_v49  ;;  %2640 = vmatpush1.bf16.msra.mxu1 %v8591_v47 }
 0x272   :  { %2600 = vmatprep.subr.bf16.mxu0 %v8598_v16  ;;  %2641 = vmatprep.subr.bf16.mxu1 %v8603_v53 }
 0x275   :  { %2601 = vmatpush1.bf16.msra.mxu0 %v8612_v54  ;;  %2642 = vmatpush1.bf16.msra.mxu1 %v8617_v23 }
 0x276   :  { %v7082_v7 = vpop.eup %7081  ;;  %2602 = vmatprep.subr.bf16.mxu0 %v8624_v25  ;;  %2643 = vmatprep.subr.bf16.mxu1 %v8629_v27  ;;  %v8670_v27 = vpop.permute.xlu1 %2105 }
 0x277   :  { %v7084_v22 = vpop.eup %7083  ;;  %v2090_v29 = vmul.f32 %v7082_v7, %v7080_v28  ;;  %10134 = vst [vmem:[#allocation58_spill] sm:$0xff] %v8670_v27  ;;  %v8682_v28 = vld [vmem:[%s10013_s6 + $0xac] ss:$16 sps:$4 sm:$0xff]   ;;  %vm2107_vm13 = vcmp.eq.s32.totalorder %v8670_v27, 1 }
 0x278   :  { %v2089_v18 = vmul.f32 %v7084_v22, %v1476_v31  ;;  %10136 = vst [vmem:[#allocation60_spill] sm:$0xff] %v8682_v28  ;;  %v8694_v22 = vld [vmem:[%s10013_s6 + $0xa0] ss:$16 sps:$4 sm:$0xff]  }
 0x279   :  { %2603 = vmatpush1.bf16.msra.mxu0 %v8636_v24  ;;  %2644 = vmatpush1.bf16.msra.mxu1 %v8641_v55  ;;  %10137 = vst [vmem:[#allocation61_spill] sm:$0xff] %v8694_v22 }
 0x27a   :  { %v2091_v48 = vadd.f32 %v2090_v29, %v2089_v18  ;;  %2604 = vmatprep.subr.bf16.mxu0 %v8648_v21  ;;  %2645 = vmatprep.subr.bf16.mxu1 %v8653_v13  ;;  %v8699_v29 = vld [vmem:[%s10013_s6 + $0xa8] ss:$16 sps:$4 sm:$0xff]   ;;  %v8718_v18 = vld [vmem:[%s10013_s6 + $0xc0] ss:$16 sps:$4 sm:$0xff]  }
 0x27b   :  { %10138 = vst [vmem:[#allocation62_spill] sm:$0xff] %v8699_v29  ;;  %10141 = vst [vmem:[#allocation65_spill] sm:$0xff] %v8718_v18 }
 0x27c   :  { %7087 = vtanh.f32 %v2091_v48  ;;  %v8687_v7 = vsel %vm2107_vm13, %v2091_v48, %v1476_v31  ;;  %v8706_v31 = vld [vmem:[%s10013_s6 + $0xc4] ss:$16 sps:$4 sm:$0xff]   ;;  %v8723_v48 = vld [vmem:[%s10013_s6 + $0xc8] ss:$16 sps:$4 sm:$0xff]  }
 0x27d   :  { %2605 = vmatpush1.bf16.msra.mxu0 %v8663_v6  ;;  %2646 = vmatpush1.bf16.msra.mxu1 %v8668_v38  ;;  %10139 = vst [vmem:[#allocation63_spill] sm:$0xff] %v8706_v31  ;;  %10142 = vst [vmem:[#allocation66_spill] sm:$0xff] %v8723_v48 }
 0x27e   :  { %2606 = vmatprep.subr.bf16.mxu0 %v8677_v10  ;;  %2647 = vmatprep.subr.bf16.mxu1 %v8682_v28 }
 0x281   :  { %2607 = vmatpush1.bf16.msra.mxu0 %v8694_v22  ;;  %2648 = vmatpush1.bf16.msra.mxu1 %v8699_v29  ;;  %v8735_v29 = vld [vmem:[%s10013_s6 + $0xec] ss:$16 sps:$4 sm:$0xff]   ;;  %v7086_v22 = vpop.eup %7085 }
 0x282   :  { %2608 = vmatprep.subr.bf16.mxu0 %v8706_v31  ;;  %2649 = vmatprep.subr.bf16.mxu1 %v8711_v60  ;;  %10143 = vst [vmem:[#allocation67_spill] sm:$0xff] %v8735_v29  ;;  %v8742_v31 = vld [vmem:[%s10013_s6 + $0xe0] ss:$16 sps:$4 sm:$0xff]   ;;  %v8747_v60 = vld [vmem:[%s10013_s6 + $0xe8] ss:$16 sps:$4 sm:$0xff]  }
 0x285   :  { %2609 = vmatpush1.bf16.msra.mxu0 %v8718_v18  ;;  %2650 = vmatpush1.bf16.msra.mxu1 %v8723_v48 }
 0x286   :  { %v7088_v28 = vpop.eup %7087  ;;  %2610 = vmatprep.subr.bf16.mxu0 %v8730_v52  ;;  %2651 = vmatprep.subr.bf16.mxu1 %v8735_v29 }
 0x287   :  { %v2093_v10 = vmul.f32 %v7088_v28, %v7086_v22 }
 0x289   :  { %v2113_v18 = vsel %vm2107_vm13, %v2093_v10, 0.0  ;;  %2611 = vmatpush1.bf16.msra.mxu0 %v8742_v31  ;;  %2652 = vmatpush1.bf16.msra.mxu1 %v8747_v60  ;;  %v8758_v48 = vsel %vm2107_vm13, %v2093_v10, %v8316_v56  ;;  %v10144_v56 = vld [vmem:[#allocation54_spill] sm:$0xff] }
 0x28a   :  { %6106 = vst [vmem:[%s10017_s8 + $0x68] sm:$0xff] %v2113_v18  ;;  %v2403_v29 = vpack.c.bf16 %v8758_v48, %v8758_v48  ;;  %2949 = vmatprep.subr.bf16.mxu0 %v8330_v57  ;;  %2990 = vmatprep.subr.bf16.mxu1 %v8335_v58  ;;  %v10145_v57 = vld [vmem:[#allocation55_spill] sm:$0xff] }
 0x28c   :  { %2629 = vmatmul.mubr.bf16.vlgmr.msra.gmra.mrb[52].mxu0 %v2403_v29  ;;  %2670 = vmatmul.mubr.bf16.vlgmr.msra.gmra.mrb[52].mxu1 %v2403_v29  ;;  %v10151_v29 = vld [vmem:[#allocation48_spill] sm:$0xff] }
 0x28d   :  { %2950 = vmatpush1.bf16.msra.mxu0 %v8340_v59  ;;  %2991 = vmatpush1.bf16.msra.mxu1 %v8345_v61  ;;  %v10146_v61 = vld [vmem:[#allocation4_spill] sm:$0xff] }
 0x28e   :  { %2951 = vmatprep.subr.bf16.mxu0 %v8354_v62  ;;  %2992 = vmatprep.subr.bf16.mxu1 %v8359_v63  ;;  %v10147_v63 = vld [vmem:[#allocation5_spill] sm:$0xff] }
 0x28f   :  { %2981 = vmatprep.mubr.bf16.mxu0 %v10099_v11  ;;  %3022 = vmatprep.mubr.bf16.mxu1 %v10099_v11 }
 0x291   :  { %2952 = vmatpush1.bf16.msra.mxu0 %v8364_v0  ;;  %2993 = vmatpush1.bf16.msra.mxu1 %v8369_v2 }
 0x292   :  { %2953 = vmatprep.subr.bf16.mxu0 %v8378_v3  ;;  %2994 = vmatprep.subr.bf16.mxu1 %v8383_v4  ;;  %v10148_v4 = vld [vmem:[#allocation6_spill] sm:$0xff] }
 0x295   :  { %2954 = vmatpush1.bf16.msra.mxu0 %v8388_v5  ;;  %2995 = vmatpush1.bf16.msra.mxu1 %v8393_v41  ;;  %v10149_v41 = vld [vmem:[#allocation7_spill] sm:$0xff] }
 0x296   :  { %2955 = vmatprep.subr.bf16.mxu0 %v8402_v42  ;;  %2996 = vmatprep.subr.bf16.mxu1 %v8407_v43 }
 0x299   :  { %2956 = vmatpush1.bf16.msra.mxu0 %v8412_v44  ;;  %2997 = vmatpush1.bf16.msra.mxu1 %v8417_v45 }
 0x29a   :  { %2957 = vmatprep.subr.bf16.mxu0 %v8426_v46  ;;  %2998 = vmatprep.subr.bf16.mxu1 %v8431_v1 }
 0x29d   :  { %2958 = vmatpush1.bf16.msra.mxu0 %v8436_v9  ;;  %2999 = vmatpush1.bf16.msra.mxu1 %v8441_v37 }
 0x29e   :  { %2959 = vmatprep.subr.bf16.mxu0 %v8450_v8  ;;  %3000 = vmatprep.subr.bf16.mxu1 %v8455_v39 }
 0x2a1   :  { %2960 = vmatpush1.bf16.msra.mxu0 %v8460_v36  ;;  %3001 = vmatpush1.bf16.msra.mxu1 %v8465_v32 }
 0x2a2   :  { %2961 = vmatprep.subr.bf16.mxu0 %v8474_v20  ;;  %3002 = vmatprep.subr.bf16.mxu1 %v8479_v17 }
 0x2a5   :  { %2962 = vmatpush1.bf16.msra.mxu0 %v8484_v19  ;;  %3003 = vmatpush1.bf16.msra.mxu1 %v8489_v40 }
 0x2a6   :  { %2963 = vmatprep.subr.bf16.mxu0 %v8498_v50  ;;  %3004 = vmatprep.subr.bf16.mxu1 %v8503_v35 }
 0x2a9   :  { %2964 = vmatpush1.bf16.msra.mxu0 %v8508_v33  ;;  %3005 = vmatpush1.bf16.msra.mxu1 %v8513_v26  ;;  %v8806_v26 = vpop.permute.xlu0 %2734 }
 0x2aa   :  { %3232 = vmatprep.subr.bf16.mxu0 %v10144_v56  ;;  %3273 = vmatprep.subr.bf16.mxu1 %v10145_v57  ;;  %10150 = vst [vmem:[#allocation54_spill] sm:$0xff] %v8806_v26  ;;  %vm2736_vm14 = vcmp.eq.s32.totalorder %v8806_v26, 1  ;;  %v10152_v56 = vld [vmem:[#allocation49_spill] sm:$0xff] }
 0x33f   :  { %v2347_v58 = vpop.f32.mrb[48].mxu0  ;;  %v2388_v59 = vpop.f32.mrb[48].mxu1 }
 0x340   :  { %v2395_v62 = vadd.f32 %v2347_v58, %v10146_v61  ;;  %v2397_v0 = vadd.f32 %v2388_v59, %v10147_v63  ;;  %v2349_v2 = vpop.f32.mrb[49].mxu0  ;;  %v2390_v3 = vpop.f32.mrb[49].mxu1  ;;  %v10153_v61 = vld [vmem:[#allocation50_spill] sm:$0xff]  ;;  %v10154_v63 = vld [vmem:[#allocation51_spill] sm:$0xff] }
 0x341   :  { %v2396_v5 = vadd.f32 %v2349_v2, %v10148_v4  ;;  %v2398_v42 = vadd.f32 %v2390_v3, %v10149_v41  ;;  %v2351_v43 = vpop.f32.mrb[50].mxu0  ;;  %v2392_v44 = vpop.f32.mrb[50].mxu1 }
 0x342   :  { %v6171_v45 = vmul.f32 -1.442695, %v2395_v62  ;;  %v2352_v46 = vpop.f32.mrb[51].mxu0  ;;  %v2393_v1 = vpop.f32.mrb[51].mxu1 }
 0x343   :  { %v6172_v9 = vmul.f32 -1.442695, %v2396_v5  ;;  %v6173_v37 = vmul.f32 -1.442695, %v2398_v42 }
 0x344   :  { %7089 = vpow2.f32 %v6171_v45 }
 0x345   :  { %7091 = vpow2.f32 %v6172_v9 }
 0x346   :  { %7093 = vpow2.f32 %v6173_v37 }
 0x347   :  { %7095 = vtanh.f32 %v2397_v0 }
 0x34e   :  { %v7090_v8 = vpop.eup %7089 }
 0x34f   :  { %v7092_v39 = vpop.eup %7091  ;;  %v2685_v36 = vadd.f32 1.0, %v7090_v8 }
 0x350   :  { %v2691_v32 = vadd.f32 1.0, %v7092_v39  ;;  %v7094_v20 = vpop.eup %7093 }
 0x351   :  { %7097 = vrcp.f32 %v2685_v36  ;;  %v7096_v17 = vpop.eup %7095  ;;  %v2698_v35 = vadd.f32 1.0, %v7094_v20 }
 0x352   :  { %7099 = vrcp.f32 %v2691_v32 }
 0x353   :  { %7101 = vrcp.f32 %v2698_v35 }
 0x35b   :  { %v7098_v19 = vpop.eup %7097 }
 0x35c   :  { %v7100_v40 = vpop.eup %7099  ;;  %v2702_v50 = vmul.f32 %v7098_v19, %v7096_v17  ;;  %v10163_v19 = vld [vmem:[#allocation65_spill] sm:$0xff] }
 0x35d   :  { %v2701_v33 = vmul.f32 %v7100_v40, %v8545_v51  ;;  %v7102_v44 = vpop.eup %7101 }
 0x35f   :  { %v2703_v10 = vadd.f32 %v2702_v50, %v2701_v33  ;;  %v2630_v28 = vpop.f32.mrb[52].mxu0  ;;  %v2671_v22 = vpop.f32.mrb[52].mxu1  ;;  %v8903_v33 = vld [vmem:[%s10012_s3 + $0x8] ss:$16 sps:$4 sm:$0xff]  }
 0x360   :  { %v2678_v18 = vadd.f32 %v2630_v28, %v10151_v29  ;;  %v2680_v57 = vadd.f32 %v2671_v22, %v10152_v56  ;;  %v2632_v58 = vpop.f32.mrb[53].mxu0  ;;  %v2673_v59 = vpop.f32.mrb[53].mxu1  ;;  %v8917_v28 = vld [vmem:[%s10012_s3 + $0x2c] ss:$16 sps:$4 sm:$0xff]   ;;  %v8922_v22 = vld [vmem:[%s10012_s3 + $0x20] ss:$16 sps:$4 sm:$0xff]  }
 0x361   :  { %7103 = vtanh.f32 %v2703_v10  ;;  %v2679_v62 = vadd.f32 %v2632_v58, %v10153_v61  ;;  %v2681_v0 = vadd.f32 %v2673_v59, %v10154_v63  ;;  %v2634_v2 = vpop.f32.mrb[54].mxu0  ;;  %v2675_v3 = vpop.f32.mrb[54].mxu1  ;;  %v8816_v4 = vsel %vm2736_vm14, %v2703_v10, %v8545_v51  ;;  %v8912_v10 = vld [vmem:[%s10012_s3 + $0x24] ss:$16 sps:$4 sm:$0xff]   ;;  %v8927_v29 = vld [vmem:[%s10012_s3 + $0x28] ss:$16 sps:$4 sm:$0xff]  }
 0x362   :  { %v6174_v5 = vmul.f32 -1.442695, %v2678_v18  ;;  %v2635_v41 = vpop.f32.mrb[55].mxu0  ;;  %v2676_v42 = vpop.f32.mrb[55].mxu1  ;;  %v8936_v18 = vld [vmem:[%s10012_s3 + $0x44] ss:$16 sps:$4 sm:$0xff]  }
 0x363   :  { %v6175_v43 = vmul.f32 -1.442695, %v2679_v62  ;;  %v6176_v46 = vmul.f32 -1.442695, %v2681_v0  ;;  %v8941_v56 = vld [vmem:[%s10012_s3 + $0x4c] ss:$16 sps:$4 sm:$0xff]  }
 0x364   :  { %7105 = vpow2.f32 %v6174_v5  ;;  %v8951_v58 = vld [vmem:[%s10012_s3 + $0x48] ss:$16 sps:$4 sm:$0xff]   ;;  %v8960_v59 = vld [vmem:[%s10012_s3 + $0x64] ss:$16 sps:$4 sm:$0xff]   ;;  %v8965_v61 = vld [vmem:[%s10012_s3 + $0x6c] ss:$16 sps:$4 sm:$0xff]  }
 0x365   :  { %7107 = vpow2.f32 %v6175_v43  ;;  %v8970_v62 = vld [vmem:[%s10012_s3 + $0x60] ss:$16 sps:$4 sm:$0xff]   ;;  %v8975_v63 = vld [vmem:[%s10012_s3 + $0x68] ss:$16 sps:$4 sm:$0xff]   ;;  %v8984_v0 = vld [vmem:[%s10012_s3 + $0x84] ss:$16 sps:$4 sm:$0xff]  }
 0x366   :  { %7109 = vpow2.f32 %v6176_v46  ;;  %v8989_v2 = vld [vmem:[%s10012_s3 + $0x8c] ss:$16 sps:$4 sm:$0xff]   ;;  %v8994_v3 = vld [vmem:[%s10012_s3 + $0x80] ss:$16 sps:$4 sm:$0xff]   ;;  %v8999_v5 = vld [vmem:[%s10012_s3 + $0x88] ss:$16 sps:$4 sm:$0xff]  }
 0x367   :  { %7111 = vtanh.f32 %v2680_v57  ;;  %v8946_v57 = vld [vmem:[%s10012_s3 + $0x40] ss:$16 sps:$4 sm:$0xff]   ;;  %v9008_v41 = vld [vmem:[%s10012_s3 + $0xa4] ss:$16 sps:$4 sm:$0xff]   ;;  %v9013_v42 = vld [vmem:[%s10012_s3 + $0xac] ss:$16 sps:$4 sm:$0xff]  }
 0x368   :  { %v9018_v43 = vld [vmem:[%s10012_s3 + $0xa0] ss:$16 sps:$4 sm:$0xff]   ;;  %v9037_v46 = vld [vmem:[%s10012_s3 + $0xcc] ss:$16 sps:$4 sm:$0xff]  }
 0x36b   :  { %v7104_v45 = vpop.eup %7103 }
 0x36c   :  { %v2705_v1 = vmul.f32 %v7104_v45, %v7102_v44  ;;  %v9023_v44 = vld [vmem:[%s10012_s3 + $0xa8] ss:$16 sps:$4 sm:$0xff]   ;;  %v9032_v45 = vld [vmem:[%s10012_s3 + $0xc4] ss:$16 sps:$4 sm:$0xff]  }
 0x36e   :  { %v7106_v9 = vpop.eup %7105  ;;  %v8821_v37 = vsel %vm2736_vm14, %v2705_v1, %v8554_v34  ;;  %v2746_v51 = vsel %vm2736_vm14, %v2705_v1, 0.0  ;;  %v9042_v1 = vld [vmem:[%s10012_s3 + $0xc0] ss:$16 sps:$4 sm:$0xff]  }
 0x36f   :  { %v7108_v8 = vpop.eup %7107  ;;  %v2709_v39 = vadd.f32 1.0, %v7106_v9  ;;  %6177 = vst [vmem:[%s10017_s8 + $0x20] sm:$0xff] %v2746_v51  ;;  %v2756_v36 = vpack.c.bf16 %v8821_v37, %v8821_v37  ;;  %v9047_v9 = vld [vmem:[%s10012_s3 + $0xc8] ss:$16 sps:$4 sm:$0xff]   ;;  %v9056_v51 = vld [vmem:[%s10012_s3 + $0xe4] ss:$16 sps:$4 sm:$0xff]  }
 0x370   :  { %v2715_v32 = vadd.f32 1.0, %v7108_v8  ;;  %v7110_v34 = vpop.eup %7109  ;;  %v9061_v8 = vld [vmem:[%s10012_s3 + $0xec] ss:$16 sps:$4 sm:$0xff]  }
 0x371   :  { %7113 = vrcp.f32 %v2709_v39  ;;  %2982 = vmatmul.mubr.bf16.vlgmr.msra.gmra.mrb[56].mxu0 %v2756_v36  ;;  %3023 = vmatmul.mubr.bf16.vlgmr.msra.gmra.mrb[56].mxu1 %v2756_v36  ;;  %v9066_v39 = vld [vmem:[%s10012_s3 + $0xe0] ss:$16 sps:$4 sm:$0xff]   ;;  %v9071_v36 = vld [vmem:[%s10012_s3 + $0xe8] ss:$16 sps:$4 sm:$0xff]  }
 0x372   :  { %7115 = vrcp.f32 %v2715_v32  ;;  %3233 = vmatpush1.bf16.msra.mxu0 %v8559_v12  ;;  %3274 = vmatpush1.bf16.msra.mxu1 %v8564_v15  ;;  %v7112_v12 = vpop.eup %7111  ;;  %v9080_v32 = vld [vmem:[%s10013_s6 + $0x4] ss:$16 sps:$4 sm:$0xff]  }
 0x373   :  { %3234 = vmatprep.subr.bf16.mxu0 %v8574_v30  ;;  %3275 = vmatprep.subr.bf16.mxu1 %v8579_v14  ;;  %v10155_v30 = vld [vmem:[#allocation57_spill] sm:$0xff] }
 0x374   :  { %3264 = vmatprep.mubr.bf16.mxu0 %v10099_v11  ;;  %3305 = vmatprep.mubr.bf16.mxu1 %v10099_v11 }
 0x376   :  { %3235 = vmatpush1.bf16.msra.mxu0 %v8586_v49  ;;  %3276 = vmatpush1.bf16.msra.mxu1 %v8591_v47  ;;  %v2722_v49 = vadd.f32 1.0, %v7110_v34  ;;  %v9085_v34 = vld [vmem:[%s10013_s6 + $0xc] ss:$16 sps:$4 sm:$0xff]  }
 0x377   :  { %3236 = vmatprep.subr.bf16.mxu0 %v8598_v16  ;;  %3277 = vmatprep.subr.bf16.mxu1 %v8603_v53  ;;  %v8847_v16 = vpop.permute.xlu1 %2741 }
 0x378   :  { %10156 = vst [vmem:[#allocation55_spill] sm:$0xff] %v8847_v16  ;;  %vm2743_vm15 = vcmp.eq.s32.totalorder %v8847_v16, 1  ;;  %7117 = vrcp.f32 %v2722_v49 }
 0x37a   :  { %3237 = vmatpush1.bf16.msra.mxu0 %v8612_v54  ;;  %3278 = vmatpush1.bf16.msra.mxu1 %v8617_v23  ;;  %v10157_v23 = vld [vmem:[#allocation59_spill] sm:$0xff] }
 0x37b   :  { %v7114_v15 = vpop.eup %7113  ;;  %3238 = vmatprep.subr.bf16.mxu0 %v8624_v25  ;;  %3279 = vmatprep.subr.bf16.mxu1 %v10155_v30  ;;  %v10158_v25 = vld [vmem:[#allocation60_spill] sm:$0xff]  ;;  %v9212_v26 = vpop.permute.xlu1 %3377 }
 0x37c   :  { %v7116_v14 = vpop.eup %7115  ;;  %v2726_v20 = vmul.f32 %v7114_v15, %v7112_v12  ;;  %v10166_v30 = vld [vmem:[#allocation8_spill] sm:$0xff]  ;;  %vm3379_vm1 = vcmp.eq.s32.totalorder %v9212_v26, 1 }
 0x37d   :  { %v2725_v47 = vmul.f32 %v7116_v14, %v8687_v7 }
 0x37e   :  { %3239 = vmatpush1.bf16.msra.mxu0 %v8636_v24  ;;  %3280 = vmatpush1.bf16.msra.mxu1 %v8641_v55  ;;  %v10159_v24 = vld [vmem:[#allocation61_spill] sm:$0xff]  ;;  %v10160_v55 = vld [vmem:[#allocation62_spill] sm:$0xff] }
 0x37f   :  { %v2727_v53 = vadd.f32 %v2726_v20, %v2725_v47  ;;  %3240 = vmatprep.subr.bf16.mxu0 %v8648_v21  ;;  %3281 = vmatprep.subr.bf16.mxu1 %v8653_v13  ;;  %v10161_v21 = vld [vmem:[#allocation63_spill] sm:$0xff]  ;;  %v10162_v13 = vld [vmem:[#allocation64_spill] sm:$0xff]  ;;  %v10167_v20 = vld [vmem:[#allocation9_spill] sm:$0xff] }
 0x381   :  { %7119 = vtanh.f32 %v2727_v53  ;;  %v8855_v54 = vsel %vm2743_vm15, %v2727_v53, %v8687_v7  ;;  %v10164_v7 = vld [vmem:[#allocation66_spill] sm:$0xff] }
 0x382   :  { %3241 = vmatpush1.bf16.msra.mxu0 %v8663_v6  ;;  %3282 = vmatpush1.bf16.msra.mxu1 %v8668_v38  ;;  %v7118_v17 = vpop.eup %7117  ;;  %v10165_v38 = vld [vmem:[#allocation67_spill] sm:$0xff] }
 0x383   :  { %3242 = vmatprep.subr.bf16.mxu0 %v10157_v23  ;;  %3283 = vmatprep.subr.bf16.mxu1 %v10158_v25  ;;  %v10168_v23 = vld [vmem:[#allocation10_spill] sm:$0xff] }
 0x386   :  { %3243 = vmatpush1.bf16.msra.mxu0 %v10159_v24  ;;  %3284 = vmatpush1.bf16.msra.mxu1 %v10160_v55  ;;  %v10169_v24 = vld [vmem:[#allocation11_spill] sm:$0xff] }
 0x387   :  { %3244 = vmatprep.subr.bf16.mxu0 %v10161_v21  ;;  %3285 = vmatprep.subr.bf16.mxu1 %v10162_v13 }
 0x38a   :  { %3245 = vmatpush1.bf16.msra.mxu0 %v10163_v19  ;;  %3286 = vmatpush1.bf16.msra.mxu1 %v10164_v7 }
 0x38b   :  { %v7120_v6 = vpop.eup %7119  ;;  %3246 = vmatprep.subr.bf16.mxu0 %v8730_v52  ;;  %3287 = vmatprep.subr.bf16.mxu1 %v10165_v38 }
 0x38c   :  { %v2729_v40 = vmul.f32 %v7120_v6, %v7118_v17 }
 0x38e   :  { %3247 = vmatpush1.bf16.msra.mxu0 %v8742_v31  ;;  %3288 = vmatpush1.bf16.msra.mxu1 %v8747_v60  ;;  %v8874_v50 = vsel %vm2743_vm15, %v2729_v40, %v8758_v48  ;;  %v2749_v35 = vsel %vm2743_vm15, %v2729_v40, 0.0  ;;  %v8888_v31 = vld [vmem:[%s10012_s3 + $0x4] ss:$16 sps:$4 sm:$0xff]   ;;  %v8893_v60 = vld [vmem:[%s10012_s3 + $0xc] ss:$16 sps:$4 sm:$0xff]  }
 0x38f   :  { %6178 = vst [vmem:[%s10017_s8 + $0x58] sm:$0xff] %v2749_v35  ;;  %v3039_v52 = vpack.c.bf16 %v8874_v50, %v8874_v50  ;;  %v8898_v48 = vld [vmem:[%s10012_s3] ss:$16 sps:$4 sm:$0xff]   ;;  %3585 = vmatprep.subr.bf16.mxu0 %v8888_v31  ;;  %3626 = vmatprep.subr.bf16.mxu1 %v8893_v60 }
 0x391   :  { %3265 = vmatmul.mubr.bf16.vlgmr.msra.gmra.mrb[60].mxu0 %v3039_v52  ;;  %3306 = vmatmul.mubr.bf16.vlgmr.msra.gmra.mrb[60].mxu1 %v3039_v52 }
 0x392   :  { %3617 = vmatprep.mubr.bf16.mxu0 %v10099_v11  ;;  %3658 = vmatprep.mubr.bf16.mxu1 %v10099_v11 }
 0x393   :  { %3586 = vmatpush1.bf16.msra.mxu0 %v8898_v48  ;;  %3627 = vmatpush1.bf16.msra.mxu1 %v8903_v33 }
 0x394   :  { %3587 = vmatprep.subr.bf16.mxu0 %v8912_v10  ;;  %3628 = vmatprep.subr.bf16.mxu1 %v8917_v28 }
 0x397   :  { %3588 = vmatpush1.bf16.msra.mxu0 %v8922_v22  ;;  %3629 = vmatpush1.bf16.msra.mxu1 %v8927_v29 }
 0x398   :  { %3589 = vmatprep.subr.bf16.mxu0 %v8936_v18  ;;  %3630 = vmatprep.subr.bf16.mxu1 %v8941_v56 }
 0x39b   :  { %3590 = vmatpush1.bf16.msra.mxu0 %v8946_v57  ;;  %3631 = vmatpush1.bf16.msra.mxu1 %v8951_v58 }
 0x39c   :  { %3591 = vmatprep.subr.bf16.mxu0 %v8960_v59  ;;  %3632 = vmatprep.subr.bf16.mxu1 %v8965_v61 }
 0x39f   :  { %3592 = vmatpush1.bf16.msra.mxu0 %v8970_v62  ;;  %3633 = vmatpush1.bf16.msra.mxu1 %v8975_v63 }
 0x3a0   :  { %3593 = vmatprep.subr.bf16.mxu0 %v8984_v0  ;;  %3634 = vmatprep.subr.bf16.mxu1 %v8989_v2 }
 0x3a3   :  { %3594 = vmatpush1.bf16.msra.mxu0 %v8994_v3  ;;  %3635 = vmatpush1.bf16.msra.mxu1 %v8999_v5 }
 0x3a4   :  { %3595 = vmatprep.subr.bf16.mxu0 %v9008_v41  ;;  %3636 = vmatprep.subr.bf16.mxu1 %v9013_v42 }
 0x3a7   :  { %3596 = vmatpush1.bf16.msra.mxu0 %v9018_v43  ;;  %3637 = vmatpush1.bf16.msra.mxu1 %v9023_v44 }
 0x3a8   :  { %3597 = vmatprep.subr.bf16.mxu0 %v9032_v45  ;;  %3638 = vmatprep.subr.bf16.mxu1 %v9037_v46 }
 0x3ab   :  { %3598 = vmatpush1.bf16.msra.mxu0 %v9042_v1  ;;  %3639 = vmatpush1.bf16.msra.mxu1 %v9047_v9 }
 0x3ac   :  { %3599 = vmatprep.subr.bf16.mxu0 %v9056_v51  ;;  %3640 = vmatprep.subr.bf16.mxu1 %v9061_v8 }
 0x3af   :  { %3600 = vmatpush1.bf16.msra.mxu0 %v9066_v39  ;;  %3641 = vmatpush1.bf16.msra.mxu1 %v9071_v36 }
 0x3b0   :  { %3868 = vmatprep.subr.bf16.mxu0 %v9080_v32  ;;  %3909 = vmatprep.subr.bf16.mxu1 %v9085_v34 }
 0x444   :  { %v2983_v12 = vpop.f32.mrb[56].mxu0  ;;  %v3024_v15 = vpop.f32.mrb[56].mxu1 }
 0x445   :  { %v3031_v14 = vadd.f32 %v2983_v12, %v10166_v30  ;;  %v3033_v49 = vadd.f32 %v3024_v15, %v10167_v20  ;;  %v2985_v47 = vpop.f32.mrb[57].mxu0  ;;  %v3026_v53 = vpop.f32.mrb[57].mxu1 }
 0x446   :  { %v3032_v25 = vadd.f32 %v2985_v47, %v10168_v23  ;;  %v3034_v55 = vadd.f32 %v3026_v53, %v10169_v24  ;;  %v2987_v21 = vpop.f32.mrb[58].mxu0  ;;  %v3028_v13 = vpop.f32.mrb[58].mxu1 }
 0x447   :  { %v6243_v17 = vmul.f32 -1.442695, %v3031_v14  ;;  %v2988_v19 = vpop.f32.mrb[59].mxu0  ;;  %v3029_v7 = vpop.f32.mrb[59].mxu1 }
 0x448   :  { %v6244_v6 = vmul.f32 -1.442695, %v3032_v25  ;;  %v6245_v38 = vmul.f32 -1.442695, %v3034_v55  ;;  %v9093_v23 = vpop.permute.xlu0 %3370 }
 0x449   :  { %7121 = vpow2.f32 %v6243_v17  ;;  %10170 = vst [vmem:[#allocation4_spill] sm:$0xff] %v9093_v23  ;;  %vm3372_vm0 = vcmp.eq.s32.totalorder %v9093_v23, 1  ;;  %v10172_v17 = vld [vmem:[#allocation45_spill] sm:$0xff]  ;;  %v9220_v23 = vld [vmem:[%s10013_s6 + $0x80] ss:$16 sps:$4 sm:$0xff]  }
 0x44a   :  { %7123 = vpow2.f32 %v6244_v6  ;;  %10176 = vst [vmem:[#allocation6_spill] sm:$0xff] %v9220_v23 }
 0x44b   :  { %7125 = vpow2.f32 %v6245_v38  ;;  %v10173_v38 = vld [vmem:[#allocation46_spill] sm:$0xff] }
 0x44c   :  { %7127 = vtanh.f32 %v3033_v49  ;;  %v10171_v49 = vld [vmem:[#allocation44_spill] sm:$0xff] }
 0x453   :  { %v7122_v40 = vpop.eup %7121 }
 0x454   :  { %v7124_v35 = vpop.eup %7123  ;;  %v3321_v52 = vadd.f32 1.0, %v7122_v40 }
 0x455   :  { %v3327_v12 = vadd.f32 1.0, %v7124_v35  ;;  %v7126_v15 = vpop.eup %7125  ;;  %v10174_v35 = vld [vmem:[#allocation47_spill] sm:$0xff] }
 0x456   :  { %7129 = vrcp.f32 %v3321_v52  ;;  %v7128_v30 = vpop.eup %7127  ;;  %v3334_v14 = vadd.f32 1.0, %v7126_v15 }
 0x457   :  { %7131 = vrcp.f32 %v3327_v12 }
 0x458   :  { %7133 = vrcp.f32 %v3334_v14 }
 0x460   :  { %v7130_v20 = vpop.eup %7129 }
 0x461   :  { %v7132_v47 = vpop.eup %7131  ;;  %v3338_v53 = vmul.f32 %v7130_v20, %v7128_v30 }
 0x462   :  { %v3337_v25 = vmul.f32 %v7132_v47, %v8816_v4 }
 0x464   :  { %v3339_v24 = vadd.f32 %v3338_v53, %v3337_v25  ;;  %v3266_v55 = vpop.f32.mrb[60].mxu0  ;;  %v3307_v21 = vpop.f32.mrb[60].mxu1 }
 0x465   :  { %v3314_v13 = vadd.f32 %v3266_v55, %v10171_v49  ;;  %v3316_v19 = vadd.f32 %v3307_v21, %v10172_v17  ;;  %v3268_v7 = vpop.f32.mrb[61].mxu0  ;;  %v3309_v6 = vpop.f32.mrb[61].mxu1 }
 0x466   :  { %7135 = vtanh.f32 %v3339_v24  ;;  %v3315_v40 = vadd.f32 %v3268_v7, %v10173_v38  ;;  %v3317_v52 = vadd.f32 %v3309_v6, %v10174_v35  ;;  %v3270_v12 = vpop.f32.mrb[62].mxu0  ;;  %v3311_v15 = vpop.f32.mrb[62].mxu1  ;;  %v9104_v30 = vsel %vm3372_vm0, %v3339_v24, %v8816_v4  ;;  %v9116_v24 = vld [vmem:[%s10013_s6] ss:$16 sps:$4 sm:$0xff]   ;;  %v9136_v35 = vld [vmem:[%s10013_s6 + $0x2c] ss:$16 sps:$4 sm:$0xff]  }
 0x467   :  { %v6246_v20 = vmul.f32 -1.442695, %v3314_v13  ;;  %v3271_v47 = vpop.f32.mrb[63].mxu0  ;;  %v3312_v53 = vpop.f32.mrb[63].mxu1  ;;  %v9121_v13 = vld [vmem:[%s10013_s6 + $0x8] ss:$16 sps:$4 sm:$0xff]  }
 0x468   :  { %v6247_v14 = vmul.f32 -1.442695, %v3315_v40  ;;  %v7134_v25 = vpop.eup %7133  ;;  %v6248_v21 = vmul.f32 -1.442695, %v3317_v52  ;;  %v9131_v40 = vld [vmem:[%s10013_s6 + $0x24] ss:$16 sps:$4 sm:$0xff]  }
 0x469   :  { %7137 = vpow2.f32 %v6246_v20  ;;  %v9143_v12 = vld [vmem:[%s10013_s6 + $0x20] ss:$16 sps:$4 sm:$0xff]   ;;  %v9148_v15 = vld [vmem:[%s10013_s6 + $0x28] ss:$16 sps:$4 sm:$0xff]   ;;  %v9160_v20 = vld [vmem:[%s10013_s6 + $0x4c] ss:$16 sps:$4 sm:$0xff]  }
 0x46a   :  { %7139 = vpow2.f32 %v6247_v14  ;;  %v9169_v47 = vld [vmem:[%s10013_s6 + $0x40] ss:$16 sps:$4 sm:$0xff]   ;;  %v9174_v53 = vld [vmem:[%s10013_s6 + $0x48] ss:$16 sps:$4 sm:$0xff]   ;;  %v9181_v14 = vld [vmem:[%s10013_s6 + $0x64] ss:$16 sps:$4 sm:$0xff]  }
 0x46b   :  { %7141 = vpow2.f32 %v6248_v21 }
 0x46c   :  { %7143 = vtanh.f32 %v3316_v19  ;;  %v9155_v19 = vld [vmem:[%s10013_s6 + $0x44] ss:$16 sps:$4 sm:$0xff]  }
 0x470   :  { %v7136_v55 = vpop.eup %7135 }
 0x471   :  { %v3341_v49 = vmul.f32 %v7136_v55, %v7134_v25  ;;  %v9186_v25 = vld [vmem:[%s10013_s6 + $0x6c] ss:$16 sps:$4 sm:$0xff]  }
 0x472   :  { %10175 = vst [vmem:[#allocation5_spill] sm:$0xff] %v9186_v25 }
 0x473   :  { %v7138_v17 = vpop.eup %7137  ;;  %v9109_v7 = vsel %vm3372_vm0, %v3341_v49, %v8821_v37  ;;  %v3382_v4 = vsel %vm3372_vm0, %v3341_v49, 0.0  ;;  %v9193_v49 = vld [vmem:[%s10013_s6 + $0x60] ss:$16 sps:$4 sm:$0xff]  }
 0x474   :  { %v7140_v6 = vpop.eup %7139  ;;  %v3345_v38 = vadd.f32 1.0, %v7138_v17  ;;  %6249 = vst [vmem:[%s10017_s8 + $0x30] sm:$0xff] %v3382_v4  ;;  %v3392_v37 = vpack.c.bf16 %v9109_v7, %v9109_v7  ;;  %v9198_v17 = vld [vmem:[%s10013_s6 + $0x68] ss:$16 sps:$4 sm:$0xff]  }
 0x475   :  { %v3351_v52 = vadd.f32 1.0, %v7140_v6  ;;  %v7142_v55 = vpop.eup %7141  ;;  %v9205_v6 = vld [vmem:[%s10013_s6 + $0x84] ss:$16 sps:$4 sm:$0xff]  }
 0x476   :  { %7145 = vrcp.f32 %v3345_v38  ;;  %3618 = vmatmul.mubr.bf16.vlgmr.msra.gmra.mrb[64].mxu0 %v3392_v37  ;;  %3659 = vmatmul.mubr.bf16.vlgmr.msra.gmra.mrb[64].mxu1 %v3392_v37  ;;  %v7144_v21 = vpop.eup %7143  ;;  %v9210_v38 = vld [vmem:[%s10013_s6 + $0x8c] ss:$16 sps:$4 sm:$0xff]   ;;  %v3358_v27 = vadd.f32 1.0, %v7142_v55  ;;  %v9232_v55 = vld [vmem:[%s10013_s6 + $0xa4] ss:$16 sps:$4 sm:$0xff]  }
 0x477   :  { %7147 = vrcp.f32 %v3351_v52  ;;  %3869 = vmatpush1.bf16.msra.mxu0 %v9116_v24  ;;  %3910 = vmatpush1.bf16.msra.mxu1 %v9121_v13  ;;  %10178 = vst [vmem:[#allocation48_spill] sm:$0xff] %v9232_v55 }
 0x478   :  { %3870 = vmatprep.subr.bf16.mxu0 %v9131_v40  ;;  %3911 = vmatprep.subr.bf16.mxu1 %v9136_v35  ;;  %7149 = vrcp.f32 %v3358_v27  ;;  %v9262_v27 = vld [vmem:[%s10013_s6 + $0xc4] ss:$16 sps:$4 sm:$0xff]  }
 0x479   :  { %3900 = vmatprep.mubr.bf16.mxu0 %v10099_v11  ;;  %3941 = vmatprep.mubr.bf16.mxu1 %v10099_v11  ;;  %10182 = vst [vmem:[#allocation57_spill] sm:$0xff] %v9262_v27 }
 0x47b   :  { %3871 = vmatpush1.bf16.msra.mxu0 %v9143_v12  ;;  %3912 = vmatpush1.bf16.msra.mxu1 %v9148_v15 }
 0x47c   :  { %3872 = vmatprep.subr.bf16.mxu0 %v9155_v19  ;;  %3913 = vmatprep.subr.bf16.mxu1 %v9160_v20 }
 0x47f   :  { %3873 = vmatpush1.bf16.msra.mxu0 %v9169_v47  ;;  %3914 = vmatpush1.bf16.msra.mxu1 %v9174_v53 }
 0x480   :  { %v7146_v4 = vpop.eup %7145  ;;  %3874 = vmatprep.subr.bf16.mxu0 %v9181_v14  ;;  %3915 = vmatprep.subr.bf16.mxu1 %v9186_v25  ;;  %v9225_v25 = vld [vmem:[%s10013_s6 + $0x88] ss:$16 sps:$4 sm:$0xff]  }
 0x481   :  { %v7148_v37 = vpop.eup %7147  ;;  %v3362_v52 = vmul.f32 %v7146_v4, %v7144_v21  ;;  %10177 = vst [vmem:[#allocation7_spill] sm:$0xff] %v9225_v25  ;;  %v9237_v4 = vld [vmem:[%s10013_s6 + $0xac] ss:$16 sps:$4 sm:$0xff]  }
 0x482   :  { %v3361_v16 = vmul.f32 %v7148_v37, %v8855_v54  ;;  %10179 = vst [vmem:[#allocation49_spill] sm:$0xff] %v9237_v4  ;;  %v9250_v37 = vld [vmem:[%s10013_s6 + $0xa0] ss:$16 sps:$4 sm:$0xff]  }
 0x483   :  { %3875 = vmatpush1.bf16.msra.mxu0 %v9193_v49  ;;  %3916 = vmatpush1.bf16.msra.mxu1 %v9198_v17  ;;  %10180 = vst [vmem:[#allocation50_spill] sm:$0xff] %v9250_v37 }
 0x484   :  { %v3363_v21 = vadd.f32 %v3362_v52, %v3361_v16  ;;  %3876 = vmatprep.subr.bf16.mxu0 %v9205_v6  ;;  %3917 = vmatprep.subr.bf16.mxu1 %v9210_v38  ;;  %v9255_v52 = vld [vmem:[%s10013_s6 + $0xa8] ss:$16 sps:$4 sm:$0xff]  }
 0x485   :  { %10181 = vst [vmem:[#allocation51_spill] sm:$0xff] %v9255_v52 }
 0x486   :  { %7151 = vtanh.f32 %v3363_v21  ;;  %v9243_v16 = vsel %vm3379_vm1, %v3363_v21, %v8855_v54  ;;  %v9267_v54 = vld [vmem:[%s10013_s6 + $0xcc] ss:$16 sps:$4 sm:$0xff]   ;;  %v9274_v21 = vld [vmem:[%s10013_s6 + $0xc0] ss:$16 sps:$4 sm:$0xff]  }
 0x487   :  { %3877 = vmatpush1.bf16.msra.mxu0 %v9220_v23  ;;  %3918 = vmatpush1.bf16.msra.mxu1 %v9225_v25  ;;  %10183 = vst [vmem:[#allocation59_spill] sm:$0xff] %v9267_v54  ;;  %10184 = vst [vmem:[#allocation60_spill] sm:$0xff] %v9274_v21 }
 0x488   :  { %3878 = vmatprep.subr.bf16.mxu0 %v9232_v55  ;;  %3919 = vmatprep.subr.bf16.mxu1 %v9237_v4  ;;  %v9279_v4 = vld [vmem:[%s10013_s6 + $0xc8] ss:$16 sps:$4 sm:$0xff]   ;;  %v7150_v55 = vpop.eup %7149 }
 0x489   :  { %10185 = vst [vmem:[#allocation61_spill] sm:$0xff] %v9279_v4 }
 0x48b   :  { %3879 = vmatpush1.bf16.msra.mxu0 %v9250_v37  ;;  %3920 = vmatpush1.bf16.msra.mxu1 %v9255_v52  ;;  %v9286_v37 = vld [vmem:[%s10013_s6 + $0xe4] ss:$16 sps:$4 sm:$0xff]   ;;  %v9291_v52 = vld [vmem:[%s10013_s6 + $0xec] ss:$16 sps:$4 sm:$0xff]  }
 0x48c   :  { %3880 = vmatprep.subr.bf16.mxu0 %v9262_v27  ;;  %3921 = vmatprep.subr.bf16.mxu1 %v9267_v54  ;;  %10186 = vst [vmem:[#allocation62_spill] sm:$0xff] %v9291_v52  ;;  %v9298_v27 = vld [vmem:[%s10013_s6 + $0xe0] ss:$16 sps:$4 sm:$0xff]   ;;  %v9303_v54 = vld [vmem:[%s10013_s6 + $0xe8] ss:$16 sps:$4 sm:$0xff]  }
 0x48f   :  { %3881 = vmatpush1.bf16.msra.mxu0 %v9274_v21  ;;  %3922 = vmatpush1.bf16.msra.mxu1 %v9279_v4 }
 0x490   :  { %v7152_v25 = vpop.eup %7151  ;;  %3882 = vmatprep.subr.bf16.mxu0 %v9286_v37  ;;  %3923 = vmatprep.subr.bf16.mxu1 %v9291_v52 }
 0x491   :  { %v3365_v23 = vmul.f32 %v7152_v25, %v7150_v55 }
 0x493   :  { %3883 = vmatpush1.bf16.msra.mxu0 %v9298_v27  ;;  %3924 = vmatpush1.bf16.msra.mxu1 %v9303_v54  ;;  %v9312_v4 = vsel %vm3379_vm1, %v3365_v23, %v8874_v50  ;;  %v3385_v21 = vsel %vm3379_vm1, %v3365_v23, 0.0  ;;  %v10192_v23 = vld [vmem:[#allocation41_spill] sm:$0xff] }
 0x494   :  { %6250 = vst [vmem:[%s10017_s8 + $0x48] sm:$0xff] %v3385_v21  ;;  %v3675_v52 = vpack.c.bf16 %v9312_v4, %v9312_v4  ;;  %4207 = vmatprep.subr.bf16.mxu0 %v8888_v31  ;;  %4248 = vmatprep.subr.bf16.mxu1 %v8893_v60  ;;  %v10187_v60 = vld [vmem:[#allocation12_spill] sm:$0xff]  ;;  %v10193_v21 = vld [vmem:[#allocation42_spill] sm:$0xff] }
 0x496   :  { %3901 = vmatmul.mubr.bf16.vlgmr.msra.gmra.mrb[68].mxu0 %v3675_v52  ;;  %3942 = vmatmul.mubr.bf16.vlgmr.msra.gmra.mrb[68].mxu1 %v3675_v52 }
 0x497   :  { %4208 = vmatpush1.bf16.msra.mxu0 %v8898_v48  ;;  %4249 = vmatpush1.bf16.msra.mxu1 %v8903_v33  ;;  %v10188_v33 = vld [vmem:[#allocation13_spill] sm:$0xff] }
 0x498   :  { %4209 = vmatprep.subr.bf16.mxu0 %v8912_v10  ;;  %4250 = vmatprep.subr.bf16.mxu1 %v8917_v28 }
 0x499   :  { %4239 = vmatprep.mubr.bf16.mxu0 %v10099_v11  ;;  %4280 = vmatprep.mubr.bf16.mxu1 %v10099_v11 }
 0x49b   :  { %4210 = vmatpush1.bf16.msra.mxu0 %v8922_v22  ;;  %4251 = vmatpush1.bf16.msra.mxu1 %v8927_v29  ;;  %v10189_v29 = vld [vmem:[#allocation14_spill] sm:$0xff] }
 0x49c   :  { %4211 = vmatprep.subr.bf16.mxu0 %v8936_v18  ;;  %4252 = vmatprep.subr.bf16.mxu1 %v8941_v56  ;;  %v10190_v56 = vld [vmem:[#allocation15_spill] sm:$0xff] }
 0x49f   :  { %4212 = vmatpush1.bf16.msra.mxu0 %v8946_v57  ;;  %4253 = vmatpush1.bf16.msra.mxu1 %v8951_v58 }
 0x4a0   :  { %4213 = vmatprep.subr.bf16.mxu0 %v8960_v59  ;;  %4254 = vmatprep.subr.bf16.mxu1 %v8965_v61 }
 0x4a3   :  { %4214 = vmatpush1.bf16.msra.mxu0 %v8970_v62  ;;  %4255 = vmatpush1.bf16.msra.mxu1 %v8975_v63 }
 0x4a4   :  { %4215 = vmatprep.subr.bf16.mxu0 %v8984_v0  ;;  %4256 = vmatprep.subr.bf16.mxu1 %v8989_v2 }
 0x4a7   :  { %4216 = vmatpush1.bf16.msra.mxu0 %v8994_v3  ;;  %4257 = vmatpush1.bf16.msra.mxu1 %v8999_v5 }
 0x4a8   :  { %4217 = vmatprep.subr.bf16.mxu0 %v9008_v41  ;;  %4258 = vmatprep.subr.bf16.mxu1 %v9013_v42 }
 0x4ab   :  { %4218 = vmatpush1.bf16.msra.mxu0 %v9018_v43  ;;  %4259 = vmatpush1.bf16.msra.mxu1 %v9023_v44 }
 0x4ac   :  { %4219 = vmatprep.subr.bf16.mxu0 %v9032_v45  ;;  %4260 = vmatprep.subr.bf16.mxu1 %v9037_v46 }
 0x4af   :  { %4220 = vmatpush1.bf16.msra.mxu0 %v9042_v1  ;;  %4261 = vmatpush1.bf16.msra.mxu1 %v9047_v9 }
 0x4b0   :  { %4221 = vmatprep.subr.bf16.mxu0 %v9056_v51  ;;  %4262 = vmatprep.subr.bf16.mxu1 %v9061_v8 }
 0x4b3   :  { %4222 = vmatpush1.bf16.msra.mxu0 %v9066_v39  ;;  %4263 = vmatpush1.bf16.msra.mxu1 %v9071_v36 }
 0x4b4   :  { %4490 = vmatprep.subr.bf16.mxu0 %v9080_v32  ;;  %4531 = vmatprep.subr.bf16.mxu1 %v9085_v34  ;;  %v10191_v32 = vld [vmem:[#allocation40_spill] sm:$0xff] }
 0x549   :  { %v3619_v50 = vpop.f32.mrb[64].mxu0  ;;  %v3660_v31 = vpop.f32.mrb[64].mxu1 }
 0x54a   :  { %v3667_v48 = vadd.f32 %v3619_v50, %v10187_v60  ;;  %v3669_v10 = vadd.f32 %v3660_v31, %v10188_v33  ;;  %v3621_v28 = vpop.f32.mrb[65].mxu0  ;;  %v3662_v22 = vpop.f32.mrb[65].mxu1  ;;  %v10194_v31 = vld [vmem:[#allocation43_spill] sm:$0xff] }
 0x54b   :  { %v3668_v18 = vadd.f32 %v3621_v28, %v10189_v29  ;;  %v3670_v57 = vadd.f32 %v3662_v22, %v10190_v56  ;;  %v3623_v58 = vpop.f32.mrb[66].mxu0  ;;  %v3664_v59 = vpop.f32.mrb[66].mxu1 }
 0x54c   :  { %v6315_v61 = vmul.f32 -1.442695, %v3667_v48  ;;  %v3624_v62 = vpop.f32.mrb[67].mxu0  ;;  %v3665_v63 = vpop.f32.mrb[67].mxu1 }
 0x54d   :  { %v6316_v0 = vmul.f32 -1.442695, %v3668_v18  ;;  %v6317_v2 = vmul.f32 -1.442695, %v3670_v57 }
 0x54e   :  { %7153 = vpow2.f32 %v6315_v61 }
 0x54f   :  { %7155 = vpow2.f32 %v6316_v0 }
 0x550   :  { %7157 = vpow2.f32 %v6317_v2 }
 0x551   :  { %7159 = vtanh.f32 %v3669_v10 }
 0x558   :  { %v7154_v3 = vpop.eup %7153 }
 0x559   :  { %v7156_v5 = vpop.eup %7155  ;;  %v3957_v41 = vadd.f32 1.0, %v7154_v3 }
 0x55a   :  { %v3963_v42 = vadd.f32 1.0, %v7156_v5  ;;  %v7158_v43 = vpop.eup %7157  ;;  %v10199_v5 = vld [vmem:[#allocation48_spill] sm:$0xff] }
 0x55b   :  { %7161 = vrcp.f32 %v3957_v41  ;;  %v7160_v44 = vpop.eup %7159  ;;  %v3970_v9 = vadd.f32 1.0, %v7158_v43  ;;  %v10204_v41 = vld [vmem:[#allocation59_spill] sm:$0xff]  ;;  %v10205_v43 = vld [vmem:[#allocation60_spill] sm:$0xff] }
 0x55c   :  { %7163 = vrcp.f32 %v3963_v42 }
 0x55d   :  { %7165 = vrcp.f32 %v3970_v9 }
 0x565   :  { %v7162_v45 = vpop.eup %7161 }
 0x566   :  { %v7164_v46 = vpop.eup %7163  ;;  %v3974_v1 = vmul.f32 %v7162_v45, %v7160_v44  ;;  %v10207_v45 = vld [vmem:[#allocation62_spill] sm:$0xff] }
 0x567   :  { %v3973_v51 = vmul.f32 %v7164_v46, %v9104_v30  ;;  %v7166_v56 = vpop.eup %7165 }
 0x569   :  { %v3975_v8 = vadd.f32 %v3974_v1, %v3973_v51  ;;  %v3902_v39 = vpop.f32.mrb[68].mxu0  ;;  %v3943_v36 = vpop.f32.mrb[68].mxu1  ;;  %v9453_v51 = vld [vmem:[%s10012_s3 + $0x8] ss:$16 sps:$4 sm:$0xff]  }
 0x56a   :  { %v3950_v34 = vadd.f32 %v3902_v39, %v10191_v32  ;;  %v3952_v25 = vadd.f32 %v3943_v36, %v10192_v23  ;;  %v3904_v55 = vpop.f32.mrb[69].mxu0  ;;  %v3945_v52 = vpop.f32.mrb[69].mxu1  ;;  %v9467_v39 = vld [vmem:[%s10012_s3 + $0x2c] ss:$16 sps:$4 sm:$0xff]   ;;  %v9472_v36 = vld [vmem:[%s10012_s3 + $0x20] ss:$16 sps:$4 sm:$0xff]  }
 0x56b   :  { %7167 = vtanh.f32 %v3975_v8  ;;  %v3951_v50 = vadd.f32 %v3904_v55, %v10193_v21  ;;  %v3953_v60 = vadd.f32 %v3945_v52, %v10194_v31  ;;  %v3906_v48 = vpop.f32.mrb[70].mxu0  ;;  %v3947_v33 = vpop.f32.mrb[70].mxu1  ;;  %v9369_v10 = vsel %vm3379_vm1, %v3975_v8, %v9104_v30  ;;  %v9462_v8 = vld [vmem:[%s10012_s3 + $0x24] ss:$16 sps:$4 sm:$0xff]   ;;  %v9477_v32 = vld [vmem:[%s10012_s3 + $0x28] ss:$16 sps:$4 sm:$0xff]  }
 0x56c   :  { %v6318_v28 = vmul.f32 -1.442695, %v3950_v34  ;;  %v3907_v22 = vpop.f32.mrb[71].mxu0  ;;  %v3948_v29 = vpop.f32.mrb[71].mxu1  ;;  %v9486_v34 = vld [vmem:[%s10012_s3 + $0x44] ss:$16 sps:$4 sm:$0xff]  }
 0x56d   :  { %v6319_v18 = vmul.f32 -1.442695, %v3951_v50  ;;  %v6320_v58 = vmul.f32 -1.442695, %v3953_v60  ;;  %v9491_v23 = vld [vmem:[%s10012_s3 + $0x4c] ss:$16 sps:$4 sm:$0xff]  }
 0x56e   :  { %7169 = vpow2.f32 %v6318_v28  ;;  %v9501_v55 = vld [vmem:[%s10012_s3 + $0x48] ss:$16 sps:$4 sm:$0xff]   ;;  %v9510_v52 = vld [vmem:[%s10012_s3 + $0x64] ss:$16 sps:$4 sm:$0xff]   ;;  %v9515_v21 = vld [vmem:[%s10012_s3 + $0x6c] ss:$16 sps:$4 sm:$0xff]  }
 0x56f   :  { %7171 = vpow2.f32 %v6319_v18  ;;  %v9520_v50 = vld [vmem:[%s10012_s3 + $0x60] ss:$16 sps:$4 sm:$0xff]   ;;  %v9525_v31 = vld [vmem:[%s10012_s3 + $0x68] ss:$16 sps:$4 sm:$0xff]   ;;  %v9534_v60 = vld [vmem:[%s10012_s3 + $0x84] ss:$16 sps:$4 sm:$0xff]  }
 0x570   :  { %7173 = vpow2.f32 %v6320_v58  ;;  %v9539_v48 = vld [vmem:[%s10012_s3 + $0x8c] ss:$16 sps:$4 sm:$0xff]   ;;  %v9544_v33 = vld [vmem:[%s10012_s3 + $0x80] ss:$16 sps:$4 sm:$0xff]   ;;  %v9549_v28 = vld [vmem:[%s10012_s3 + $0x88] ss:$16 sps:$4 sm:$0xff]  }
 0x571   :  { %7175 = vtanh.f32 %v3952_v25  ;;  %v9496_v25 = vld [vmem:[%s10012_s3 + $0x40] ss:$16 sps:$4 sm:$0xff]   ;;  %v9558_v22 = vld [vmem:[%s10012_s3 + $0xa4] ss:$16 sps:$4 sm:$0xff]   ;;  %v9563_v29 = vld [vmem:[%s10012_s3 + $0xac] ss:$16 sps:$4 sm:$0xff]  }
 0x572   :  { %v9568_v18 = vld [vmem:[%s10012_s3 + $0xa0] ss:$16 sps:$4 sm:$0xff]   ;;  %v9587_v58 = vld [vmem:[%s10012_s3 + $0xcc] ss:$16 sps:$4 sm:$0xff]  }
 0x575   :  { %v7168_v57 = vpop.eup %7167 }
 0x576   :  { %v3977_v59 = vmul.f32 %v7168_v57, %v7166_v56  ;;  %v9573_v56 = vld [vmem:[%s10012_s3 + $0xa8] ss:$16 sps:$4 sm:$0xff]   ;;  %v9582_v57 = vld [vmem:[%s10012_s3 + $0xc4] ss:$16 sps:$4 sm:$0xff]  }
 0x578   :  { %v7170_v61 = vpop.eup %7169  ;;  %v9374_v62 = vsel %vm3379_vm1, %v3977_v59, %v9109_v7  ;;  %v4006_v30 = vsel %vm3379_vm1, %v3977_v59, 0.0  ;;  %v9592_v59 = vld [vmem:[%s10012_s3 + $0xc0] ss:$16 sps:$4 sm:$0xff]  }
 0x579   :  { %v7172_v63 = vpop.eup %7171  ;;  %v3981_v0 = vadd.f32 1.0, %v7170_v61  ;;  %6321 = vst [vmem:[%s10017_s8 + $0x40] sm:$0xff] %v4006_v30  ;;  %v4014_v2 = vpack.c.bf16 %v9374_v62, %v9374_v62  ;;  %v9597_v61 = vld [vmem:[%s10012_s3 + $0xc8] ss:$16 sps:$4 sm:$0xff]   ;;  %v9606_v30 = vld [vmem:[%s10012_s3 + $0xe4] ss:$16 sps:$4 sm:$0xff]  }
 0x57a   :  { %v3987_v3 = vadd.f32 1.0, %v7172_v63  ;;  %v7174_v26 = vpop.eup %7173  ;;  %v9611_v63 = vld [vmem:[%s10012_s3 + $0xec] ss:$16 sps:$4 sm:$0xff]  }
 0x57b   :  { %7177 = vrcp.f32 %v3981_v0  ;;  %4240 = vmatmul.mubr.bf16.vlgmr.msra.gmra.mrb[72].mxu0 %v4014_v2  ;;  %4281 = vmatmul.mubr.bf16.vlgmr.msra.gmra.mrb[72].mxu1 %v4014_v2  ;;  %v7176_v7 = vpop.eup %7175  ;;  %v9616_v0 = vld [vmem:[%s10012_s3 + $0xe0] ss:$16 sps:$4 sm:$0xff]   ;;  %v9621_v2 = vld [vmem:[%s10012_s3 + $0xe8] ss:$16 sps:$4 sm:$0xff]  }
 0x57c   :  { %7179 = vrcp.f32 %v3987_v3  ;;  %4491 = vmatpush1.bf16.msra.mxu0 %v9116_v24  ;;  %4532 = vmatpush1.bf16.msra.mxu1 %v9121_v13  ;;  %v10195_v13 = vld [vmem:[#allocation5_spill] sm:$0xff]  ;;  %v9630_v3 = vld [vmem:[%s10013_s6 + $0x4] ss:$16 sps:$4 sm:$0xff]  }
 0x57d   :  { %4492 = vmatprep.subr.bf16.mxu0 %v9131_v40  ;;  %4533 = vmatprep.subr.bf16.mxu1 %v9136_v35 }
 0x57e   :  { %4522 = vmatprep.mubr.bf16.mxu0 %v10099_v11  ;;  %4563 = vmatprep.mubr.bf16.mxu1 %v10099_v11 }
 0x580   :  { %4493 = vmatpush1.bf16.msra.mxu0 %v9143_v12  ;;  %4534 = vmatpush1.bf16.msra.mxu1 %v9148_v15  ;;  %v3994_v12 = vadd.f32 1.0, %v7174_v26  ;;  %v9635_v26 = vld [vmem:[%s10013_s6 + $0xc] ss:$16 sps:$4 sm:$0xff]  }
 0x581   :  { %4494 = vmatprep.subr.bf16.mxu0 %v9155_v19  ;;  %4535 = vmatprep.subr.bf16.mxu1 %v9160_v20  ;;  %v10210_v20 = vld [vmem:[#allocation18_spill] sm:$0xff] }
 0x582   :  { %7181 = vrcp.f32 %v3994_v12 }
 0x584   :  { %4495 = vmatpush1.bf16.msra.mxu0 %v9169_v47  ;;  %4536 = vmatpush1.bf16.msra.mxu1 %v9174_v53  ;;  %v10197_v53 = vld [vmem:[#allocation6_spill] sm:$0xff] }
 0x585   :  { %v7178_v24 = vpop.eup %7177  ;;  %4496 = vmatprep.subr.bf16.mxu0 %v9181_v14  ;;  %4537 = vmatprep.subr.bf16.mxu1 %v10195_v13  ;;  %v10198_v14 = vld [vmem:[#allocation7_spill] sm:$0xff]  ;;  %v10208_v13 = vld [vmem:[#allocation16_spill] sm:$0xff] }
 0x586   :  { %v7180_v40 = vpop.eup %7179  ;;  %v3998_v35 = vmul.f32 %v7178_v24, %v7176_v7 }
 0x587   :  { %v3997_v15 = vmul.f32 %v7180_v40, %v9243_v16 }
 0x588   :  { %4497 = vmatpush1.bf16.msra.mxu0 %v9193_v49  ;;  %4538 = vmatpush1.bf16.msra.mxu1 %v9198_v17  ;;  %v10200_v49 = vld [vmem:[#allocation49_spill] sm:$0xff]  ;;  %v10201_v17 = vld [vmem:[#allocation50_spill] sm:$0xff] }
 0x589   :  { %v3999_v19 = vadd.f32 %v3998_v35, %v3997_v15  ;;  %4498 = vmatprep.subr.bf16.mxu0 %v9205_v6  ;;  %4539 = vmatprep.subr.bf16.mxu1 %v9210_v38  ;;  %v10202_v6 = vld [vmem:[#allocation51_spill] sm:$0xff]  ;;  %v10203_v38 = vld [vmem:[#allocation57_spill] sm:$0xff] }
 0x58a   :  { %v10209_v35 = vld [vmem:[#allocation17_spill] sm:$0xff] }
 0x58b   :  { %7183 = vtanh.f32 %v3999_v19  ;;  %v9405_v47 = vsel %vm3372_vm0, %v3999_v19, %v9243_v16  ;;  %v10206_v16 = vld [vmem:[#allocation61_spill] sm:$0xff] }
 0x58c   :  { %4499 = vmatpush1.bf16.msra.mxu0 %v10197_v53  ;;  %4540 = vmatpush1.bf16.msra.mxu1 %v10198_v14  ;;  %v7182_v42 = vpop.eup %7181  ;;  %v10211_v14 = vld [vmem:[#allocation19_spill] sm:$0xff] }
 0x58d   :  { %4500 = vmatprep.subr.bf16.mxu0 %v10199_v5  ;;  %4541 = vmatprep.subr.bf16.mxu1 %v10200_v49 }
 0x590   :  { %4501 = vmatpush1.bf16.msra.mxu0 %v10201_v17  ;;  %4542 = vmatpush1.bf16.msra.mxu1 %v10202_v6 }
 0x591   :  { %4502 = vmatprep.subr.bf16.mxu0 %v10203_v38  ;;  %4543 = vmatprep.subr.bf16.mxu1 %v10204_v41 }
 0x594   :  { %4503 = vmatpush1.bf16.msra.mxu0 %v10205_v43  ;;  %4544 = vmatpush1.bf16.msra.mxu1 %v10206_v16 }
 0x595   :  { %v7184_v44 = vpop.eup %7183  ;;  %4504 = vmatprep.subr.bf16.mxu0 %v9286_v37  ;;  %4545 = vmatprep.subr.bf16.mxu1 %v10207_v45 }
 0x596   :  { %v4001_v46 = vmul.f32 %v7184_v44, %v7182_v42 }
 0x598   :  { %4505 = vmatpush1.bf16.msra.mxu0 %v9298_v27  ;;  %4546 = vmatpush1.bf16.msra.mxu1 %v9303_v54  ;;  %v9424_v1 = vsel %vm3372_vm0, %v4001_v46, %v9312_v4  ;;  %v4008_v9 = vsel %vm3372_vm0, %v4001_v46, 0.0  ;;  %v9438_v4 = vld [vmem:[%s10012_s3 + $0x4] ss:$16 sps:$4 sm:$0xff]   ;;  %v9443_v27 = vld [vmem:[%s10012_s3 + $0xc] ss:$16 sps:$4 sm:$0xff]  }
 0x599   :  { %6322 = vst [vmem:[%s10017_s8 + $0x38] sm:$0xff] %v4008_v9  ;;  %v4297_v37 = vpack.c.bf16 %v9424_v1, %v9424_v1  ;;  %v9448_v54 = vld [vmem:[%s10012_s3] ss:$16 sps:$4 sm:$0xff]   ;;  %4829 = vmatprep.subr.bf16.mxu0 %v9438_v4  ;;  %4870 = vmatprep.subr.bf16.mxu1 %v9443_v27 }
 0x59b   :  { %4523 = vmatmul.mubr.bf16.vlgmr.msra.gmra.mrb[76].mxu0 %v4297_v37  ;;  %4564 = vmatmul.mubr.bf16.vlgmr.msra.gmra.mrb[76].mxu1 %v4297_v37 }
 0x59c   :  { %4861 = vmatprep.mubr.bf16.mxu0 %v10099_v11  ;;  %4902 = vmatprep.mubr.bf16.mxu1 %v10099_v11 }
 0x59d   :  { %4830 = vmatpush1.bf16.msra.mxu0 %v9448_v54  ;;  %4871 = vmatpush1.bf16.msra.mxu1 %v9453_v51 }
 0x59e   :  { %4831 = vmatprep.subr.bf16.mxu0 %v9462_v8  ;;  %4872 = vmatprep.subr.bf16.mxu1 %v9467_v39 }
 0x5a1   :  { %4832 = vmatpush1.bf16.msra.mxu0 %v9472_v36  ;;  %4873 = vmatpush1.bf16.msra.mxu1 %v9477_v32 }
 0x5a2   :  { %4833 = vmatprep.subr.bf16.mxu0 %v9486_v34  ;;  %4874 = vmatprep.subr.bf16.mxu1 %v9491_v23 }
 0x5a5   :  { %4834 = vmatpush1.bf16.msra.mxu0 %v9496_v25  ;;  %4875 = vmatpush1.bf16.msra.mxu1 %v9501_v55 }
 0x5a6   :  { %4835 = vmatprep.subr.bf16.mxu0 %v9510_v52  ;;  %4876 = vmatprep.subr.bf16.mxu1 %v9515_v21 }
 0x5a9   :  { %4836 = vmatpush1.bf16.msra.mxu0 %v9520_v50  ;;  %4877 = vmatpush1.bf16.msra.mxu1 %v9525_v31 }
 0x5aa   :  { %4837 = vmatprep.subr.bf16.mxu0 %v9534_v60  ;;  %4878 = vmatprep.subr.bf16.mxu1 %v9539_v48 }
 0x5ad   :  { %4838 = vmatpush1.bf16.msra.mxu0 %v9544_v33  ;;  %4879 = vmatpush1.bf16.msra.mxu1 %v9549_v28 }
 0x5ae   :  { %4839 = vmatprep.subr.bf16.mxu0 %v9558_v22  ;;  %4880 = vmatprep.subr.bf16.mxu1 %v9563_v29 }
 0x5b1   :  { %4840 = vmatpush1.bf16.msra.mxu0 %v9568_v18  ;;  %4881 = vmatpush1.bf16.msra.mxu1 %v9573_v56 }
 0x5b2   :  { %4841 = vmatprep.subr.bf16.mxu0 %v9582_v57  ;;  %4882 = vmatprep.subr.bf16.mxu1 %v9587_v58 }
 0x5b5   :  { %4842 = vmatpush1.bf16.msra.mxu0 %v9592_v59  ;;  %4883 = vmatpush1.bf16.msra.mxu1 %v9597_v61 }
 0x5b6   :  { %4843 = vmatprep.subr.bf16.mxu0 %v9606_v30  ;;  %4884 = vmatprep.subr.bf16.mxu1 %v9611_v63 }
 0x5b9   :  { %4844 = vmatpush1.bf16.msra.mxu0 %v9616_v0  ;;  %4885 = vmatpush1.bf16.msra.mxu1 %v9621_v2 }
 0x5ba   :  { %5112 = vmatprep.subr.bf16.mxu0 %v9630_v3  ;;  %5153 = vmatprep.subr.bf16.mxu1 %v9635_v26 }
 0x64e   :  { %v4241_v7 = vpop.f32.mrb[72].mxu0  ;;  %v4282_v24 = vpop.f32.mrb[72].mxu1 }
 0x64f   :  { %v4289_v40 = vadd.f32 %v4241_v7, %v10208_v13  ;;  %v4291_v12 = vadd.f32 %v4282_v24, %v10209_v35  ;;  %v4243_v15 = vpop.f32.mrb[73].mxu0  ;;  %v4284_v19 = vpop.f32.mrb[73].mxu1 }
 0x650   :  { %v4290_v53 = vadd.f32 %v4243_v15, %v10210_v20  ;;  %v4292_v5 = vadd.f32 %v4284_v19, %v10211_v14  ;;  %v4245_v49 = vpop.f32.mrb[74].mxu0  ;;  %v4286_v17 = vpop.f32.mrb[74].mxu1 }
 0x651   :  { %v6387_v6 = vmul.f32 -1.442695, %v4289_v40  ;;  %v4246_v38 = vpop.f32.mrb[75].mxu0  ;;  %v4287_v41 = vpop.f32.mrb[75].mxu1 }
 0x652   :  { %v6388_v42 = vmul.f32 -1.442695, %v4290_v53  ;;  %v6389_v43 = vmul.f32 -1.442695, %v4292_v5  ;;  %v10212_v53 = vld [vmem:[#allocation36_spill] sm:$0xff]  ;;  %v10213_v5 = vld [vmem:[#allocation37_spill] sm:$0xff] }
 0x653   :  { %7185 = vpow2.f32 %v6387_v6  ;;  %v10214_v6 = vld [vmem:[#allocation38_spill] sm:$0xff]  ;;  %v10215_v41 = vld [vmem:[#allocation39_spill] sm:$0xff] }
 0x654   :  { %7187 = vpow2.f32 %v6388_v42 }
 0x655   :  { %7189 = vpow2.f32 %v6389_v43 }
 0x656   :  { %7191 = vtanh.f32 %v4291_v12 }
 0x65d   :  { %v7186_v16 = vpop.eup %7185 }
 0x65e   :  { %v7188_v44 = vpop.eup %7187  ;;  %v4579_v45 = vadd.f32 1.0, %v7186_v16 }
 0x65f   :  { %v4585_v46 = vadd.f32 1.0, %v7188_v44  ;;  %v7190_v9 = vpop.eup %7189  ;;  %v9728_v44 = vld [vmem:[%s10013_s6 + $0x64] ss:$16 sps:$4 sm:$0xff]  }
 0x660   :  { %7193 = vrcp.f32 %v4579_v45  ;;  %v7192_v37 = vpop.eup %7191  ;;  %v4592_v40 = vadd.f32 1.0, %v7190_v9 }
 0x661   :  { %7195 = vrcp.f32 %v4585_v46 }
 0x662   :  { %7197 = vrcp.f32 %v4592_v40 }
 0x66a   :  { %v7194_v7 = vpop.eup %7193 }
 0x66b   :  { %v7196_v24 = vpop.eup %7195  ;;  %v4596_v13 = vmul.f32 %v7194_v7, %v7192_v37 }
 0x66c   :  { %v4595_v35 = vmul.f32 %v7196_v24, %v9369_v10  ;;  %v7198_v24 = vpop.eup %7197 }
 0x66e   :  { %v4597_v15 = vadd.f32 %v4596_v13, %v4595_v35  ;;  %v4524_v19 = vpop.f32.mrb[76].mxu0  ;;  %v4565_v20 = vpop.f32.mrb[76].mxu1 }
 0x66f   :  { %v4572_v14 = vadd.f32 %v4524_v19, %v10212_v53  ;;  %v4574_v49 = vadd.f32 %v4565_v20, %v10213_v5  ;;  %v4526_v12 = vpop.f32.mrb[77].mxu0  ;;  %v4567_v17 = vpop.f32.mrb[77].mxu1  ;;  %v9668_v53 = vld [vmem:[%s10013_s6 + $0x8] ss:$16 sps:$4 sm:$0xff]  }
 0x670   :  { %7199 = vtanh.f32 %v4597_v15  ;;  %v4573_v38 = vadd.f32 %v4526_v12, %v10214_v6  ;;  %v4575_v42 = vadd.f32 %v4567_v17, %v10215_v41  ;;  %v4528_v43 = vpop.f32.mrb[78].mxu0  ;;  %v4569_v16 = vpop.f32.mrb[78].mxu1  ;;  %v9651_v45 = vsel %vm2743_vm15, %v4597_v15, %v9369_v10  ;;  %v9663_v15 = vld [vmem:[%s10013_s6] ss:$16 sps:$4 sm:$0xff]   ;;  %v9678_v12 = vld [vmem:[%s10013_s6 + $0x24] ss:$16 sps:$4 sm:$0xff]  }
 0x671   :  { %v6390_v46 = vmul.f32 -1.442695, %v4572_v14  ;;  %v4529_v9 = vpop.f32.mrb[79].mxu0  ;;  %v4570_v37 = vpop.f32.mrb[79].mxu1  ;;  %v9683_v17 = vld [vmem:[%s10013_s6 + $0x2c] ss:$16 sps:$4 sm:$0xff]  }
 0x672   :  { %v6391_v7 = vmul.f32 -1.442695, %v4573_v38  ;;  %v6392_v40 = vmul.f32 -1.442695, %v4575_v42  ;;  %v9690_v38 = vld [vmem:[%s10013_s6 + $0x20] ss:$16 sps:$4 sm:$0xff]  }
 0x673   :  { %7201 = vpow2.f32 %v6390_v46  ;;  %v9695_v41 = vld [vmem:[%s10013_s6 + $0x28] ss:$16 sps:$4 sm:$0xff]   ;;  %v9707_v42 = vld [vmem:[%s10013_s6 + $0x4c] ss:$16 sps:$4 sm:$0xff]   ;;  %v9716_v43 = vld [vmem:[%s10013_s6 + $0x40] ss:$16 sps:$4 sm:$0xff]  }
 0x674   :  { %7203 = vpow2.f32 %v6391_v7  ;;  %v9721_v16 = vld [vmem:[%s10013_s6 + $0x48] ss:$16 sps:$4 sm:$0xff]   ;;  %v9733_v46 = vld [vmem:[%s10013_s6 + $0x6c] ss:$16 sps:$4 sm:$0xff]   ;;  %v9740_v7 = vld [vmem:[%s10013_s6 + $0x60] ss:$16 sps:$4 sm:$0xff]  }
 0x675   :  { %7205 = vpow2.f32 %v6392_v40  ;;  %10217 = vst [vmem:[#allocation63_spill] sm:$0xff] %v9733_v46  ;;  %v9752_v40 = vld [vmem:[%s10013_s6 + $0x84] ss:$16 sps:$4 sm:$0xff]  }
 0x676   :  { %7207 = vtanh.f32 %v4574_v49  ;;  %v9702_v49 = vld [vmem:[%s10013_s6 + $0x44] ss:$16 sps:$4 sm:$0xff]  }
 0x67a   :  { %v7200_v13 = vpop.eup %7199 }
 0x67b   :  { %v4599_v35 = vmul.f32 %v7200_v13, %v7198_v24  ;;  %v9745_v24 = vld [vmem:[%s10013_s6 + $0x68] ss:$16 sps:$4 sm:$0xff]  }
 0x67d   :  { %v7202_v19 = vpop.eup %7201  ;;  %v9656_v20 = vsel %vm2743_vm15, %v4599_v35, %v9374_v62  ;;  %v4628_v10 = vsel %vm2743_vm15, %v4599_v35, 0.0  ;;  %v9757_v35 = vld [vmem:[%s10013_s6 + $0x8c] ss:$16 sps:$4 sm:$0xff]  }
 0x67e   :  { %v7204_v14 = vpop.eup %7203  ;;  %v4603_v5 = vadd.f32 1.0, %v7202_v19  ;;  %6393 = vst [vmem:[%s10017_s8 + $0x50] sm:$0xff] %v4628_v10  ;;  %v4636_v62 = vpack.c.bf16 %v9656_v20, %v9656_v20 }
 0x67f   :  { %v4609_v6 = vadd.f32 1.0, %v7204_v14  ;;  %v7206_v9 = vpop.eup %7205 }
 0x680   :  { %7209 = vrcp.f32 %v4603_v5  ;;  %4862 = vmatmul.mubr.bf16.vlgmr.msra.gmra.mrb[80].mxu0 %v4636_v62  ;;  %4903 = vmatmul.mubr.bf16.vlgmr.msra.gmra.mrb[80].mxu1 %v4636_v62  ;;  %v7208_v37 = vpop.eup %7207  ;;  %v4616_v14 = vadd.f32 1.0, %v7206_v9  ;;  %v9765_v62 = vld [vmem:[%s10013_s6 + $0x80] ss:$16 sps:$4 sm:$0xff]   ;;  %v9777_v9 = vld [vmem:[%s10013_s6 + $0xa4] ss:$16 sps:$4 sm:$0xff]  }
 0x681   :  { %7211 = vrcp.f32 %v4609_v6  ;;  %5113 = vmatpush1.bf16.msra.mxu0 %v9663_v15  ;;  %5154 = vmatpush1.bf16.msra.mxu1 %v9668_v53  ;;  %10218 = vst [vmem:[#allocation64_spill] sm:$0xff] %v9765_v62  ;;  %v9770_v6 = vld [vmem:[%s10013_s6 + $0x88] ss:$16 sps:$4 sm:$0xff]   ;;  %10220 = vst [vmem:[#allocation66_spill] sm:$0xff] %v9777_v9 }
 0x682   :  { %5114 = vmatprep.subr.bf16.mxu0 %v9678_v12  ;;  %5155 = vmatprep.subr.bf16.mxu1 %v9683_v17  ;;  %10219 = vst [vmem:[#allocation65_spill] sm:$0xff] %v9770_v6  ;;  %7213 = vrcp.f32 %v4616_v14  ;;  %v9818_v14 = vld [vmem:[%s10013_s6 + $0xc0] ss:$16 sps:$4 sm:$0xff]  }
 0x683   :  { %5144 = vmatprep.mubr.bf16.mxu0 %v10099_v11  ;;  %5185 = vmatprep.mubr.bf16.mxu1 %v10099_v11  ;;  %10227 = vst [vmem:[#allocation44_spill] sm:$0xff] %v9818_v14 }
 0x685   :  { %5115 = vmatpush1.bf16.msra.mxu0 %v9690_v38  ;;  %5156 = vmatpush1.bf16.msra.mxu1 %v9695_v41 }
 0x686   :  { %5116 = vmatprep.subr.bf16.mxu0 %v9702_v49  ;;  %5157 = vmatprep.subr.bf16.mxu1 %v9707_v42 }
 0x689   :  { %5117 = vmatpush1.bf16.msra.mxu0 %v9716_v43  ;;  %5158 = vmatpush1.bf16.msra.mxu1 %v9721_v16 }
 0x68a   :  { %v7210_v13 = vpop.eup %7209  ;;  %5118 = vmatprep.subr.bf16.mxu0 %v9728_v44  ;;  %5159 = vmatprep.subr.bf16.mxu1 %v9733_v46 }
 0x68b   :  { %v7212_v19 = vpop.eup %7211  ;;  %v4620_v10 = vmul.f32 %v7210_v13, %v7208_v37  ;;  %v9782_v37 = vld [vmem:[%s10013_s6 + $0xac] ss:$16 sps:$4 sm:$0xff]  }
 0x68c   :  { %v4619_v5 = vmul.f32 %v7212_v19, %v9405_v47  ;;  %10221 = vst [vmem:[#allocation67_spill] sm:$0xff] %v9782_v37 }
 0x68d   :  { %5119 = vmatpush1.bf16.msra.mxu0 %v9740_v7  ;;  %5160 = vmatpush1.bf16.msra.mxu1 %v9745_v24 }
 0x68e   :  { %v4621_v46 = vadd.f32 %v4620_v10, %v4619_v5  ;;  %5120 = vmatprep.subr.bf16.mxu0 %v9752_v40  ;;  %5161 = vmatprep.subr.bf16.mxu1 %v9757_v35  ;;  %v9794_v10 = vld [vmem:[%s10013_s6 + $0xa0] ss:$16 sps:$4 sm:$0xff]   ;;  %v9799_v5 = vld [vmem:[%s10013_s6 + $0xa8] ss:$16 sps:$4 sm:$0xff]  }
 0x68f   :  { %10223 = vst [vmem:[#allocation8_spill] sm:$0xff] %v9794_v10  ;;  %10224 = vst [vmem:[#allocation9_spill] sm:$0xff] %v9799_v5 }
 0x690   :  { %7215 = vtanh.f32 %v4621_v46  ;;  %v9787_v19 = vsel %vm2736_vm14, %v4621_v46, %v9405_v47  ;;  %v9806_v47 = vld [vmem:[%s10013_s6 + $0xc4] ss:$16 sps:$4 sm:$0xff]   ;;  %v9811_v46 = vld [vmem:[%s10013_s6 + $0xcc] ss:$16 sps:$4 sm:$0xff]  }
 0x691   :  { %5121 = vmatpush1.bf16.msra.mxu0 %v9765_v62  ;;  %5162 = vmatpush1.bf16.msra.mxu1 %v9770_v6  ;;  %10225 = vst [vmem:[#allocation10_spill] sm:$0xff] %v9806_v47  ;;  %10226 = vst [vmem:[#allocation11_spill] sm:$0xff] %v9811_v46 }
 0x692   :  { %5122 = vmatprep.subr.bf16.mxu0 %v9777_v9  ;;  %5163 = vmatprep.subr.bf16.mxu1 %v9782_v37  ;;  %v9823_v37 = vld [vmem:[%s10013_s6 + $0xc8] ss:$16 sps:$4 sm:$0xff]   ;;  %v7214_v9 = vpop.eup %7213 }
 0x693   :  { %10228 = vst [vmem:[#allocation45_spill] sm:$0xff] %v9823_v37 }
 0x695   :  { %5123 = vmatpush1.bf16.msra.mxu0 %v9794_v10  ;;  %5164 = vmatpush1.bf16.msra.mxu1 %v9799_v5  ;;  %v9830_v10 = vld [vmem:[%s10013_s6 + $0xe4] ss:$16 sps:$4 sm:$0xff]   ;;  %v9835_v5 = vld [vmem:[%s10013_s6 + $0xec] ss:$16 sps:$4 sm:$0xff]  }
 0x696   :  { %5124 = vmatprep.subr.bf16.mxu0 %v9806_v47  ;;  %5165 = vmatprep.subr.bf16.mxu1 %v9811_v46  ;;  %10229 = vst [vmem:[#allocation46_spill] sm:$0xff] %v9835_v5  ;;  %v9842_v47 = vld [vmem:[%s10013_s6 + $0xe0] ss:$16 sps:$4 sm:$0xff]   ;;  %v9847_v46 = vld [vmem:[%s10013_s6 + $0xe8] ss:$16 sps:$4 sm:$0xff]  }
 0x699   :  { %5125 = vmatpush1.bf16.msra.mxu0 %v9818_v14  ;;  %5166 = vmatpush1.bf16.msra.mxu1 %v9823_v37 }
 0x69a   :  { %v7216_v6 = vpop.eup %7215  ;;  %5126 = vmatprep.subr.bf16.mxu0 %v9830_v10  ;;  %5167 = vmatprep.subr.bf16.mxu1 %v9835_v5 }
 0x69b   :  { %v4623_v62 = vmul.f32 %v7216_v6, %v7214_v9 }
 0x69d   :  { %5127 = vmatpush1.bf16.msra.mxu0 %v9842_v47  ;;  %5168 = vmatpush1.bf16.msra.mxu1 %v9847_v46  ;;  %v9856_v37 = vsel %vm2736_vm14, %v4623_v62, %v9424_v1  ;;  %v4630_v14 = vsel %vm2736_vm14, %v4623_v62, 0.0  ;;  %v10235_v62 = vld [vmem:[#allocation33_spill] sm:$0xff] }
 0x69e   :  { %6394 = vst [vmem:[%s10017_s8 + $0x28] sm:$0xff] %v4630_v14  ;;  %v4919_v5 = vpack.c.bf16 %v9856_v37, %v9856_v37  ;;  %5451 = vmatprep.subr.bf16.mxu0 %v9438_v4  ;;  %5492 = vmatprep.subr.bf16.mxu1 %v9443_v27  ;;  %v10230_v27 = vld [vmem:[#allocation20_spill] sm:$0xff] }
 0x6a0   :  { %5145 = vmatmul.mubr.bf16.vlgmr.msra.gmra.mrb[84].mxu0 %v4919_v5  ;;  %5186 = vmatmul.mubr.bf16.vlgmr.msra.gmra.mrb[84].mxu1 %v4919_v5  ;;  %v10236_v5 = vld [vmem:[#allocation34_spill] sm:$0xff] }
 0x6a1   :  { %5452 = vmatpush1.bf16.msra.mxu0 %v9448_v54  ;;  %5493 = vmatpush1.bf16.msra.mxu1 %v9453_v51  ;;  %v10231_v51 = vld [vmem:[#allocation21_spill] sm:$0xff] }
 0x6a2   :  { %5453 = vmatprep.subr.bf16.mxu0 %v9462_v8  ;;  %5494 = vmatprep.subr.bf16.mxu1 %v9467_v39 }
 0x6a3   :  { %5483 = vmatprep.mubr.bf16.mxu0 %v10099_v11  ;;  %5524 = vmatprep.mubr.bf16.mxu1 %v10099_v11 }
 0x6a5   :  { %5454 = vmatpush1.bf16.msra.mxu0 %v9472_v36  ;;  %5495 = vmatpush1.bf16.msra.mxu1 %v9477_v32  ;;  %v10232_v32 = vld [vmem:[#allocation22_spill] sm:$0xff] }
 0x6a6   :  { %5455 = vmatprep.subr.bf16.mxu0 %v9486_v34  ;;  %5496 = vmatprep.subr.bf16.mxu1 %v9491_v23  ;;  %v10233_v23 = vld [vmem:[#allocation23_spill] sm:$0xff] }
 0x6a9   :  { %5456 = vmatpush1.bf16.msra.mxu0 %v9496_v25  ;;  %5497 = vmatpush1.bf16.msra.mxu1 %v9501_v55 }
 0x6aa   :  { %5457 = vmatprep.subr.bf16.mxu0 %v9510_v52  ;;  %5498 = vmatprep.subr.bf16.mxu1 %v9515_v21 }
 0x6ad   :  { %5458 = vmatpush1.bf16.msra.mxu0 %v9520_v50  ;;  %5499 = vmatpush1.bf16.msra.mxu1 %v9525_v31 }
 0x6ae   :  { %5459 = vmatprep.subr.bf16.mxu0 %v9534_v60  ;;  %5500 = vmatprep.subr.bf16.mxu1 %v9539_v48 }
 0x6b1   :  { %5460 = vmatpush1.bf16.msra.mxu0 %v9544_v33  ;;  %5501 = vmatpush1.bf16.msra.mxu1 %v9549_v28 }
 0x6b2   :  { %5461 = vmatprep.subr.bf16.mxu0 %v9558_v22  ;;  %5502 = vmatprep.subr.bf16.mxu1 %v9563_v29 }
 0x6b5   :  { %5462 = vmatpush1.bf16.msra.mxu0 %v9568_v18  ;;  %5503 = vmatpush1.bf16.msra.mxu1 %v9573_v56 }
 0x6b6   :  { %5463 = vmatprep.subr.bf16.mxu0 %v9582_v57  ;;  %5504 = vmatprep.subr.bf16.mxu1 %v9587_v58 }
 0x6b9   :  { %5464 = vmatpush1.bf16.msra.mxu0 %v9592_v59  ;;  %5505 = vmatpush1.bf16.msra.mxu1 %v9597_v61 }
 0x6ba   :  { %5465 = vmatprep.subr.bf16.mxu0 %v9606_v30  ;;  %5506 = vmatprep.subr.bf16.mxu1 %v9611_v63 }
 0x6bd   :  { %5466 = vmatpush1.bf16.msra.mxu0 %v9616_v0  ;;  %5507 = vmatpush1.bf16.msra.mxu1 %v9621_v2 }
 0x6be   :  { %5734 = vmatprep.subr.bf16.mxu0 %v9630_v3  ;;  %5775 = vmatprep.subr.bf16.mxu1 %v9635_v26  ;;  %v10234_v3 = vld [vmem:[#allocation32_spill] sm:$0xff] }
 0x753   :  { %v4863_v1 = vpop.f32.mrb[80].mxu0  ;;  %v4904_v4 = vpop.f32.mrb[80].mxu1 }
 0x754   :  { %v4911_v54 = vadd.f32 %v4863_v1, %v10230_v27  ;;  %v4913_v8 = vadd.f32 %v4904_v4, %v10231_v51  ;;  %v4865_v39 = vpop.f32.mrb[81].mxu0  ;;  %v4906_v36 = vpop.f32.mrb[81].mxu1  ;;  %v10237_v1 = vld [vmem:[#allocation35_spill] sm:$0xff] }
 0x755   :  { %v4912_v34 = vadd.f32 %v4865_v39, %v10232_v32  ;;  %v4914_v25 = vadd.f32 %v4906_v36, %v10233_v23  ;;  %v4867_v55 = vpop.f32.mrb[82].mxu0  ;;  %v4908_v52 = vpop.f32.mrb[82].mxu1 }
 0x756   :  { %v6459_v21 = vmul.f32 -1.442695, %v4911_v54  ;;  %v4868_v50 = vpop.f32.mrb[83].mxu0  ;;  %v4909_v31 = vpop.f32.mrb[83].mxu1 }
 0x757   :  { %v6460_v60 = vmul.f32 -1.442695, %v4912_v34  ;;  %v6461_v48 = vmul.f32 -1.442695, %v4914_v25 }
 0x758   :  { %7217 = vpow2.f32 %v6459_v21 }
 0x759   :  { %7219 = vpow2.f32 %v6460_v60 }
 0x75a   :  { %7221 = vpow2.f32 %v6461_v48 }
 0x75b   :  { %7223 = vtanh.f32 %v4913_v8 }
 0x762   :  { %v7218_v33 = vpop.eup %7217 }
 0x763   :  { %v7220_v28 = vpop.eup %7219  ;;  %v5201_v22 = vadd.f32 1.0, %v7218_v33 }
 0x764   :  { %v5207_v29 = vadd.f32 1.0, %v7220_v28  ;;  %v7222_v18 = vpop.eup %7221  ;;  %v10243_v28 = vld [vmem:[#allocation66_spill] sm:$0xff] }
 0x765   :  { %7225 = vrcp.f32 %v5201_v22  ;;  %v7224_v56 = vpop.eup %7223  ;;  %v5214_v61 = vadd.f32 1.0, %v7222_v18  ;;  %v10248_v22 = vld [vmem:[#allocation11_spill] sm:$0xff]  ;;  %v10249_v18 = vld [vmem:[#allocation44_spill] sm:$0xff] }
 0x766   :  { %7227 = vrcp.f32 %v5207_v29 }
 0x767   :  { %7229 = vrcp.f32 %v5214_v61 }
 0x76f   :  { %v7226_v57 = vpop.eup %7225 }
 0x770   :  { %v7228_v58 = vpop.eup %7227  ;;  %v5218_v59 = vmul.f32 %v7226_v57, %v7224_v56  ;;  %v10251_v57 = vld [vmem:[#allocation46_spill] sm:$0xff] }
 0x771   :  { %v5217_v30 = vmul.f32 %v7228_v58, %v9651_v45  ;;  %v7230_v23 = vpop.eup %7229 }
 0x773   :  { %v5219_v63 = vadd.f32 %v5218_v59, %v5217_v30  ;;  %v5146_v0 = vpop.f32.mrb[84].mxu0  ;;  %v5187_v2 = vpop.f32.mrb[84].mxu1 }
 0x774   :  { %v5194_v26 = vadd.f32 %v5146_v0, %v10234_v3  ;;  %v5196_v6 = vadd.f32 %v5187_v2, %v10235_v62  ;;  %v5148_v9 = vpop.f32.mrb[85].mxu0  ;;  %v5189_v13 = vpop.f32.mrb[85].mxu1  ;;  %v10253_v0 = vld [vmem:[#allocation25_spill] sm:$0xff] }
 0x775   :  { %7231 = vtanh.f32 %v5219_v63  ;;  %v5195_v14 = vadd.f32 %v5148_v9, %v10236_v5  ;;  %v5197_v4 = vadd.f32 %v5189_v13, %v10237_v1  ;;  %v5150_v27 = vpop.f32.mrb[86].mxu0  ;;  %v5191_v54 = vpop.f32.mrb[86].mxu1  ;;  %v9913_v8 = vsel %vm2107_vm13, %v5219_v63, %v9651_v45 }
 0x776   :  { %v6462_v39 = vmul.f32 -1.442695, %v5194_v26  ;;  %v5151_v36 = vpop.f32.mrb[87].mxu0  ;;  %v5192_v32 = vpop.f32.mrb[87].mxu1  ;;  %v10254_v26 = vld [vmem:[#allocation26_spill] sm:$0xff] }
 0x777   :  { %v6463_v34 = vmul.f32 -1.442695, %v5195_v14  ;;  %v6464_v55 = vmul.f32 -1.442695, %v5197_v4 }
 0x778   :  { %7233 = vpow2.f32 %v6462_v39 }
 0x779   :  { %7235 = vpow2.f32 %v6463_v34 }
 0x77a   :  { %7237 = vpow2.f32 %v6464_v55 }
 0x77b   :  { %7239 = vtanh.f32 %v5196_v6  ;;  %v10255_v6 = vld [vmem:[#allocation27_spill] sm:$0xff] }
 0x77f   :  { %v7232_v25 = vpop.eup %7231 }
 0x780   :  { %v5221_v52 = vmul.f32 %v7232_v25, %v7230_v23 }
 0x782   :  { %v7234_v21 = vpop.eup %7233  ;;  %v9918_v50 = vsel %vm2107_vm13, %v5221_v52, %v9656_v20  ;;  %v5250_v45 = vsel %vm2107_vm13, %v5221_v52, 0.0 }
 0x783   :  { %v7236_v31 = vpop.eup %7235  ;;  %v5225_v60 = vadd.f32 1.0, %v7234_v21  ;;  %6465 = vst [vmem:[%s10017_s8 + $0x60] sm:$0xff] %v5250_v45  ;;  %v5258_v48 = vpack.c.bf16 %v9918_v50, %v9918_v50 }
 0x784   :  { %v5231_v33 = vadd.f32 1.0, %v7236_v31  ;;  %v7238_v20 = vpop.eup %7237 }
 0x785   :  { %7241 = vrcp.f32 %v5225_v60  ;;  %5484 = vmatmul.mubr.bf16.vlgmr.msra.gmra.mrb[88].mxu0 %v5258_v48  ;;  %5525 = vmatmul.mubr.bf16.vlgmr.msra.gmra.mrb[88].mxu1 %v5258_v48 }
 0x786   :  { %7243 = vrcp.f32 %v5231_v33  ;;  %5735 = vmatpush1.bf16.msra.mxu0 %v9663_v15  ;;  %5776 = vmatpush1.bf16.msra.mxu1 %v9668_v53  ;;  %v7240_v15 = vpop.eup %7239  ;;  %v10256_v33 = vld [vmem:[#allocation28_spill] sm:$0xff] }
 0x787   :  { %5736 = vmatprep.subr.bf16.mxu0 %v9678_v12  ;;  %5777 = vmatprep.subr.bf16.mxu1 %v9683_v17  ;;  %v10239_v12 = vld [vmem:[#allocation63_spill] sm:$0xff] }
 0x788   :  { %5766 = vmatprep.mubr.bf16.mxu0 %v10099_v11  ;;  %5807 = vmatprep.mubr.bf16.mxu1 %v10099_v11 }
 0x78a   :  { %5737 = vmatpush1.bf16.msra.mxu0 %v9690_v38  ;;  %5778 = vmatpush1.bf16.msra.mxu1 %v9695_v41  ;;  %v5238_v38 = vadd.f32 1.0, %v7238_v20 }
 0x78b   :  { %5738 = vmatprep.subr.bf16.mxu0 %v9702_v49  ;;  %5779 = vmatprep.subr.bf16.mxu1 %v9707_v42 }
 0x78c   :  { %7245 = vrcp.f32 %v5238_v38 }
 0x78e   :  { %5739 = vmatpush1.bf16.msra.mxu0 %v9716_v43  ;;  %5780 = vmatpush1.bf16.msra.mxu1 %v9721_v16  ;;  %v10241_v16 = vld [vmem:[#allocation64_spill] sm:$0xff] }
 0x78f   :  { %v7242_v53 = vpop.eup %7241  ;;  %5740 = vmatprep.subr.bf16.mxu0 %v9728_v44  ;;  %5781 = vmatprep.subr.bf16.mxu1 %v10239_v12  ;;  %v10242_v44 = vld [vmem:[#allocation65_spill] sm:$0xff] }
 0x790   :  { %v7244_v11 = vpop.eup %7243  ;;  %v5242_v17 = vmul.f32 %v7242_v53, %v7240_v15  ;;  %v10257_v15 = vld [vmem:[#allocation29_spill] sm:$0xff] }
 0x791   :  { %v5241_v41 = vmul.f32 %v7244_v11, %v9787_v19 }
 0x792   :  { %5741 = vmatpush1.bf16.msra.mxu0 %v9740_v7  ;;  %5782 = vmatpush1.bf16.msra.mxu1 %v9745_v24  ;;  %v10244_v7 = vld [vmem:[#allocation67_spill] sm:$0xff]  ;;  %v10245_v24 = vld [vmem:[#allocation8_spill] sm:$0xff] }
 0x793   :  { %v5243_v49 = vadd.f32 %v5242_v17, %v5241_v41  ;;  %5742 = vmatprep.subr.bf16.mxu0 %v9752_v40  ;;  %5783 = vmatprep.subr.bf16.mxu1 %v9757_v35  ;;  %v10246_v40 = vld [vmem:[#allocation9_spill] sm:$0xff]  ;;  %v10247_v35 = vld [vmem:[#allocation10_spill] sm:$0xff]  ;;  %v10259_v41 = vld [vmem:[#allocation31_spill] sm:$0xff] }
 0x794   :  { %v10258_v17 = vld [vmem:[#allocation30_spill] sm:$0xff] }
 0x795   :  { %7247 = vtanh.f32 %v5243_v49  ;;  %v9949_v43 = vsel %vm2100_vm12, %v5243_v49, %v9787_v19  ;;  %v10250_v19 = vld [vmem:[#allocation45_spill] sm:$0xff] }
 0x796   :  { %5743 = vmatpush1.bf16.msra.mxu0 %v10241_v16  ;;  %5784 = vmatpush1.bf16.msra.mxu1 %v10242_v44  ;;  %v7246_v29 = vpop.eup %7245 }
 0x797   :  { %5744 = vmatprep.subr.bf16.mxu0 %v10243_v28  ;;  %5785 = vmatprep.subr.bf16.mxu1 %v10244_v7 }
 0x79a   :  { %5745 = vmatpush1.bf16.msra.mxu0 %v10245_v24  ;;  %5786 = vmatpush1.bf16.msra.mxu1 %v10246_v40 }
 0x79b   :  { %5746 = vmatprep.subr.bf16.mxu0 %v10247_v35  ;;  %5787 = vmatprep.subr.bf16.mxu1 %v10248_v22 }
 0x79e   :  { %5747 = vmatpush1.bf16.msra.mxu0 %v10249_v18  ;;  %5788 = vmatpush1.bf16.msra.mxu1 %v10250_v19 }
 0x79f   :  { %v7248_v56 = vpop.eup %7247  ;;  %5748 = vmatprep.subr.bf16.mxu0 %v9830_v10  ;;  %5789 = vmatprep.subr.bf16.mxu1 %v10251_v57 }
 0x7a0   :  { %v5245_v58 = vmul.f32 %v7248_v56, %v7246_v29 }
 0x7a2   :  { %5749 = vmatpush1.bf16.msra.mxu0 %v9842_v47  ;;  %5790 = vmatpush1.bf16.msra.mxu1 %v9847_v46  ;;  %v9968_v59 = vsel %vm2100_vm12, %v5245_v58, %v9856_v37  ;;  %v5252_v61 = vsel %vm2100_vm12, %v5245_v58, 0.0  ;;  %v10252_v46 = vld [vmem:[#allocation24_spill] sm:$0xff] }
 0x7a3   :  { %6466 = vst [vmem:[%s10017_s8 + $0x18] sm:$0xff] %v5252_v61  ;;  %v5541_v10 = vpack.c.bf16 %v9968_v59, %v9968_v59 }
 0x7a5   :  { %5767 = vmatmul.mubr.bf16.vlgmr.msra.gmra.mrb[92].mxu0 %v5541_v10  ;;  %5808 = vmatmul.mubr.bf16.vlgmr.msra.gmra.mrb[92].mxu1 %v5541_v10 }
 0x858   :  { %v5485_v47 = vpop.f32.mrb[88].mxu0  ;;  %v5526_v30 = vpop.f32.mrb[88].mxu1 }
 0x859   :  { %v5533_v63 = vadd.f32 %v5485_v47, %v10252_v46  ;;  %v5535_v2 = vadd.f32 %v5526_v30, %v10253_v0  ;;  %v5487_v37 = vpop.f32.mrb[89].mxu0  ;;  %v5528_v3 = vpop.f32.mrb[89].mxu1 }
 0x85a   :  { %v5534_v62 = vadd.f32 %v5487_v37, %v10254_v26  ;;  %v5536_v9 = vadd.f32 %v5528_v3, %v10255_v6  ;;  %v5489_v13 = vpop.f32.mrb[90].mxu0  ;;  %v5530_v5 = vpop.f32.mrb[90].mxu1 }
 0x85b   :  { %v6531_v14 = vmul.f32 -1.442695, %v5533_v63  ;;  %v5490_v1 = vpop.f32.mrb[91].mxu0  ;;  %v5531_v4 = vpop.f32.mrb[91].mxu1 }
 0x85c   :  { %v6532_v27 = vmul.f32 -1.442695, %v5534_v62  ;;  %v6533_v54 = vmul.f32 -1.442695, %v5536_v9 }
 0x85d   :  { %7249 = vpow2.f32 %v6531_v14 }
 0x85e   :  { %7251 = vpow2.f32 %v6532_v27 }
 0x85f   :  { %7253 = vpow2.f32 %v6533_v54 }
 0x860   :  { %7255 = vtanh.f32 %v5535_v2 }
 0x867   :  { %v7250_v51 = vpop.eup %7249 }
 0x868   :  { %v7252_v39 = vpop.eup %7251  ;;  %v5823_v36 = vadd.f32 1.0, %v7250_v51 }
 0x869   :  { %v5829_v32 = vadd.f32 1.0, %v7252_v39  ;;  %v7254_v34 = vpop.eup %7253 }
 0x86a   :  { %7257 = vrcp.f32 %v5823_v36  ;;  %v7256_v23 = vpop.eup %7255  ;;  %v5836_v21 = vadd.f32 1.0, %v7254_v34 }
 0x86b   :  { %7259 = vrcp.f32 %v5829_v32 }
 0x86c   :  { %7261 = vrcp.f32 %v5836_v21 }
 0x874   :  { %v7258_v25 = vpop.eup %7257 }
 0x875   :  { %v7260_v55 = vpop.eup %7259  ;;  %v5840_v52 = vmul.f32 %v7258_v25, %v7256_v23 }
 0x876   :  { %v5839_v45 = vmul.f32 %v7260_v55, %v9913_v8  ;;  %v7262_v24 = vpop.eup %7261 }
 0x878   :  { %v5841_v31 = vadd.f32 %v5840_v52, %v5839_v45  ;;  %v5768_v60 = vpop.f32.mrb[92].mxu0  ;;  %v5809_v48 = vpop.f32.mrb[92].mxu1 }
 0x879   :  { %v5816_v20 = vadd.f32 %v5768_v60, %v10256_v33  ;;  %v5818_v53 = vadd.f32 %v5809_v48, %v10257_v15  ;;  %v5770_v12 = vpop.f32.mrb[93].mxu0  ;;  %v5811_v11 = vpop.f32.mrb[93].mxu1 }
 0x87a   :  { %7263 = vtanh.f32 %v5841_v31  ;;  %v5817_v38 = vadd.f32 %v5770_v12, %v10258_v17  ;;  %v5819_v49 = vadd.f32 %v5811_v11, %v10259_v41  ;;  %v5772_v42 = vpop.f32.mrb[94].mxu0  ;;  %v5813_v16 = vpop.f32.mrb[94].mxu1 }
 0x87b   :  { %v6534_v44 = vmul.f32 -1.442695, %v5816_v20  ;;  %v5773_v28 = vpop.f32.mrb[95].mxu0  ;;  %v5814_v8 = vpop.f32.mrb[95].mxu1 }
 0x87c   :  { %v6535_v7 = vmul.f32 -1.442695, %v5817_v38  ;;  %v6536_v35 = vmul.f32 -1.442695, %v5819_v49 }
 0x87d   :  { %7265 = vpow2.f32 %v6534_v44 }
 0x87e   :  { %7267 = vpow2.f32 %v6535_v7 }
 0x87f   :  { %7269 = vpow2.f32 %v6536_v35 }
 0x880   :  { %7271 = vtanh.f32 %v5818_v53 }
 0x884   :  { %v7264_v40 = vpop.eup %7263 }
 0x885   :  { %v5843_v22 = vmul.f32 %v7264_v40, %v7262_v24 }
 0x887   :  { %v7266_v29 = vpop.eup %7265  ;;  %v5868_v19 = vsel %vm1474_vm10, %v5843_v22, %v9918_v50  ;;  %v5870_v56 = vsel %vm1474_vm10, %v5843_v22, 0.0 }
 0x888   :  { %v7268_v57 = vpop.eup %7267  ;;  %6537 = vst [vmem:[%s10017_s8 + $0x70] sm:$0xff] %v5870_v56  ;;  %5874 = vst [vmem:[%s10018_s9] sm:$0xff] %v5868_v19  ;;  %v5847_v58 = vadd.f32 1.0, %v7266_v29 }
 0x889   :  { %v5853_v61 = vadd.f32 1.0, %v7268_v57  ;;  %v7270_v10 = vpop.eup %7269 }
 0x88a   :  { %7273 = vrcp.f32 %v5847_v58  ;;  %v7272_v50 = vpop.eup %7271  ;;  %v5860_v63 = vadd.f32 1.0, %v7270_v10 }
 0x88b   :  { %7275 = vrcp.f32 %v5853_v61 }
 0x88c   :  { %7277 = vrcp.f32 %v5860_v63 }
 0x894   :  { %v7274_v47 = vpop.eup %7273 }
 0x895   :  { %v7276_v30 = vpop.eup %7275  ;;  %v5864_v46 = vmul.f32 %v7274_v47, %v7272_v50 }
 0x896   :  { %v5863_v0 = vmul.f32 %v7276_v30, %v9949_v43  ;;  %v7278_v37 = vpop.eup %7277 }
 0x898   :  { %v5865_v2 = vadd.f32 %v5864_v46, %v5863_v0 }
 0x89a   :  { %7279 = vtanh.f32 %v5865_v2 }
 0x8a4   :  { %v7280_v3 = vpop.eup %7279 }
 0x8a5   :  { %v5867_v26 = vmul.f32 %v7280_v3, %v7278_v37 }
 0x8a7   :  { %v5869_v6 = vsel %vm1467_vm8, %v5867_v26, %v9968_v59  ;;  %v5872_v9 = vsel %vm1467_vm8, %v5867_v26, 0.0 }
 0x8a8   :  { %5873 = vst [vmem:[%s10017_s8 + $0x8] sm:$0xff] %v5872_v9  ;;  %5875 = vst [vmem:[%s10018_s9 + $0x8] sm:$0xff] %v5869_v6 }

</bundles_post_ra>
